<compile_context>
chip_gen: v5e
topology: v5e:2x2
jax: 0.10.0
libtpu: 0.0.40
codegen_flags: <defaults>
</compile_context>

<pallas_src>
import math

import jax
import jax.numpy as jnp
from jax import lax
from jax.experimental import pallas as pl
from jax.experimental.pallas import tpu as pltpu


# Default FeatureExtractor config: in_chans=1, dropout=0, conv_bias=False.
DEFAULT_CONV_LAYERS = ((128, 10, 5), (128, 3, 2), (128, 3, 2), (128, 2, 2))
GN_EPS = 1e-5
_INV_SQRT2 = 0.7071067811865476


def _erf_approx(z):
    # Abramowitz & Stegun 7.1.26 (|error| <= 1.5e-7); uses exp (EUP) only.
    za = jnp.abs(z)
    t = 1.0 / (1.0 + 0.3275911 * za)
    poly = t * (0.254829592 + t * (-0.284496736 + t * (1.421413741 +
               t * (-1.453152027 + t * 1.061405429))))
    e = 1.0 - poly * jnp.exp(-(za * za))
    return jnp.where(z < 0.0, -e, e)


def _gelu(v):
    # nn.GELU() default == exact erf-based GELU.
    return 0.5 * v * (1.0 + _erf_approx(v * _INV_SQRT2))


def _conv_out_len(l_in, ks, st):
    pad = (ks - 1) // 2
    return (l_in + 2 * pad - ks) // st + 1


# --------------------------------- kernel ------------------------------------

def _make_kernel(conv_layers, l_ins, l_outs, bb, q0, s0, cdt):
    """Per-grid-step kernel: `bb` batch elements through the whole conv stack."""
    n_layers = len(conv_layers)
    n_rest = n_layers - 1
    c0 = conv_layers[0][0]
    L0 = l_outs[0]

    def kernel(xr_ref, w0_ref, gnw_ref, gnb_ref, *rest):
        w_refs = rest[:n_rest]
        out_ref = rest[n_rest]
        bufs = rest[n_rest + 1:]

        # ---- layer 0: Conv(k0, s0, C_in=1) as q0 accumulated MXU dots --------
        # xr_ref: (bb, rows, s0); window i == rows i .. i+q0-1 flattened.
        y = jnp.zeros((bb * L0, c0), jnp.float32)
        for j in range(q0):                                    # static unroll
            pj = xr_ref[:, pl.ds(j, L0), :].reshape(bb * L0, s0).astype(cdt)
            y = y + jnp.dot(pj, w0_ref[pl.ds(j * s0, s0), :],
                            preferred_element_type=jnp.float32)
        y = y.reshape(bb, L0, c0)

        # ---- GroupNorm(C, C): per-(sample, channel) over time, single pass ----
        inv_n = 1.0 / L0
        mean = jnp.sum(y, axis=1, keepdims=True) * inv_n
        var = jnp.sum(y * y, axis=1, keepdims=True) * inv_n - mean * mean
        y = (y - mean) * (lax.rsqrt(var + GN_EPS) * gnw_ref[...]) + gnb_ref[...]

        act = _gelu(y)                                         # (bb, L0, C) f32

        # ---- layers 1..: strided conv as one fused contraction per layer -----
        for li in range(1, n_layers):
            c_out, ks, st = conv_layers[li]
            c_in = conv_layers[li - 1][0]
            pad = (ks - 1) // 2
            l_in, l_out = l_ins[li], l_outs[li]
            buf = bufs[li - 1]                  # (bb, l_in + 2*pad, c_in) f32

            if pad > 0:                          # zero only the halo rows
                zp = jnp.zeros((bb, pad, c_in), jnp.float32)
                buf[:, pl.ds(0, pad), :] = zp
                buf[:, pl.ds(pad + l_in, pad), :] = zp
            buf[:, pl.ds(pad, l_in), :] = act    # interior rows

            rows = []
            for b in range(bb):                  # static unroll, 2-D ref views
                view = buf.at[b]                 # (l_in + 2*pad, c_in)
                taps = []
                for k in range(ks):
                    idx = pl.ds(k, l_out, stride=st) if st > 1 else pl.ds(k, l_out)
                    taps.append(view[idx, :])    # (l_out, c_in)
                # lane concat of 128-wide pieces -> (l_out, ks*c_in)
                rows.append(jnp.concatenate(taps, axis=-1))
            xc = jnp.concatenate(rows, axis=0).astype(cdt)     # (bb*l_out, ks*c_in)

            y = jnp.dot(xc, w_refs[li - 1][...],
                        preferred_element_type=jnp.float32)    # (bb*l_out, c_out)
            act = _gelu(y).reshape(bb, l_out, c_out)           # norm==Identity li>=1

        out_ref[...] = act.astype(out_ref.dtype)               # lane-dense (bb,L,C)

    return kernel


# -------------------------------- wrapper -------------------------------------

def feature_extractor(x, params, *, conv_layers=DEFAULT_CONV_LAYERS,
                      compute_dtype=jnp.bfloat16, batch_block=2):
    """x: (B, in_chans=1, T, 1) -- PyTorch NCHW layout with W == 1."""
    conv_layers = list(conv_layers)
    B, in_ch, T, W = x.shape
    assert in_ch == 1 and W == 1, "layer-0 im2col path assumes in_chans == 1"
    bb = max(1, min(batch_block, B))
    while B % bb:
        bb -= 1

    x1d = x.reshape(B, T).astype(jnp.float32)

    l_ins, l_outs, l = [], [], T
    for (_c, ks, st) in conv_layers:
        l_ins.append(l)
        l = _conv_out_len(l, ks, st)
        l_outs.append(l)

    c0, k0, s0 = conv_layers[0]
    pad0 = (k0 - 1) // 2
    q0 = -(-k0 // s0)                                   # rows touched per window
    L0 = l_outs[0]
    rows_total = max(L0 - 1 + q0, -(-(pad0 + T) // s0))
    total_len = rows_total * s0
    # Pure layout plumbing: pad + reshape (no gather, no im2col bloat).
    xr = jnp.pad(x1d, ((0, 0), (pad0, total_len - pad0 - T))).reshape(
        B, rows_total, s0)

    # Weights (PyTorch layouts -> kernel layouts).
    w0 = params['conv0_w'][:, 0, :, 0].T                           # (k0, C0)
    w0p = jnp.pad(w0, ((0, q0 * s0 - k0), (0, 0))).astype(compute_dtype)
    gnw = params['gn_w'].reshape(1, c0).astype(jnp.float32)
    gnb = params['gn_b'].reshape(1, c0).astype(jnp.float32)
    rest_w = []
    for i in range(1, len(conv_layers)):
        c_out, ks, _st = conv_layers[i]
        c_in = conv_layers[i - 1][0]
        wi = params[f'conv{i}_w'][..., 0]                          # (C_out, C_in, ks)
        wi = jnp.transpose(wi, (2, 1, 0)).reshape(ks * c_in, c_out)
        rest_w.append(wi.astype(compute_dtype))                    # (ks*C_in, C_out)

    kernel = _make_kernel(conv_layers, l_ins, l_outs, bb, q0, s0, compute_dtype)

    def _full(a):   # whole-array block, constant index map -> stays VMEM-resident
        return pl.BlockSpec(a.shape, lambda g: (0, 0))

    in_specs = [pl.BlockSpec((bb, rows_total, s0), lambda g: (g, 0, 0)),
                _full(w0p), _full(gnw), _full(gnb)]
    in_specs += [_full(w) for w in rest_w]

    c_last = conv_layers[-1][0]
    out_specs = pl.BlockSpec((bb, l_outs[-1], c_last), lambda g: (g, 0, 0))
    out_shape = jax.ShapeDtypeStruct((B, l_outs[-1], c_last), jnp.float32)

    scratch = []
    for i in range(1, len(conv_layers)):
        ks = conv_layers[i][1]
        pad = (ks - 1) // 2
        c_in = conv_layers[i - 1][0]
        scratch.append(pltpu.VMEM((bb, l_ins[i] + 2 * pad, c_in), jnp.float32))

    flops = 2 * B * sum(
        l_outs[i] * conv_layers[i][1] * (1 if i == 0 else conv_layers[i - 1][0])
        * conv_layers[i][0] for i in range(len(conv_layers)))
    trans = B * sum(l_outs[i] * conv_layers[i][0] for i in range(len(conv_layers)))
    bytes_acc = int(xr.size * 4 + B * l_outs[-1] * c_last * 4
                    + sum(w.size * w.dtype.itemsize
                          for w in [w0p, gnw, gnb] + rest_w))

    return pl.pallas_call(
        kernel,
        out_shape=out_shape,
        grid_spec=pltpu.PrefetchScalarGridSpec(
            num_scalar_prefetch=0,
            grid=(B // bb,),
            in_specs=in_specs,
            out_specs=out_specs,
            scratch_shapes=scratch,
        ),
        compiler_params=pltpu.CompilerParams(
            dimension_semantics=("parallel",)),
        cost_estimate=pl.CostEstimate(flops=flops, transcendentals=trans,
                                      bytes_accessed=bytes_acc),
    )(xr, w0p, gnw, gnb, *rest_w)


# --------------------------- pure-JAX reference --------------------------------

def reference(x, params, conv_layers=DEFAULT_CONV_LAYERS):
    conv_layers = list(conv_layers)
    B = x.shape[0]
    h = x[..., 0].astype(jnp.float32)                         # (B, C_in, T)
    for i, (c_out, ks, st) in enumerate(conv_layers):
        w = params[f'conv{i}_w'][..., 0].astype(jnp.float32)  # (C_out, C_in, ks)
        pad = (ks - 1) // 2
        h = lax.conv_general_dilated(
            h, w, window_strides=(st,), padding=[(pad, pad)],
            dimension_numbers=('NCH', 'OIH', 'NCH'),
            precision=lax.Precision.HIGHEST)
        if i == 0:  # GroupNorm(C, C): per-channel stats over time, then affine
            mu = jnp.mean(h, axis=-1, keepdims=True)
            var = jnp.mean((h - mu) ** 2, axis=-1, keepdims=True)
            h = (h - mu) * lax.rsqrt(var + GN_EPS)
            h = h * params['gn_w'].reshape(1, -1, 1) + params['gn_b'].reshape(1, -1, 1)
        h = jax.nn.gelu(h, approximate=False)                 # exact erf GELU
    return jnp.transpose(h, (0, 2, 1))                        # (B, L_final, C)


# ----------------------------------- main ---------------------------------------

if __name__ == "__main__":
    conv_layers = list(DEFAULT_CONV_LAYERS)
    B, T = 8, 320                      # output: (8, 8, 128)

    key = jax.random.PRNGKey(0)
    keys = jax.random.split(key, len(conv_layers) + 3)

    params = {}
    c_in = 1
    for i, (c_out, ks, st) in enumerate(conv_layers):
        fan_in = c_in * ks
        params[f'conv{i}_w'] = (jax.random.normal(
            keys[i], (c_out, c_in, ks, 1), jnp.float32) / math.sqrt(fan_in))
        c_in = c_out
    params['gn_w'] = 1.0 + 0.1 * jax.random.normal(keys[-3], (conv_layers[0][0],),
                                                   jnp.float32)
    params['gn_b'] = 0.1 * jax.random.normal(keys[-2], (conv_layers[0][0],),
                                             jnp.float32)

    x = jax.random.normal(keys[-1], (B, 1, T, 1), jnp.float32)   # NCHW, W=1

    ref = reference(x, params, conv_layers)
    assert ref.shape == (B, 8, 128), ref.shape

    # Structure / indexing check: f32 MXU operands vs independent XLA conv ref.
    out_f32 = jax.block_until_ready(
        feature_extractor(x, params, conv_layers=conv_layers,
                          compute_dtype=jnp.float32, batch_block=2))
    assert out_f32.shape == ref.shape, (out_f32.shape, ref.shape)
    err = float(jnp.max(jnp.abs(out_f32 - ref)))
    assert err < 5e-3, err

    # Performance path: bf16 MXU operands, f32 GroupNorm / GELU / accumulation.
    out_bf16 = jax.block_until_ready(
        feature_extractor(x, params, conv_layers=conv_layers,
                          compute_dtype=jnp.bfloat16, batch_block=2))
    err_bf = float(jnp.max(jnp.abs(out_bf16 - ref)))
    assert err_bf < 1e-1, err_bf

    print("KERNEL_OK")
</pallas_src>

<mosaic_0001>
module attributes {stable_mosaic.version = 11 : i64} {
  func.func @kernel(%arg0: i32, %arg1: memref<2x65x5xf32, #tpu.memory_space<vmem>>, %arg2: memref<10x128xf32, #tpu.memory_space<vmem>>, %arg3: memref<1x128xf32, #tpu.memory_space<vmem>>, %arg4: memref<1x128xf32, #tpu.memory_space<vmem>>, %arg5: memref<384x128xf32, #tpu.memory_space<vmem>>, %arg6: memref<384x128xf32, #tpu.memory_space<vmem>>, %arg7: memref<256x128xf32, #tpu.memory_space<vmem>>, %arg8: memref<2x8x128xf32, #tpu.memory_space<vmem>>, %arg9: memref<2x66x128xf32, #tpu.memory_space<vmem>>, %arg10: memref<2x34x128xf32, #tpu.memory_space<vmem>>, %arg11: memref<2x16x128xf32, #tpu.memory_space<vmem>>) attributes {dimension_semantics = [#tpu.dimension_semantics<parallel>], iteration_bounds = array<i64: 4>, scalar_prefetch = 0 : i64, scratch_operands = 3 : i64, tpu.core_type = #tpu.core_type<tc>, window_params = [{transform_indices = @transform_0, window_bounds = array<i64: 2, 65, 5>}, {pipeline_mode = #tpu.pipeline_mode<synchronous>, transform_indices = @transform_1, window_bounds = array<i64: 10, 128>}, {pipeline_mode = #tpu.pipeline_mode<synchronous>, transform_indices = @transform_2, window_bounds = array<i64: 1, 128>}, {pipeline_mode = #tpu.pipeline_mode<synchronous>, transform_indices = @transform_3, window_bounds = array<i64: 1, 128>}, {pipeline_mode = #tpu.pipeline_mode<synchronous>, transform_indices = @transform_4, window_bounds = array<i64: 384, 128>}, {pipeline_mode = #tpu.pipeline_mode<synchronous>, transform_indices = @transform_5, window_bounds = array<i64: 384, 128>}, {pipeline_mode = #tpu.pipeline_mode<synchronous>, transform_indices = @transform_6, window_bounds = array<i64: 256, 128>}, {transform_indices = @transform_7, window_bounds = array<i64: 2, 8, 128>}]} {
    %cst = arith.constant 0.000000e+00 : f32
    %0 = vector.broadcast %cst : f32 to vector<128x128xf32>
    %c0 = arith.constant 0 : index
    %c0_0 = arith.constant 0 : index
    %c0_1 = arith.constant 0 : index
    %1 = vector.load %arg1[%c0, %c0_0, %c0_1] : memref<2x65x5xf32, #tpu.memory_space<vmem>>, vector<2x64x5xf32>
    %2 = vector.shape_cast %1 : vector<2x64x5xf32> to vector<128x5xf32>
    %c0_2 = arith.constant 0 : index
    %c0_3 = arith.constant 0 : index
    %3 = vector.load %arg2[%c0_2, %c0_3] : memref<10x128xf32, #tpu.memory_space<vmem>>, vector<5x128xf32>
    %cst_4 = arith.constant dense<0.000000e+00> : vector<128x128xf32>
    %4 = tpu.matmul %2, %3, %cst_4 {dimension_numbers = #tpu.dot_dimension_numbers<[1], [0], [0], [1], [0, 0, 1, 1], [], []>} : vector<128x5xf32>, vector<5x128xf32>, vector<128x128xf32> -> vector<128x128xf32>
    %5 = arith.addf %0, %4 : vector<128x128xf32>
    %c0_5 = arith.constant 0 : index
    %c1 = arith.constant 1 : index
    %c0_6 = arith.constant 0 : index
    %6 = vector.load %arg1[%c0_5, %c1, %c0_6] : memref<2x65x5xf32, #tpu.memory_space<vmem>>, vector<2x64x5xf32>
    %7 = vector.shape_cast %6 : vector<2x64x5xf32> to vector<128x5xf32>
    %c5 = arith.constant 5 : index
    %c0_7 = arith.constant 0 : index
    %8 = vector.load %arg2[%c5, %c0_7] : memref<10x128xf32, #tpu.memory_space<vmem>>, vector<5x128xf32>
    %cst_8 = arith.constant dense<0.000000e+00> : vector<128x128xf32>
    %9 = tpu.matmul %7, %8, %cst_8 {dimension_numbers = #tpu.dot_dimension_numbers<[1], [0], [0], [1], [0, 0, 1, 1], [], []>} : vector<128x5xf32>, vector<5x128xf32>, vector<128x128xf32> -> vector<128x128xf32>
    %10 = arith.addf %5, %9 : vector<128x128xf32>
    %11 = vector.shape_cast %10 : vector<128x128xf32> to vector<2x64x128xf32>
    %cst_9 = arith.constant dense<0.000000e+00> : vector<2x128xf32>
    %12 = vector.multi_reduction <add>, %11, %cst_9 [1] : vector<2x64x128xf32> to vector<2x128xf32>
    %13 = vector.shape_cast %12 : vector<2x128xf32> to vector<2x1x128xf32>
    %cst_10 = arith.constant 1.562500e-02 : f32
    %14 = vector.broadcast %cst_10 : f32 to vector<2x1x128xf32>
    %15 = arith.mulf %13, %14 : vector<2x1x128xf32>
    %16 = arith.mulf %11, %11 : vector<2x64x128xf32>
    %cst_11 = arith.constant dense<0.000000e+00> : vector<2x128xf32>
    %17 = vector.multi_reduction <add>, %16, %cst_11 [1] : vector<2x64x128xf32> to vector<2x128xf32>
    %18 = vector.shape_cast %17 : vector<2x128xf32> to vector<2x1x128xf32>
    %cst_12 = arith.constant 1.562500e-02 : f32
    %19 = vector.broadcast %cst_12 : f32 to vector<2x1x128xf32>
    %20 = arith.mulf %18, %19 : vector<2x1x128xf32>
    %21 = arith.mulf %15, %15 : vector<2x1x128xf32>
    %22 = arith.subf %20, %21 : vector<2x1x128xf32>
    %23 = vector.broadcast %15 : vector<2x1x128xf32> to vector<2x64x128xf32>
    %24 = arith.subf %11, %23 : vector<2x64x128xf32>
    %cst_13 = arith.constant 9.99999974E-6 : f32
    %25 = vector.broadcast %cst_13 : f32 to vector<2x1x128xf32>
    %26 = arith.addf %22, %25 : vector<2x1x128xf32>
    %27 = math.rsqrt %26 : vector<2x1x128xf32>
    %c0_14 = arith.constant 0 : index
    %c0_15 = arith.constant 0 : index
    %28 = vector.load %arg3[%c0_14, %c0_15] : memref<1x128xf32, #tpu.memory_space<vmem>>, vector<1x128xf32>
    %29 = vector.shape_cast %28 : vector<1x128xf32> to vector<1x1x128xf32>
    %30 = vector.broadcast %29 : vector<1x1x128xf32> to vector<2x1x128xf32>
    %31 = arith.mulf %27, %30 : vector<2x1x128xf32>
    %32 = vector.broadcast %31 : vector<2x1x128xf32> to vector<2x64x128xf32>
    %33 = arith.mulf %24, %32 : vector<2x64x128xf32>
    %c0_16 = arith.constant 0 : index
    %c0_17 = arith.constant 0 : index
    %34 = vector.load %arg4[%c0_16, %c0_17] : memref<1x128xf32, #tpu.memory_space<vmem>>, vector<1x128xf32>
    %35 = vector.shape_cast %34 : vector<1x128xf32> to vector<1x1x128xf32>
    %36 = vector.broadcast %35 : vector<1x1x128xf32> to vector<2x64x128xf32>
    %37 = arith.addf %33, %36 : vector<2x64x128xf32>
    %cst_18 = arith.constant 5.000000e-01 : f32
    %38 = vector.broadcast %cst_18 : f32 to vector<2x64x128xf32>
    %39 = arith.mulf %38, %37 : vector<2x64x128xf32>
    %cst_19 = arith.constant 0.707106769 : f32
    %40 = vector.broadcast %cst_19 : f32 to vector<2x64x128xf32>
    %41 = arith.mulf %37, %40 : vector<2x64x128xf32>
    %42 = math.absf %41 : vector<2x64x128xf32>
    %cst_20 = arith.constant 0.327591091 : f32
    %43 = vector.broadcast %cst_20 : f32 to vector<2x64x128xf32>
    %44 = arith.mulf %43, %42 : vector<2x64x128xf32>
    %cst_21 = arith.constant 1.000000e+00 : f32
    %45 = vector.broadcast %cst_21 : f32 to vector<2x64x128xf32>
    %46 = arith.addf %45, %44 : vector<2x64x128xf32>
    %cst_22 = arith.constant 1.000000e+00 : f32
    %47 = vector.broadcast %cst_22 : f32 to vector<2x64x128xf32>
    %48 = arith.divf %47, %46 : vector<2x64x128xf32>
    %cst_23 = arith.constant 1.06140542 : f32
    %49 = vector.broadcast %cst_23 : f32 to vector<2x64x128xf32>
    %50 = arith.mulf %48, %49 : vector<2x64x128xf32>
    %cst_24 = arith.constant -1.45315206 : f32
    %51 = vector.broadcast %cst_24 : f32 to vector<2x64x128xf32>
    %52 = arith.addf %51, %50 : vector<2x64x128xf32>
    %53 = arith.mulf %48, %52 : vector<2x64x128xf32>
    %cst_25 = arith.constant 1.42141378 : f32
    %54 = vector.broadcast %cst_25 : f32 to vector<2x64x128xf32>
    %55 = arith.addf %54, %53 : vector<2x64x128xf32>
    %56 = arith.mulf %48, %55 : vector<2x64x128xf32>
    %cst_26 = arith.constant -0.284496725 : f32
    %57 = vector.broadcast %cst_26 : f32 to vector<2x64x128xf32>
    %58 = arith.addf %57, %56 : vector<2x64x128xf32>
    %59 = arith.mulf %48, %58 : vector<2x64x128xf32>
    %cst_27 = arith.constant 0.254829586 : f32
    %60 = vector.broadcast %cst_27 : f32 to vector<2x64x128xf32>
    %61 = arith.addf %60, %59 : vector<2x64x128xf32>
    %62 = arith.mulf %48, %61 : vector<2x64x128xf32>
    %63 = arith.mulf %42, %42 : vector<2x64x128xf32>
    %cst_28 = arith.constant 0.000000e+00 : f32
    %64 = vector.broadcast %cst_28 : f32 to vector<2x64x128xf32>
    %65 = arith.subf %64, %63 : vector<2x64x128xf32>
    %66 = math.exp %65 : vector<2x64x128xf32>
    %67 = arith.mulf %62, %66 : vector<2x64x128xf32>
    %cst_29 = arith.constant 1.000000e+00 : f32
    %68 = vector.broadcast %cst_29 : f32 to vector<2x64x128xf32>
    %69 = arith.subf %68, %67 : vector<2x64x128xf32>
    %cst_30 = arith.constant 0.000000e+00 : f32
    %70 = vector.broadcast %cst_30 : f32 to vector<2x64x128xf32>
    %71 = arith.cmpf olt, %41, %70 : vector<2x64x128xf32>
    %cst_31 = arith.constant 0.000000e+00 : f32
    %72 = vector.broadcast %cst_31 : f32 to vector<2x64x128xf32>
    %73 = arith.subf %72, %69 : vector<2x64x128xf32>
    %74 = arith.select %71, %73, %69 : vector<2x64x128xi1>, vector<2x64x128xf32>
    %cst_32 = arith.constant 1.000000e+00 : f32
    %75 = vector.broadcast %cst_32 : f32 to vector<2x64x128xf32>
    %76 = arith.addf %75, %74 : vector<2x64x128xf32>
    %77 = arith.mulf %39, %76 : vector<2x64x128xf32>
    %cst_33 = arith.constant 0.000000e+00 : f32
    %78 = vector.broadcast %cst_33 : f32 to vector<2x1x128xf32>
    %c0_34 = arith.constant 0 : index
    %c0_35 = arith.constant 0 : index
    %c0_36 = arith.constant 0 : index
    %79 = vector.load %arg9[%c0_34, %c0_35, %c0_36] : memref<2x66x128xf32, #tpu.memory_space<vmem>>, vector<2x1x128xf32>
    tpu.vector_store %arg9[%c0_34, %c0_35, %c0_36], %78 {strides = array<i32>} : memref<2x66x128xf32, #tpu.memory_space<vmem>>, vector<2x1x128xf32>,
    %c0_37 = arith.constant 0 : index
    %c65 = arith.constant 65 : index
    %c0_38 = arith.constant 0 : index
    %80 = vector.load %arg9[%c0_37, %c65, %c0_38] : memref<2x66x128xf32, #tpu.memory_space<vmem>>, vector<2x1x128xf32>
    tpu.vector_store %arg9[%c0_37, %c65, %c0_38], %78 {strides = array<i32>} : memref<2x66x128xf32, #tpu.memory_space<vmem>>, vector<2x1x128xf32>,
    %c0_39 = arith.constant 0 : index
    %c1_40 = arith.constant 1 : index
    %c0_41 = arith.constant 0 : index
    %81 = vector.load %arg9[%c0_39, %c1_40, %c0_41] : memref<2x66x128xf32, #tpu.memory_space<vmem>>, vector<2x64x128xf32>
    tpu.vector_store %arg9[%c0_39, %c1_40, %c0_41], %77 {strides = array<i32>} : memref<2x66x128xf32, #tpu.memory_space<vmem>>, vector<2x64x128xf32>,
    %c0_i32 = arith.constant 0 : i32
    %c0_i32_42 = arith.constant 0 : i32
    %c0_i32_43 = arith.constant 0 : i32
    %82 = tpu.memref_slice %arg9[%c0_i32, %c0_i32_42, %c0_i32_43] : memref<2x66x128xf32, #tpu.memory_space<vmem>> -> memref<1x66x128xf32, #tpu.memory_space<vmem>>
    %83 = tpu.memref_squeeze %82 : memref<1x66x128xf32, #tpu.memory_space<vmem>> -> memref<66x128xf32, #tpu.memory_space<vmem>>
    %c0_44 = arith.constant 0 : index
    %c0_45 = arith.constant 0 : index
    %84 = tpu.strided_load %83[%c0_44, %c0_45] {strides = array<i32: 2, 1>} : memref<66x128xf32, #tpu.memory_space<vmem>>, vector<32x128xf32>
    %c0_i32_46 = arith.constant 0 : i32
    %c0_i32_47 = arith.constant 0 : i32
    %c0_i32_48 = arith.constant 0 : i32
    %85 = tpu.memref_slice %arg9[%c0_i32_46, %c0_i32_47, %c0_i32_48] : memref<2x66x128xf32, #tpu.memory_space<vmem>> -> memref<1x66x128xf32, #tpu.memory_space<vmem>>
    %86 = tpu.memref_squeeze %85 : memref<1x66x128xf32, #tpu.memory_space<vmem>> -> memref<66x128xf32, #tpu.memory_space<vmem>>
    %c1_49 = arith.constant 1 : index
    %c0_50 = arith.constant 0 : index
    %87 = tpu.strided_load %86[%c1_49, %c0_50] {strides = array<i32: 2, 1>} : memref<66x128xf32, #tpu.memory_space<vmem>>, vector<32x128xf32>
    %c0_i32_51 = arith.constant 0 : i32
    %c0_i32_52 = arith.constant 0 : i32
    %c0_i32_53 = arith.constant 0 : i32
    %88 = tpu.memref_slice %arg9[%c0_i32_51, %c0_i32_52, %c0_i32_53] : memref<2x66x128xf32, #tpu.memory_space<vmem>> -> memref<1x66x128xf32, #tpu.memory_space<vmem>>
    %89 = tpu.memref_squeeze %88 : memref<1x66x128xf32, #tpu.memory_space<vmem>> -> memref<66x128xf32, #tpu.memory_space<vmem>>
    %c2 = arith.constant 2 : index
    %c0_54 = arith.constant 0 : index
    %90 = tpu.strided_load %89[%c2, %c0_54] {strides = array<i32: 2, 1>} : memref<66x128xf32, #tpu.memory_space<vmem>>, vector<32x128xf32>
    %91 = tpu.concatenate %84, %87, %90 in 1 : vector<32x128xf32>, vector<32x128xf32>, vector<32x128xf32> -> vector<32x384xf32>
    %c1_i32 = arith.constant 1 : i32
    %c0_i32_55 = arith.constant 0 : i32
    %c0_i32_56 = arith.constant 0 : i32
    %92 = tpu.memref_slice %arg9[%c1_i32, %c0_i32_55, %c0_i32_56] : memref<2x66x128xf32, #tpu.memory_space<vmem>> -> memref<1x66x128xf32, #tpu.memory_space<vmem>>
    %93 = tpu.memref_squeeze %92 : memref<1x66x128xf32, #tpu.memory_space<vmem>> -> memref<66x128xf32, #tpu.memory_space<vmem>>
    %c0_57 = arith.constant 0 : index
    %c0_58 = arith.constant 0 : index
    %94 = tpu.strided_load %93[%c0_57, %c0_58] {strides = array<i32: 2, 1>} : memref<66x128xf32, #tpu.memory_space<vmem>>, vector<32x128xf32>
    %c1_i32_59 = arith.constant 1 : i32
    %c0_i32_60 = arith.constant 0 : i32
    %c0_i32_61 = arith.constant 0 : i32
    %95 = tpu.memref_slice %arg9[%c1_i32_59, %c0_i32_60, %c0_i32_61] : memref<2x66x128xf32, #tpu.memory_space<vmem>> -> memref<1x66x128xf32, #tpu.memory_space<vmem>>
    %96 = tpu.memref_squeeze %95 : memref<1x66x128xf32, #tpu.memory_space<vmem>> -> memref<66x128xf32, #tpu.memory_space<vmem>>
    %c1_62 = arith.constant 1 : index
    %c0_63 = arith.constant 0 : index
    %97 = tpu.strided_load %96[%c1_62, %c0_63] {strides = array<i32: 2, 1>} : memref<66x128xf32, #tpu.memory_space<vmem>>, vector<32x128xf32>
    %c1_i32_64 = arith.constant 1 : i32
    %c0_i32_65 = arith.constant 0 : i32
    %c0_i32_66 = arith.constant 0 : i32
    %98 = tpu.memref_slice %arg9[%c1_i32_64, %c0_i32_65, %c0_i32_66] : memref<2x66x128xf32, #tpu.memory_space<vmem>> -> memref<1x66x128xf32, #tpu.memory_space<vmem>>
    %99 = tpu.memref_squeeze %98 : memref<1x66x128xf32, #tpu.memory_space<vmem>> -> memref<66x128xf32, #tpu.memory_space<vmem>>
    %c2_67 = arith.constant 2 : index
    %c0_68 = arith.constant 0 : index
    %100 = tpu.strided_load %99[%c2_67, %c0_68] {strides = array<i32: 2, 1>} : memref<66x128xf32, #tpu.memory_space<vmem>>, vector<32x128xf32>
    %101 = tpu.concatenate %94, %97, %100 in 1 : vector<32x128xf32>, vector<32x128xf32>, vector<32x128xf32> -> vector<32x384xf32>
    %102 = tpu.concatenate %91, %101 in 0 : vector<32x384xf32>, vector<32x384xf32> -> vector<64x384xf32>
    %c0_69 = arith.constant 0 : index
    %c0_70 = arith.constant 0 : index
    %103 = vector.load %arg5[%c0_69, %c0_70] : memref<384x128xf32, #tpu.memory_space<vmem>>, vector<384x128xf32>
    %cst_71 = arith.constant dense<0.000000e+00> : vector<64x128xf32>
    %104 = tpu.matmul %102, %103, %cst_71 {dimension_numbers = #tpu.dot_dimension_numbers<[1], [0], [0], [1], [0, 0, 1, 1], [], []>} : vector<64x384xf32>, vector<384x128xf32>, vector<64x128xf32> -> vector<64x128xf32>
    %cst_72 = arith.constant 5.000000e-01 : f32
    %105 = vector.broadcast %cst_72 : f32 to vector<64x128xf32>
    %106 = arith.mulf %105, %104 : vector<64x128xf32>
    %cst_73 = arith.constant 0.707106769 : f32
    %107 = vector.broadcast %cst_73 : f32 to vector<64x128xf32>
    %108 = arith.mulf %104, %107 : vector<64x128xf32>
    %109 = math.absf %108 : vector<64x128xf32>
    %cst_74 = arith.constant 0.327591091 : f32
    %110 = vector.broadcast %cst_74 : f32 to vector<64x128xf32>
    %111 = arith.mulf %110, %109 : vector<64x128xf32>
    %cst_75 = arith.constant 1.000000e+00 : f32
    %112 = vector.broadcast %cst_75 : f32 to vector<64x128xf32>
    %113 = arith.addf %112, %111 : vector<64x128xf32>
    %cst_76 = arith.constant 1.000000e+00 : f32
    %114 = vector.broadcast %cst_76 : f32 to vector<64x128xf32>
    %115 = arith.divf %114, %113 : vector<64x128xf32>
    %cst_77 = arith.constant 1.06140542 : f32
    %116 = vector.broadcast %cst_77 : f32 to vector<64x128xf32>
    %117 = arith.mulf %115, %116 : vector<64x128xf32>
    %cst_78 = arith.constant -1.45315206 : f32
    %118 = vector.broadcast %cst_78 : f32 to vector<64x128xf32>
    %119 = arith.addf %118, %117 : vector<64x128xf32>
    %120 = arith.mulf %115, %119 : vector<64x128xf32>
    %cst_79 = arith.constant 1.42141378 : f32
    %121 = vector.broadcast %cst_79 : f32 to vector<64x128xf32>
    %122 = arith.addf %121, %120 : vector<64x128xf32>
    %123 = arith.mulf %115, %122 : vector<64x128xf32>
    %cst_80 = arith.constant -0.284496725 : f32
    %124 = vector.broadcast %cst_80 : f32 to vector<64x128xf32>
    %125 = arith.addf %124, %123 : vector<64x128xf32>
    %126 = arith.mulf %115, %125 : vector<64x128xf32>
    %cst_81 = arith.constant 0.254829586 : f32
    %127 = vector.broadcast %cst_81 : f32 to vector<64x128xf32>
    %128 = arith.addf %127, %126 : vector<64x128xf32>
    %129 = arith.mulf %115, %128 : vector<64x128xf32>
    %130 = arith.mulf %109, %109 : vector<64x128xf32>
    %cst_82 = arith.constant 0.000000e+00 : f32
    %131 = vector.broadcast %cst_82 : f32 to vector<64x128xf32>
    %132 = arith.subf %131, %130 : vector<64x128xf32>
    %133 = math.exp %132 : vector<64x128xf32>
    %134 = arith.mulf %129, %133 : vector<64x128xf32>
    %cst_83 = arith.constant 1.000000e+00 : f32
    %135 = vector.broadcast %cst_83 : f32 to vector<64x128xf32>
    %136 = arith.subf %135, %134 : vector<64x128xf32>
    %cst_84 = arith.constant 0.000000e+00 : f32
    %137 = vector.broadcast %cst_84 : f32 to vector<64x128xf32>
    %138 = arith.cmpf olt, %108, %137 : vector<64x128xf32>
    %cst_85 = arith.constant 0.000000e+00 : f32
    %139 = vector.broadcast %cst_85 : f32 to vector<64x128xf32>
    %140 = arith.subf %139, %136 : vector<64x128xf32>
    %141 = arith.select %138, %140, %136 : vector<64x128xi1>, vector<64x128xf32>
    %cst_86 = arith.constant 1.000000e+00 : f32
    %142 = vector.broadcast %cst_86 : f32 to vector<64x128xf32>
    %143 = arith.addf %142, %141 : vector<64x128xf32>
    %144 = arith.mulf %106, %143 : vector<64x128xf32>
    %145 = vector.shape_cast %144 : vector<64x128xf32> to vector<2x32x128xf32>
    %cst_87 = arith.constant 0.000000e+00 : f32
    %146 = vector.broadcast %cst_87 : f32 to vector<2x1x128xf32>
    %c0_88 = arith.constant 0 : index
    %c0_89 = arith.constant 0 : index
    %c0_90 = arith.constant 0 : index
    %147 = vector.load %arg10[%c0_88, %c0_89, %c0_90] : memref<2x34x128xf32, #tpu.memory_space<vmem>>, vector<2x1x128xf32>
    tpu.vector_store %arg10[%c0_88, %c0_89, %c0_90], %146 {strides = array<i32>} : memref<2x34x128xf32, #tpu.memory_space<vmem>>, vector<2x1x128xf32>,
    %c0_91 = arith.constant 0 : index
    %c33 = arith.constant 33 : index
    %c0_92 = arith.constant 0 : index
    %148 = vector.load %arg10[%c0_91, %c33, %c0_92] : memref<2x34x128xf32, #tpu.memory_space<vmem>>, vector<2x1x128xf32>
    tpu.vector_store %arg10[%c0_91, %c33, %c0_92], %146 {strides = array<i32>} : memref<2x34x128xf32, #tpu.memory_space<vmem>>, vector<2x1x128xf32>,
    %c0_93 = arith.constant 0 : index
    %c1_94 = arith.constant 1 : index
    %c0_95 = arith.constant 0 : index
    %149 = vector.load %arg10[%c0_93, %c1_94, %c0_95] : memref<2x34x128xf32, #tpu.memory_space<vmem>>, vector<2x32x128xf32>
    tpu.vector_store %arg10[%c0_93, %c1_94, %c0_95], %145 {strides = array<i32>} : memref<2x34x128xf32, #tpu.memory_space<vmem>>, vector<2x32x128xf32>,
    %c0_i32_96 = arith.constant 0 : i32
    %c0_i32_97 = arith.constant 0 : i32
    %c0_i32_98 = arith.constant 0 : i32
    %150 = tpu.memref_slice %arg10[%c0_i32_96, %c0_i32_97, %c0_i32_98] : memref<2x34x128xf32, #tpu.memory_space<vmem>> -> memref<1x34x128xf32, #tpu.memory_space<vmem>>
    %151 = tpu.memref_squeeze %150 : memref<1x34x128xf32, #tpu.memory_space<vmem>> -> memref<34x128xf32, #tpu.memory_space<vmem>>
    %c0_99 = arith.constant 0 : index
    %c0_100 = arith.constant 0 : index
    %152 = tpu.strided_load %151[%c0_99, %c0_100] {strides = array<i32: 2, 1>} : memref<34x128xf32, #tpu.memory_space<vmem>>, vector<16x128xf32>
    %c0_i32_101 = arith.constant 0 : i32
    %c0_i32_102 = arith.constant 0 : i32
    %c0_i32_103 = arith.constant 0 : i32
    %153 = tpu.memref_slice %arg10[%c0_i32_101, %c0_i32_102, %c0_i32_103] : memref<2x34x128xf32, #tpu.memory_space<vmem>> -> memref<1x34x128xf32, #tpu.memory_space<vmem>>
    %154 = tpu.memref_squeeze %153 : memref<1x34x128xf32, #tpu.memory_space<vmem>> -> memref<34x128xf32, #tpu.memory_space<vmem>>
    %c1_104 = arith.constant 1 : index
    %c0_105 = arith.constant 0 : index
    %155 = tpu.strided_load %154[%c1_104, %c0_105] {strides = array<i32: 2, 1>} : memref<34x128xf32, #tpu.memory_space<vmem>>, vector<16x128xf32>
    %c0_i32_106 = arith.constant 0 : i32
    %c0_i32_107 = arith.constant 0 : i32
    %c0_i32_108 = arith.constant 0 : i32
    %156 = tpu.memref_slice %arg10[%c0_i32_106, %c0_i32_107, %c0_i32_108] : memref<2x34x128xf32, #tpu.memory_space<vmem>> -> memref<1x34x128xf32, #tpu.memory_space<vmem>>
    %157 = tpu.memref_squeeze %156 : memref<1x34x128xf32, #tpu.memory_space<vmem>> -> memref<34x128xf32, #tpu.memory_space<vmem>>
    %c2_109 = arith.constant 2 : index
    %c0_110 = arith.constant 0 : index
    %158 = tpu.strided_load %157[%c2_109, %c0_110] {strides = array<i32: 2, 1>} : memref<34x128xf32, #tpu.memory_space<vmem>>, vector<16x128xf32>
    %159 = tpu.concatenate %152, %155, %158 in 1 : vector<16x128xf32>, vector<16x128xf32>, vector<16x128xf32> -> vector<16x384xf32>
    %c1_i32_111 = arith.constant 1 : i32
    %c0_i32_112 = arith.constant 0 : i32
    %c0_i32_113 = arith.constant 0 : i32
    %160 = tpu.memref_slice %arg10[%c1_i32_111, %c0_i32_112, %c0_i32_113] : memref<2x34x128xf32, #tpu.memory_space<vmem>> -> memref<1x34x128xf32, #tpu.memory_space<vmem>>
    %161 = tpu.memref_squeeze %160 : memref<1x34x128xf32, #tpu.memory_space<vmem>> -> memref<34x128xf32, #tpu.memory_space<vmem>>
    %c0_114 = arith.constant 0 : index
    %c0_115 = arith.constant 0 : index
    %162 = tpu.strided_load %161[%c0_114, %c0_115] {strides = array<i32: 2, 1>} : memref<34x128xf32, #tpu.memory_space<vmem>>, vector<16x128xf32>
    %c1_i32_116 = arith.constant 1 : i32
    %c0_i32_117 = arith.constant 0 : i32
    %c0_i32_118 = arith.constant 0 : i32
    %163 = tpu.memref_slice %arg10[%c1_i32_116, %c0_i32_117, %c0_i32_118] : memref<2x34x128xf32, #tpu.memory_space<vmem>> -> memref<1x34x128xf32, #tpu.memory_space<vmem>>
    %164 = tpu.memref_squeeze %163 : memref<1x34x128xf32, #tpu.memory_space<vmem>> -> memref<34x128xf32, #tpu.memory_space<vmem>>
    %c1_119 = arith.constant 1 : index
    %c0_120 = arith.constant 0 : index
    %165 = tpu.strided_load %164[%c1_119, %c0_120] {strides = array<i32: 2, 1>} : memref<34x128xf32, #tpu.memory_space<vmem>>, vector<16x128xf32>
    %c1_i32_121 = arith.constant 1 : i32
    %c0_i32_122 = arith.constant 0 : i32
    %c0_i32_123 = arith.constant 0 : i32
    %166 = tpu.memref_slice %arg10[%c1_i32_121, %c0_i32_122, %c0_i32_123] : memref<2x34x128xf32, #tpu.memory_space<vmem>> -> memref<1x34x128xf32, #tpu.memory_space<vmem>>
    %167 = tpu.memref_squeeze %166 : memref<1x34x128xf32, #tpu.memory_space<vmem>> -> memref<34x128xf32, #tpu.memory_space<vmem>>
    %c2_124 = arith.constant 2 : index
    %c0_125 = arith.constant 0 : index
    %168 = tpu.strided_load %167[%c2_124, %c0_125] {strides = array<i32: 2, 1>} : memref<34x128xf32, #tpu.memory_space<vmem>>, vector<16x128xf32>
    %169 = tpu.concatenate %162, %165, %168 in 1 : vector<16x128xf32>, vector<16x128xf32>, vector<16x128xf32> -> vector<16x384xf32>
    %170 = tpu.concatenate %159, %169 in 0 : vector<16x384xf32>, vector<16x384xf32> -> vector<32x384xf32>
    %c0_126 = arith.constant 0 : index
    %c0_127 = arith.constant 0 : index
    %171 = vector.load %arg6[%c0_126, %c0_127] : memref<384x128xf32, #tpu.memory_space<vmem>>, vector<384x128xf32>
    %cst_128 = arith.constant dense<0.000000e+00> : vector<32x128xf32>
    %172 = tpu.matmul %170, %171, %cst_128 {dimension_numbers = #tpu.dot_dimension_numbers<[1], [0], [0], [1], [0, 0, 1, 1], [], []>} : vector<32x384xf32>, vector<384x128xf32>, vector<32x128xf32> -> vector<32x128xf32>
    %cst_129 = arith.constant 5.000000e-01 : f32
    %173 = vector.broadcast %cst_129 : f32 to vector<32x128xf32>
    %174 = arith.mulf %173, %172 : vector<32x128xf32>
    %cst_130 = arith.constant 0.707106769 : f32
    %175 = vector.broadcast %cst_130 : f32 to vector<32x128xf32>
    %176 = arith.mulf %172, %175 : vector<32x128xf32>
    %177 = math.absf %176 : vector<32x128xf32>
    %cst_131 = arith.constant 0.327591091 : f32
    %178 = vector.broadcast %cst_131 : f32 to vector<32x128xf32>
    %179 = arith.mulf %178, %177 : vector<32x128xf32>
    %cst_132 = arith.constant 1.000000e+00 : f32
    %180 = vector.broadcast %cst_132 : f32 to vector<32x128xf32>
    %181 = arith.addf %180, %179 : vector<32x128xf32>
    %cst_133 = arith.constant 1.000000e+00 : f32
    %182 = vector.broadcast %cst_133 : f32 to vector<32x128xf32>
    %183 = arith.divf %182, %181 : vector<32x128xf32>
    %cst_134 = arith.constant 1.06140542 : f32
    %184 = vector.broadcast %cst_134 : f32 to vector<32x128xf32>
    %185 = arith.mulf %183, %184 : vector<32x128xf32>
    %cst_135 = arith.constant -1.45315206 : f32
    %186 = vector.broadcast %cst_135 : f32 to vector<32x128xf32>
    %187 = arith.addf %186, %185 : vector<32x128xf32>
    %188 = arith.mulf %183, %187 : vector<32x128xf32>
    %cst_136 = arith.constant 1.42141378 : f32
    %189 = vector.broadcast %cst_136 : f32 to vector<32x128xf32>
    %190 = arith.addf %189, %188 : vector<32x128xf32>
    %191 = arith.mulf %183, %190 : vector<32x128xf32>
    %cst_137 = arith.constant -0.284496725 : f32
    %192 = vector.broadcast %cst_137 : f32 to vector<32x128xf32>
    %193 = arith.addf %192, %191 : vector<32x128xf32>
    %194 = arith.mulf %183, %193 : vector<32x128xf32>
    %cst_138 = arith.constant 0.254829586 : f32
    %195 = vector.broadcast %cst_138 : f32 to vector<32x128xf32>
    %196 = arith.addf %195, %194 : vector<32x128xf32>
    %197 = arith.mulf %183, %196 : vector<32x128xf32>
    %198 = arith.mulf %177, %177 : vector<32x128xf32>
    %cst_139 = arith.constant 0.000000e+00 : f32
    %199 = vector.broadcast %cst_139 : f32 to vector<32x128xf32>
    %200 = arith.subf %199, %198 : vector<32x128xf32>
    %201 = math.exp %200 : vector<32x128xf32>
    %202 = arith.mulf %197, %201 : vector<32x128xf32>
    %cst_140 = arith.constant 1.000000e+00 : f32
    %203 = vector.broadcast %cst_140 : f32 to vector<32x128xf32>
    %204 = arith.subf %203, %202 : vector<32x128xf32>
    %cst_141 = arith.constant 0.000000e+00 : f32
    %205 = vector.broadcast %cst_141 : f32 to vector<32x128xf32>
    %206 = arith.cmpf olt, %176, %205 : vector<32x128xf32>
    %cst_142 = arith.constant 0.000000e+00 : f32
    %207 = vector.broadcast %cst_142 : f32 to vector<32x128xf32>
    %208 = arith.subf %207, %204 : vector<32x128xf32>
    %209 = arith.select %206, %208, %204 : vector<32x128xi1>, vector<32x128xf32>
    %cst_143 = arith.constant 1.000000e+00 : f32
    %210 = vector.broadcast %cst_143 : f32 to vector<32x128xf32>
    %211 = arith.addf %210, %209 : vector<32x128xf32>
    %212 = arith.mulf %174, %211 : vector<32x128xf32>
    %213 = vector.shape_cast %212 : vector<32x128xf32> to vector<2x16x128xf32>
    %c0_144 = arith.constant 0 : index
    %c0_145 = arith.constant 0 : index
    %c0_146 = arith.constant 0 : index
    %214 = vector.load %arg11[%c0_144, %c0_145, %c0_146] : memref<2x16x128xf32, #tpu.memory_space<vmem>>, vector<2x16x128xf32>
    tpu.vector_store %arg11[%c0_144, %c0_145, %c0_146], %213 {strides = array<i32>} : memref<2x16x128xf32, #tpu.memory_space<vmem>>, vector<2x16x128xf32>,
    %c0_i32_147 = arith.constant 0 : i32
    %c0_i32_148 = arith.constant 0 : i32
    %c0_i32_149 = arith.constant 0 : i32
    %215 = tpu.memref_slice %arg11[%c0_i32_147, %c0_i32_148, %c0_i32_149] : memref<2x16x128xf32, #tpu.memory_space<vmem>> -> memref<1x16x128xf32, #tpu.memory_space<vmem>>
    %216 = tpu.memref_squeeze %215 : memref<1x16x128xf32, #tpu.memory_space<vmem>> -> memref<16x128xf32, #tpu.memory_space<vmem>>
    %c0_150 = arith.constant 0 : index
    %c0_151 = arith.constant 0 : index
    %217 = tpu.strided_load %216[%c0_150, %c0_151] {strides = array<i32: 2, 1>} : memref<16x128xf32, #tpu.memory_space<vmem>>, vector<8x128xf32>
    %c0_i32_152 = arith.constant 0 : i32
    %c0_i32_153 = arith.constant 0 : i32
    %c0_i32_154 = arith.constant 0 : i32
    %218 = tpu.memref_slice %arg11[%c0_i32_152, %c0_i32_153, %c0_i32_154] : memref<2x16x128xf32, #tpu.memory_space<vmem>> -> memref<1x16x128xf32, #tpu.memory_space<vmem>>
    %219 = tpu.memref_squeeze %218 : memref<1x16x128xf32, #tpu.memory_space<vmem>> -> memref<16x128xf32, #tpu.memory_space<vmem>>
    %c1_155 = arith.constant 1 : index
    %c0_156 = arith.constant 0 : index
    %220 = tpu.strided_load %219[%c1_155, %c0_156] {strides = array<i32: 2, 1>} : memref<16x128xf32, #tpu.memory_space<vmem>>, vector<8x128xf32>
    %221 = tpu.concatenate %217, %220 in 1 : vector<8x128xf32>, vector<8x128xf32> -> vector<8x256xf32>
    %c1_i32_157 = arith.constant 1 : i32
    %c0_i32_158 = arith.constant 0 : i32
    %c0_i32_159 = arith.constant 0 : i32
    %222 = tpu.memref_slice %arg11[%c1_i32_157, %c0_i32_158, %c0_i32_159] : memref<2x16x128xf32, #tpu.memory_space<vmem>> -> memref<1x16x128xf32, #tpu.memory_space<vmem>>
    %223 = tpu.memref_squeeze %222 : memref<1x16x128xf32, #tpu.memory_space<vmem>> -> memref<16x128xf32, #tpu.memory_space<vmem>>
    %c0_160 = arith.constant 0 : index
    %c0_161 = arith.constant 0 : index
    %224 = tpu.strided_load %223[%c0_160, %c0_161] {strides = array<i32: 2, 1>} : memref<16x128xf32, #tpu.memory_space<vmem>>, vector<8x128xf32>
    %c1_i32_162 = arith.constant 1 : i32
    %c0_i32_163 = arith.constant 0 : i32
    %c0_i32_164 = arith.constant 0 : i32
    %225 = tpu.memref_slice %arg11[%c1_i32_162, %c0_i32_163, %c0_i32_164] : memref<2x16x128xf32, #tpu.memory_space<vmem>> -> memref<1x16x128xf32, #tpu.memory_space<vmem>>
    %226 = tpu.memref_squeeze %225 : memref<1x16x128xf32, #tpu.memory_space<vmem>> -> memref<16x128xf32, #tpu.memory_space<vmem>>
    %c1_165 = arith.constant 1 : index
    %c0_166 = arith.constant 0 : index
    %227 = tpu.strided_load %226[%c1_165, %c0_166] {strides = array<i32: 2, 1>} : memref<16x128xf32, #tpu.memory_space<vmem>>, vector<8x128xf32>
    %228 = tpu.concatenate %224, %227 in 1 : vector<8x128xf32>, vector<8x128xf32> -> vector<8x256xf32>
    %229 = tpu.concatenate %221, %228 in 0 : vector<8x256xf32>, vector<8x256xf32> -> vector<16x256xf32>
    %c0_167 = arith.constant 0 : index
    %c0_168 = arith.constant 0 : index
    %230 = vector.load %arg7[%c0_167, %c0_168] : memref<256x128xf32, #tpu.memory_space<vmem>>, vector<256x128xf32>
    %cst_169 = arith.constant dense<0.000000e+00> : vector<16x128xf32>
    %231 = tpu.matmul %229, %230, %cst_169 {dimension_numbers = #tpu.dot_dimension_numbers<[1], [0], [0], [1], [0, 0, 1, 1], [], []>} : vector<16x256xf32>, vector<256x128xf32>, vector<16x128xf32> -> vector<16x128xf32>
    %cst_170 = arith.constant 5.000000e-01 : f32
    %232 = vector.broadcast %cst_170 : f32 to vector<16x128xf32>
    %233 = arith.mulf %232, %231 : vector<16x128xf32>
    %cst_171 = arith.constant 0.707106769 : f32
    %234 = vector.broadcast %cst_171 : f32 to vector<16x128xf32>
    %235 = arith.mulf %231, %234 : vector<16x128xf32>
    %236 = math.absf %235 : vector<16x128xf32>
    %cst_172 = arith.constant 0.327591091 : f32
    %237 = vector.broadcast %cst_172 : f32 to vector<16x128xf32>
    %238 = arith.mulf %237, %236 : vector<16x128xf32>
    %cst_173 = arith.constant 1.000000e+00 : f32
    %239 = vector.broadcast %cst_173 : f32 to vector<16x128xf32>
    %240 = arith.addf %239, %238 : vector<16x128xf32>
    %cst_174 = arith.constant 1.000000e+00 : f32
    %241 = vector.broadcast %cst_174 : f32 to vector<16x128xf32>
    %242 = arith.divf %241, %240 : vector<16x128xf32>
    %cst_175 = arith.constant 1.06140542 : f32
    %243 = vector.broadcast %cst_175 : f32 to vector<16x128xf32>
    %244 = arith.mulf %242, %243 : vector<16x128xf32>
    %cst_176 = arith.constant -1.45315206 : f32
    %245 = vector.broadcast %cst_176 : f32 to vector<16x128xf32>
    %246 = arith.addf %245, %244 : vector<16x128xf32>
    %247 = arith.mulf %242, %246 : vector<16x128xf32>
    %cst_177 = arith.constant 1.42141378 : f32
    %248 = vector.broadcast %cst_177 : f32 to vector<16x128xf32>
    %249 = arith.addf %248, %247 : vector<16x128xf32>
    %250 = arith.mulf %242, %249 : vector<16x128xf32>
    %cst_178 = arith.constant -0.284496725 : f32
    %251 = vector.broadcast %cst_178 : f32 to vector<16x128xf32>
    %252 = arith.addf %251, %250 : vector<16x128xf32>
    %253 = arith.mulf %242, %252 : vector<16x128xf32>
    %cst_179 = arith.constant 0.254829586 : f32
    %254 = vector.broadcast %cst_179 : f32 to vector<16x128xf32>
    %255 = arith.addf %254, %253 : vector<16x128xf32>
    %256 = arith.mulf %242, %255 : vector<16x128xf32>
    %257 = arith.mulf %236, %236 : vector<16x128xf32>
    %cst_180 = arith.constant 0.000000e+00 : f32
    %258 = vector.broadcast %cst_180 : f32 to vector<16x128xf32>
    %259 = arith.subf %258, %257 : vector<16x128xf32>
    %260 = math.exp %259 : vector<16x128xf32>
    %261 = arith.mulf %256, %260 : vector<16x128xf32>
    %cst_181 = arith.constant 1.000000e+00 : f32
    %262 = vector.broadcast %cst_181 : f32 to vector<16x128xf32>
    %263 = arith.subf %262, %261 : vector<16x128xf32>
    %cst_182 = arith.constant 0.000000e+00 : f32
    %264 = vector.broadcast %cst_182 : f32 to vector<16x128xf32>
    %265 = arith.cmpf olt, %235, %264 : vector<16x128xf32>
    %cst_183 = arith.constant 0.000000e+00 : f32
    %266 = vector.broadcast %cst_183 : f32 to vector<16x128xf32>
    %267 = arith.subf %266, %263 : vector<16x128xf32>
    %268 = arith.select %265, %267, %263 : vector<16x128xi1>, vector<16x128xf32>
    %cst_184 = arith.constant 1.000000e+00 : f32
    %269 = vector.broadcast %cst_184 : f32 to vector<16x128xf32>
    %270 = arith.addf %269, %268 : vector<16x128xf32>
    %271 = arith.mulf %233, %270 : vector<16x128xf32>
    %272 = vector.shape_cast %271 : vector<16x128xf32> to vector<2x8x128xf32>
    %c0_185 = arith.constant 0 : index
    %c0_186 = arith.constant 0 : index
    %c0_187 = arith.constant 0 : index
    %273 = vector.load %arg8[%c0_185, %c0_186, %c0_187] : memref<2x8x128xf32, #tpu.memory_space<vmem>>, vector<2x8x128xf32>
    tpu.vector_store %arg8[%c0_185, %c0_186, %c0_187], %272 {strides = array<i32>} : memref<2x8x128xf32, #tpu.memory_space<vmem>>, vector<2x8x128xf32>,
    return
  }
  func.func @transform_0(%arg0: i32) -> (i32, i32, i32) {
    %c0_i32 = arith.constant 0 : i32
    %c0_i32_0 = arith.constant 0 : i32
    %c0_i32_1 = arith.constant 0 : i32
    return %arg0, %c0_i32, %c0_i32_0 : i32, i32, i32
  }
  func.func @transform_1(%arg0: i32) -> (i32, i32) {
    %c0_i32 = arith.constant 0 : i32
    %c0_i32_0 = arith.constant 0 : i32
    %c0_i32_1 = arith.constant 0 : i32
    return %c0_i32, %c0_i32_0 : i32, i32
  }
  func.func @transform_2(%arg0: i32) -> (i32, i32) {
    %c0_i32 = arith.constant 0 : i32
    %c0_i32_0 = arith.constant 0 : i32
    %c0_i32_1 = arith.constant 0 : i32
    return %c0_i32, %c0_i32_0 : i32, i32
  }
  func.func @transform_3(%arg0: i32) -> (i32, i32) {
    %c0_i32 = arith.constant 0 : i32
    %c0_i32_0 = arith.constant 0 : i32
    %c0_i32_1 = arith.constant 0 : i32
    return %c0_i32, %c0_i32_0 : i32, i32
  }
  func.func @transform_4(%arg0: i32) -> (i32, i32) {
    %c0_i32 = arith.constant 0 : i32
    %c0_i32_0 = arith.constant 0 : i32
    %c0_i32_1 = arith.constant 0 : i32
    return %c0_i32, %c0_i32_0 : i32, i32
  }
  func.func @transform_5(%arg0: i32) -> (i32, i32) {
    %c0_i32 = arith.constant 0 : i32
    %c0_i32_0 = arith.constant 0 : i32
    %c0_i32_1 = arith.constant 0 : i32
    return %c0_i32, %c0_i32_0 : i32, i32
  }
  func.func @transform_6(%arg0: i32) -> (i32, i32) {
    %c0_i32 = arith.constant 0 : i32
    %c0_i32_0 = arith.constant 0 : i32
    %c0_i32_1 = arith.constant 0 : i32
    return %c0_i32, %c0_i32_0 : i32, i32
  }
  func.func @transform_7(%arg0: i32) -> (i32, i32, i32) {
    %c0_i32 = arith.constant 0 : i32
    %c0_i32_0 = arith.constant 0 : i32
    %c0_i32_1 = arith.constant 0 : i32
    return %arg0, %c0_i32, %c0_i32_0 : i32, i32, i32
  }
}

</mosaic_0001>

<bundles_post_ra>
// kernel: tpu_custom_call.1
= control target key start
LH: loop header
LB: loop body
LE: loop exit
PB: predicated region body
PF: predicated region fallthrough
CT: control target
= control target key end

     0   :  { %12 = vsyncpa [#allocation6], 0  ;;  %s4429_s0 = inlined_call_operand.vmem [shape: f32[8,65,5], index: 0, kind: input, shape index: {}]   ;;  %s4430_s1 = inlined_call_operand.vmem [shape: f32[10,128], index: 1, kind: input, shape index: {}]   ;;  %s4431_s2 = inlined_call_operand.vmem [shape: f32[1,128], index: 2, kind: input, shape index: {}]   ;;  %s4432_s3 = inlined_call_operand.vmem [shape: f32[1,128], index: 3, kind: input, shape index: {}]   ;;  %s4433_s4 = inlined_call_operand.vmem [shape: f32[384,128], index: 4, kind: input, shape index: {}]   ;;  %s4434_s5 = inlined_call_operand.hbm [shape: f32[384,128], index: 5, kind: input, shape index: {}]   ;;  %s4435_s6 = inlined_call_operand.hbm [shape: f32[256,128], index: 6, kind: input, shape index: {}]   ;;  %s4436_s7 = inlined_call_operand.hbm [shape: f32[8,8,128], index: 7, kind: output, shape index: {}]  }
   0x1   :  { %13 = vsyncpa [#allocation9], 0 }
   0x2   :  { %14 = vsyncpa [#allocation7], 0 }
   0x3   :  { %16 = vsyncpa [#allocation7 + $0x1], 0  ;;  %s2994_s24 = smov 0   ;;  %s2996_s25 = smov 0  }
   0x4   :  { %s2998_s26 = smov 0   ;;  %s3000_s27 = smov 0  }
   0x5 LB: > { %s3015_s28 = sadd.s32 4294967295, %s2945_s27   ;;  %s2556_s29 = sadd.s32 4294967294, %s2945_s27   ;;  %s2945_s27 = sphi %s3000_s27, %s4475_s27   ;;  %s2941_s26 = sphi %s2998_s26, %s4474_s26   ;;  %s2937_s25 = sphi %s2996_s25, %s4473_s25   ;;  %s2933_s24 = sphi %s2994_s24, %s4472_s24  }
   0x6   : > { %s3019_s30 = sadd.s32 1, %s2945_s27   ;;  %s181_s8 = sadd.s32 1, %s2941_s26 }
   0x7   : > { %s178_s9 = ssub.s32 %s2945_s27, %s3019_s30  ;;  %p191_p0 = scmp.ne.s32.totalorder %s2941_s26, %s2937_s25 }
   0x8   : > { %p179_p1 = scmp.eq.s32.totalorder %s178_s9, 0  ;;  %p192_p2 = scmp.eq.s32.totalorder %s3015_s28, 3 }
   0x9   : > { %p197_p3 = scmp.ne.s32.totalorder %s2937_s25, %s2933_s24  ;;  %p198_p4 = scmp.eq.s32.totalorder %s2556_s29, 3 }
   0xa   : > { %s3030_s10 = scalar_select %p179_p1, %s2941_s26, %s181_s8  }
   0xb   : > { %p3032_p5 = por %p192_p2, %p191_p0  ;;  %p3036_p6 = por %p198_p4, %p197_p3 }
   0xc   : > { %p2557_p7 = scmp.ge.s32.totalorder %s2945_s27, 1  ;;  %p205_p8 = scmp.lt.s32.totalorder %s2945_s27, 5 }
   0xd   : > { %p2645_p9 = scmp.eq.s32.totalorder %s3015_s28, 0  ;;  %s228_s16 = sshll.u32 %s4434_s5, 4  ;;  %s229_s16 = int_to_ptr.hbm [resolvable:$true] %s228_s16 }
   0xe   : > { %p3043_p10 = pnand %p2557_p7, %p205_p8  ;;  %s2947_s17 = smov [#allocation5]  }
   0xf   : > { %s230_s18 = sshll.u32 %s2947_s17, 4  ;;  %s242_s21 = sshll.u32 %s4435_s6, 4  ;;  %s231_s18 = int_to_ptr.vmem [resolvable:$true] %s230_s18  ;;  %s243_s21 = int_to_ptr.hbm [resolvable:$true] %s242_s21 }
  0x10   : > { %p2634_p11 = pneg %p3043_p10  ;;  %s2948_s22 = smov 128  }
  0x11   : > { %s2949_s23 = smov 8   ;;  %s2950_s29 = smov [#allocation8]  }
  0x12   : > { %p2635_p12 = pnand %p2645_p9, %p2634_p11  ;;  %s244_s8 = sshll.u32 %s2950_s29, 4  ;;  %s245_s8 = int_to_ptr.vmem [resolvable:$true] %s244_s8 }
  0x13   : > { %270 = sbr.rel (%p3043_p10) target bundleno = 1171 (0x493), region = 48 }
  0x14   : > { %2637 = dma.hbm_to_vmem [thread:$0]  (!%p2635_p12), %s229_s16, 6144, %s231_s18, [#allocation6], %s2948_s22, %s2948_s22, %s2949_s23  }
  0x15   : > { %2640 = dma.hbm_to_vmem [thread:$0]  (!%p2635_p12), %s243_s21, 4096, %s245_s8, [#allocation9], %s2948_s22, %s2948_s22, %s2949_s23  }
  0x18   : > { %2920 = dma.done.wait (%p2645_p9), [#allocation6], 6144  }
  0x19   : > { %2922 = vsyncadd (%p2645_p9), [#allocation6], 4294961152 }
  0x1a   : > { %2924 = dma.done.wait (%p2645_p9), [#allocation9], 4096  }
  0x1b   : > { %2926 = vsyncadd (%p2645_p9), [#allocation9], 4294963200  ;;  %s2565_s9 = sshll.u32 %s3015_s28, 1  ;;  %vm400_vm0 = vcmask 1044480   ;;  %vm351_vm1 = vcmask 39936   ;;  %s306_s8 = sand.u32 1, %s2937_s25  }
  0x1c   : > { %p310_p13 = scmp.lt.s32.totalorder %s2565_s9, 7  ;;  %v350_v0 = vld [vmem:[%s4430_s1 + $0x5] sm:$0x1f]  ;;  %v333_v1 = vld [vmem:[%s4430_s1] sm:$0x1f]  ;;  %s2606_s13 = sshll.u32 %s3015_s28, 4 }
  0x1d   : > { %2567 = vmatpush.msk.msra.mxu0 %vm400_vm0, %v350_v0  ;;  %2584 = vmatpush.msk.msra.mxu1 %vm400_vm0, %v333_v1  ;;  %s2451_s17 = scalar_lea.hbm %s4436_s7, %s2606_s13  ;;  %s2440_s28 = scalar_lea.sflag [#allocation7], %s306_s8 }
  0x1e   : > { %s4477_s9 = smov (!%p310_p13, %s2565_s9), 7  ;;  %s2454_s19 = sshll.u32 %s2451_s17, 4  ;;  %s2455_s19 = int_to_ptr.hbm [resolvable:$true] %s2454_s19 }
  0x1f   : > { %s2623_s14 = smul.u32 72, %s4477_s9  ;;  %s2564_s9 = sshll.u32 %s306_s8, 4 }
  0x20   : > { %s2895_s29 = scalar_lea.hbm %s4436_s7, 64 }
  0x21   : > { %s3077_s20 = scalar_lea.vmem %s4429_s0, %s2623_s14  ;;  %s308_s14 = scalar_lea.vmem [#allocation10], %s2564_s9 }
  0x22   : > { %v334_v2 = vld [vmem:[%s3077_s20 + $0x1] sm:$0xff]  ;;  %v335_v4 = vld [vmem:[%s3077_s20 + $0x9] sm:$0xff]  ;;  %v336_v6 = vld [vmem:[%s3077_s20 + $0x11] sm:$0xff]  ;;  %s2452_s18 = sshll.u32 %s308_s14, 4  ;;  %s2453_s18 = int_to_ptr.vmem [resolvable:$true] %s2452_s18 }
  0x23   : > { %v317_v3 = vld [vmem:[%s3077_s20] sm:$0xff]  ;;  %2568 = vmatmul.msk.f32.vlgmr.msra.gmra.mxu0 %vm351_vm1, %v334_v2  ;;  %v318_v5 = vld [vmem:[%s3077_s20 + $0x8] sm:$0xff]  ;;  %v319_v7 = vld [vmem:[%s3077_s20 + $0x10] sm:$0xff] }
  0x24   : > { %2585 = vmatmul.msk.f32.vlgmr.msra.gmra.mxu1 %vm351_vm1, %v317_v3  ;;  %v337_v8 = vld [vmem:[%s3077_s20 + $0x19] sm:$0xff]  ;;  %v338_v10 = vld [vmem:[%s3077_s20 + $0x21] sm:$0xff]  ;;  %v339_v12 = vld [vmem:[%s3077_s20 + $0x29] sm:$0xff] }
  0x25   : > { %v320_v9 = vld [vmem:[%s3077_s20 + $0x18] sm:$0xff]  ;;  %v321_v11 = vld [vmem:[%s3077_s20 + $0x20] sm:$0xff]  ;;  %v322_v13 = vld [vmem:[%s3077_s20 + $0x28] sm:$0xff] }
  0x26   : > { %v340_v14 = vld [vmem:[%s3077_s20 + $0x31] sm:$0xff]  ;;  %v341_v16 = vld [vmem:[%s3077_s20 + $0x39] sm:$0xff]  ;;  %v342_v18 = vld [vmem:[%s3077_s20 + $0x49] sm:$0xff] }
  0x27   : > { %v323_v15 = vld [vmem:[%s3077_s20 + $0x30] sm:$0xff]  ;;  %v324_v17 = vld [vmem:[%s3077_s20 + $0x38] sm:$0xff]  ;;  %v325_v19 = vld [vmem:[%s3077_s20 + $0x48] sm:$0xff] }
  0x28   : > { %v343_v20 = vld [vmem:[%s3077_s20 + $0x51] sm:$0xff]  ;;  %v344_v22 = vld [vmem:[%s3077_s20 + $0x59] sm:$0xff]  ;;  %v345_v24 = vld [vmem:[%s3077_s20 + $0x61] sm:$0xff] }
  0x29   : > { %v326_v21 = vld [vmem:[%s3077_s20 + $0x50] sm:$0xff]  ;;  %v327_v23 = vld [vmem:[%s3077_s20 + $0x58] sm:$0xff]  ;;  %v328_v25 = vld [vmem:[%s3077_s20 + $0x60] sm:$0xff] }
  0x2a   : > { %v346_v26 = vld [vmem:[%s3077_s20 + $0x69] sm:$0xff]  ;;  %v347_v28 = vld [vmem:[%s3077_s20 + $0x71] sm:$0xff]  ;;  %v348_v30 = vld [vmem:[%s3077_s20 + $0x79] sm:$0xff] }
  0x2b   : > { %2569 = vmatmul.msk.f32.gmra.mxu0 %vm351_vm1, %v335_v4  ;;  %v329_v27 = vld [vmem:[%s3077_s20 + $0x68] sm:$0xff]  ;;  %v330_v29 = vld [vmem:[%s3077_s20 + $0x70] sm:$0xff]  ;;  %v331_v31 = vld [vmem:[%s3077_s20 + $0x78] sm:$0xff] }
  0x2c   : > { %2586 = vmatmul.msk.f32.gmra.mxu1 %vm351_vm1, %v318_v5  ;;  %v349_v32 = vld [vmem:[%s3077_s20 + $0x81] sm:$0xff] }
  0x2d   : > { %v332_v33 = vld [vmem:[%s3077_s20 + $0x80] sm:$0xff]  ;;  %s2889_s20 = sshra.s32 %s2455_s19, 4  ;;  %s2890_s20 = int_to_ptr.hbm [resolvable:$true] %s2889_s20 }
  0x2e   : > { %s2891_s21 = scalar_lea.hbm %s2890_s20, 16  ;;  %p2896_p3 = scmp.lt.s32.totalorder %s2890_s20, %s4436_s7 }
  0x2f   : > { %p2892_p0 = scmp.ne.s32.totalorder %s2890_s20, %s2891_s21  ;;  %p2897_p4 = scmp.lt.s32.totalorder %s2895_s29, %s2891_s21 }
  0x31   : > { %p2893_p1 = pnand %p2892_p0, %p3032_p5  ;;  %p2898_p7 = por %p2897_p4, %p2896_p3 }
  0x33   : > { %2570 = vmatmul.msk.f32.gmra.mxu0 %vm351_vm1, %v336_v6  ;;  %p2894_p2 = pneg %p2893_p1 }
  0x34   : > { %2587 = vmatmul.msk.f32.gmra.mxu1 %vm351_vm1, %v319_v7 }
  0x35   : > { %p2899_p8 = pnand %p2898_p7, %p2894_p2 }
  0x3b   : > { %2571 = vmatmul.msk.f32.gmra.mxu0 %vm351_vm1, %v337_v8 }
  0x3c   : > { %2588 = vmatmul.msk.f32.gmra.mxu1 %vm351_vm1, %v320_v9 }
  0x43   : > { %2572 = vmatmul.msk.f32.gmra.mxu0 %vm351_vm1, %v338_v10 }
  0x44   : > { %2589 = vmatmul.msk.f32.gmra.mxu1 %vm351_vm1, %v321_v11 }
  0x4b   : > { %2573 = vmatmul.msk.f32.gmra.mxu0 %vm351_vm1, %v339_v12 }
  0x4c   : > { %2590 = vmatmul.msk.f32.gmra.mxu1 %vm351_vm1, %v322_v13 }
  0x53   : > { %2574 = vmatmul.msk.f32.gmra.mxu0 %vm351_vm1, %v340_v14 }
  0x54   : > { %2591 = vmatmul.msk.f32.gmra.mxu1 %vm351_vm1, %v323_v15 }
  0x5b   : > { %2575 = vmatmul.msk.f32.gmra.mxu0 %vm351_vm1, %v341_v16 }
  0x5c   : > { %2592 = vmatmul.msk.f32.gmra.mxu1 %vm351_vm1, %v324_v17 }
  0x63   : > { %2576 = vmatmul.msk.f32.gmra.mxu0 %vm351_vm1, %v342_v18 }
  0x64   : > { %2593 = vmatmul.msk.f32.gmra.mxu1 %vm351_vm1, %v325_v19 }
  0x6b   : > { %2577 = vmatmul.msk.f32.gmra.mxu0 %vm351_vm1, %v343_v20 }
  0x6c   : > { %2594 = vmatmul.msk.f32.gmra.mxu1 %vm351_vm1, %v326_v21 }
  0x73   : > { %2578 = vmatmul.msk.f32.gmra.mxu0 %vm351_vm1, %v344_v22 }
  0x74   : > { %2595 = vmatmul.msk.f32.gmra.mxu1 %vm351_vm1, %v327_v23 }
  0x7b   : > { %2579 = vmatmul.msk.f32.gmra.mxu0 %vm351_vm1, %v345_v24 }
  0x7c   : > { %2596 = vmatmul.msk.f32.gmra.mxu1 %vm351_vm1, %v328_v25 }
  0x83   : > { %2580 = vmatmul.msk.f32.gmra.mxu0 %vm351_vm1, %v346_v26 }
  0x84   : > { %2597 = vmatmul.msk.f32.gmra.mxu1 %vm351_vm1, %v329_v27 }
  0x8b   : > { %2581 = vmatmul.msk.f32.gmra.mxu0 %vm351_vm1, %v347_v28 }
  0x8c   : > { %2598 = vmatmul.msk.f32.gmra.mxu1 %vm351_vm1, %v330_v29 }
  0x93   : > { %2582 = vmatmul.msk.f32.gmra.mxu0 %vm351_vm1, %v348_v30 }
  0x94   : > { %2599 = vmatmul.msk.f32.gmra.mxu1 %vm351_vm1, %v331_v31 }
  0x9b   : > { %2583 = vmatmul.msk.f32.gmra.mxu0 %vm351_vm1, %v349_v32 }
  0x9c   : > { %2600 = vmatmul.msk.f32.gmra.mxu1 %vm351_vm1, %v332_v33 }
  0xa0   : > { %v421_v34 = vpop.f32.mrf.mxu0 }
  0xa1   : > { %v537_v35 = vpop.f32.mrf.mxu1 }
  0xa2   : > { %v3145_v47 = vadd.f32 %v537_v35, %v421_v34 }
  0xa4   : > { %v613_v51 = vmul.f32 %v3145_v47, %v3145_v47 }
  0xa8   : > { %v424_v36 = vpop.f32.mrf.mxu0 }
  0xa9   : > { %v540_v37 = vpop.f32.mrf.mxu1 }
  0xaa   : > { %v3143_v46 = vadd.f32 %v540_v37, %v424_v36 }
  0xac   : > { %v614_v49 = vmul.f32 %v3143_v46, %v3143_v46  ;;  %v585_v52 = vadd.f32 %v3143_v46, %v3145_v47 }
  0xae   : > { %v629_v57 = vadd.f32 %v614_v49, %v613_v51 }
  0xb0   : > { %v427_v38 = vpop.f32.mrf.mxu0 }
  0xb1   : > { %v543_v39 = vpop.f32.mrf.mxu1 }
  0xb2   : > { %v3147_v48 = vadd.f32 %v543_v39, %v427_v38 }
  0xb4   : > { %v615_v53 = vmul.f32 %v3147_v48, %v3147_v48  ;;  %v586_v58 = vadd.f32 %v585_v52, %v3147_v48 }
  0xb6   : > { %v630_v61 = vadd.f32 %v629_v57, %v615_v53  ;;  %v3189_v53 = vld [vmem:[%s4431_s2] sm:$0x1] }
  0xb8   : > { %v430_v40 = vpop.f32.mrf.mxu0 }
  0xb9   : > { %v546_v41 = vpop.f32.mrf.mxu1 }
  0xba   : > { %v3151_v50 = vadd.f32 %v546_v41, %v430_v40 }
  0xbc   : > { %v616_v59 = vmul.f32 %v3151_v50, %v3151_v50  ;;  %v587_v62 = vadd.f32 %v586_v58, %v3151_v50 }
  0xbe   : > { %v631_v1 = vadd.f32 %v630_v61, %v616_v59 }
  0xc0   : > { %v433_v42 = vpop.f32.mrf.mxu0 }
  0xc1   : > { %v549_v43 = vpop.f32.mrf.mxu1 }
  0xc2   : > { %v3159_v54 = vadd.f32 %v549_v43, %v433_v42 }
  0xc4   : > { %v617_v63 = vmul.f32 %v3159_v54, %v3159_v54  ;;  %v588_v2 = vadd.f32 %v587_v62, %v3159_v54 }
  0xc6   : > { %v632_v4 = vadd.f32 %v631_v1, %v617_v63 }
  0xc8   : > { %v436_v44 = vpop.f32.mrf.mxu0 }
  0xc9   : > { %v552_v45 = vpop.f32.mrf.mxu1 }
  0xca   : > { %v3164_v60 = vadd.f32 %v552_v45, %v436_v44 }
  0xcc   : > { %v618_v3 = vmul.f32 %v3164_v60, %v3164_v60  ;;  %v589_v5 = vadd.f32 %v588_v2, %v3164_v60  ;;  %v3204_v2 = vld [vmem:[%s4432_s3] ss:$0 sm:$0xff] }
  0xce   : > { %v633_v9 = vadd.f32 %v632_v4, %v618_v3 }
  0xd0   : > { %v439_v55 = vpop.f32.mrf.mxu0 }
  0xd1   : > { %v555_v56 = vpop.f32.mrf.mxu1 }
  0xd2   : > { %v3169_v0 = vadd.f32 %v555_v56, %v439_v55 }
  0xd4   : > { %v619_v6 = vmul.f32 %v3169_v0, %v3169_v0  ;;  %v590_v10 = vadd.f32 %v589_v5, %v3169_v0 }
  0xd6   : > { %v634_v12 = vadd.f32 %v633_v9, %v619_v6 }
  0xd8   : > { %v442_v7 = vpop.f32.mrf.mxu0 }
  0xd9   : > { %v558_v8 = vpop.f32.mrf.mxu1 }
  0xda   : > { %v559_v11 = vadd.f32 %v558_v8, %v442_v7 }
  0xdc   : > { %v591_v13 = vadd.f32 %v590_v10, %v559_v11  ;;  %v620_v14 = vmul.f32 %v559_v11, %v559_v11 }
  0xde   : > { %v592_v15 = vrot.slane %v591_v13, 4  ;;  %v635_v16 = vadd.f32 %v634_v12, %v620_v14 }
  0xe0   : > { %v593_v17 = vadd.f32 %v592_v15, %v591_v13  ;;  %v636_v18 = vrot.slane %v635_v16, 4  ;;  %v445_v19 = vpop.f32.mrf.mxu0 }
  0xe1   : > { %v561_v20 = vpop.f32.mrf.mxu1 }
  0xe2   : > { %v594_v21 = vrot.slane %v593_v17, 2  ;;  %v637_v22 = vadd.f32 %v636_v18, %v635_v16  ;;  %v3194_v61 = vadd.f32 %v561_v20, %v445_v19  ;;  %v1462_v19 = vld [vmem:[%s4433_s4 + $0x78] sm:$0xff] }
  0xe3   : > { %v1478_v20 = vld [vmem:[%s4433_s4 + $0xf8] sm:$0xff]  ;;  %1495 = vmatpush.msra.mxu2 %v1462_v19 }
  0xe4   : > { %v595_v23 = vadd.f32 %v594_v21, %v593_v17  ;;  %v638_v24 = vrot.slane %v637_v22, 2  ;;  %v621_v10 = vmul.f32 %v3194_v61, %v3194_v61  ;;  %1536 = vmatpush.msra.mxu3 %v1478_v20 }
  0xe6   : > { %v596_v25 = vrot.slane %v595_v23, 1  ;;  %v639_v26 = vadd.f32 %v638_v24, %v637_v22 }
  0xe8   : > { %v597_v27 = vadd.f32 %v596_v25, %v595_v23  ;;  %v640_v28 = vrot.slane %v639_v26, 1  ;;  %v448_v29 = vpop.f32.mrf.mxu0  ;;  %v1461_v25 = vld [vmem:[%s4433_s4 + $0x70] sm:$0xff] }
  0xe9   : > { %v564_v30 = vpop.f32.mrf.mxu1  ;;  %1496 = vmatpush.msra.mxu2 %v1461_v25 }
  0xea   : > { %v3178_v31 = vmul.f32 0.015625, %v597_v27  ;;  %v641_v32 = vadd.f32 %v640_v28, %v639_v26  ;;  %v3191_v58 = vadd.f32 %v564_v30, %v448_v29  ;;  %v1477_v26 = vld [vmem:[%s4433_s4 + $0xf0] sm:$0xff] }
  0xeb   : > { %1537 = vmatpush.msra.mxu3 %v1477_v26 }
  0xec   : > { %v655_v33 = vmul.f32 0.015625, %v641_v32  ;;  %v657_v34 = vmul.f32 %v3178_v31, %v3178_v31  ;;  %v665_v39 = vsub.f32 %v3159_v54, %v3178_v31  ;;  %v666_v40 = vsub.f32 %v3164_v60, %v3178_v31 }
  0xed   : > { %v668_v63 = vsub.f32 %v559_v11, %v3178_v31  ;;  %v661_v3 = vsub.f32 %v3145_v47, %v3178_v31  ;;  %v662_v4 = vsub.f32 %v3143_v46, %v3178_v31  ;;  %v622_v5 = vmul.f32 %v3191_v58, %v3191_v58 }
  0xee   : > { %v659_v35 = vsub.f32 %v655_v33, %v657_v34  ;;  %v598_v47 = vadd.f32 %v3191_v58, %v3194_v61  ;;  %v667_v21 = vsub.f32 %v3169_v0, %v3178_v31  ;;  %v663_v28 = vsub.f32 %v3147_v48, %v3178_v31  ;;  %v1460_v48 = vld [vmem:[%s4433_s4 + $0x68] sm:$0xff] }
  0xef   : > { %v642_v17 = vadd.f32 %v622_v5, %v621_v10  ;;  %v664_v29 = vsub.f32 %v3151_v50, %v3178_v31  ;;  %v1476_v50 = vld [vmem:[%s4433_s4 + $0xe8] sm:$0xff]  ;;  %1497 = vmatpush.msra.mxu2 %v1460_v48  ;;  %v1458_v5 = vld [vmem:[%s4433_s4 + $0x58] sm:$0xff] }
  0xf0   : > { %v677_v36 = vadd.f32 1e-05, %v659_v35  ;;  %v451_v37 = vpop.f32.mrf.mxu0  ;;  %1538 = vmatpush.msra.mxu3 %v1476_v50 }
  0xf1   : > { %v567_v38 = vpop.f32.mrf.mxu1 }
  0xf2   : > { %2690 = vrsqrt.f32 %v677_v36  ;;  %vm685_vm3 = vweird.f32 %v677_v36  ;;  %v3196_v62 = vadd.f32 %v567_v38, %v451_v37 }
  0xf4   : > { %v623_v46 = vmul.f32 %v3196_v62, %v3196_v62  ;;  %v599_v23 = vadd.f32 %v598_v47, %v3196_v62 }
  0xf6   : > { %v643_v24 = vadd.f32 %v642_v17, %v623_v46 }
  0xf8   : > { %v2691_v41 = vpop.eup %2690  ;;  %v454_v43 = vpop.f32.mrf.mxu0 }
  0xf9   : > { %v680_v42 = vmul.f32 %v2691_v41, %v677_v36  ;;  %v570_v44 = vpop.f32.mrf.mxu1  ;;  %vm686_vm2 = vweird.f32 %v2691_v41 }
  0xfa   : > { %vm687_vm4 = vmor %vm685_vm3, %vm686_vm2  ;;  %v3212_v6 = vadd.f32 %v570_v44, %v454_v43 }
  0xfb   : > { %v681_v45 = vmul.f32 %v2691_v41, %v680_v42 }
  0xfc   : > { %v624_v18 = vmul.f32 %v3212_v6, %v3212_v6  ;;  %v600_v32 = vadd.f32 %v599_v23, %v3212_v6 }
  0xfd   : > { %v682_v49 = vmul.f32 0.5, %v681_v45 }
  0xfe   : > { %v644_v35 = vadd.f32 %v643_v24, %v624_v18  ;;  %v1457_v18 = vld [vmem:[%s4433_s4 + $0x50] sm:$0xff] }
  0xff   : > { %v683_v51 = vsub.f32 1.5, %v682_v49 }
 0x100   : > { %v457_v55 = vpop.f32.mrf.mxu0 }
 0x101   : > { %v684_v52 = vmul.f32 %v2691_v41, %v683_v51  ;;  %v573_v56 = vpop.f32.mrf.mxu1 }
 0x102   : > { %v3224_v14 = vadd.f32 %v573_v56, %v457_v55  ;;  %v1475_v55 = vld [vmem:[%s4433_s4 + $0xe0] sm:$0xff] }
 0x103   : > { %v688_v57 = vsel %vm687_vm4, %v2691_v41, %v684_v52  ;;  %v1459_v52 = vld [vmem:[%s4433_s4 + $0x60] sm:$0xff]  ;;  %1539 = vmatpush.msra.mxu3 %v1475_v55 }
 0x104   : > { %v700_v59 = vmul.f32 %v3189_v53, %v688_v57  ;;  %v625_v33 = vmul.f32 %v3224_v14, %v3224_v14  ;;  %v601_v45 = vadd.f32 %v600_v32, %v3224_v14  ;;  %1498 = vmatpush.msra.mxu2 %v1459_v52 }
 0x106   : > { %v3199_v1 = vperm.slane %v700_v59, 0  ;;  %1499 = vmatpush.msra.mxu2 %v1458_v5 }
 0x108   : > { %v711_v7 = vmul.f32 %v3199_v1, %v668_v63  ;;  %v704_v8 = vmul.f32 %v3199_v1, %v661_v3  ;;  %v705_v9 = vmul.f32 %v3199_v1, %v662_v4  ;;  %v460_v11 = vpop.f32.mrf.mxu0  ;;  %v706_v37 = vmul.f32 %v3199_v1, %v663_v28  ;;  %1500 = vmatpush.msra.mxu2 %v1457_v18 }
 0x109   : > { %v576_v12 = vpop.f32.mrf.mxu1  ;;  %v707_v38 = vmul.f32 %v3199_v1, %v664_v29  ;;  %v645_v63 = vadd.f32 %v644_v35, %v625_v33  ;;  %v1456_v29 = vld [vmem:[%s4433_s4 + $0x48] sm:$0xff]  ;;  %v709_v54 = vmul.f32 %v3199_v1, %v666_v40 }
 0x10a   : > { %v731_v13 = vadd.f32 %v3204_v2, %v711_v7  ;;  %v3227_v15 = vadd.f32 %v3204_v2, %v704_v8  ;;  %v3230_v16 = vadd.f32 %v3204_v2, %v705_v9  ;;  %v3274_v43 = vadd.f32 %v576_v12, %v460_v11  ;;  %v1474_v7 = vld [vmem:[%s4433_s4 + $0xd8] sm:$0xff]  ;;  %1501 = vmatpush.msra.mxu2 %v1456_v29 }
 0x10b   : > { %v3297_v10 = vadd.f32 %v3204_v2, %v706_v37  ;;  %1540 = vmatpush.msra.mxu3 %v1474_v7  ;;  %v3305_v11 = vadd.f32 %v3204_v2, %v707_v38  ;;  %v1455_v38 = vld [vmem:[%s4433_s4 + $0x40] sm:$0xff] }
 0x10c   : > { %v3242_v22 = vmul.f32 0.70710677, %v731_v13  ;;  %v3252_v27 = vmul.f32 0.70710677, %v3227_v15  ;;  %v3263_v34 = vmul.f32 0.70710677, %v3230_v16  ;;  %v626_v46 = vmul.f32 %v3274_v43, %v3274_v43  ;;  %1502 = vmatpush.msra.mxu2 %v1455_v38 }
 0x10d   : > { %v3299_v47 = vmul.f32 0.5, %v731_v13  ;;  %v602_v17 = vadd.f32 %v601_v45, %v3274_v43  ;;  %v1473_v13 = vld [vmem:[%s4433_s4 + $0xd0] sm:$0xff]  ;;  %v3318_v24 = vmul.f32 0.5, %v3227_v15  ;;  %v3321_v25 = vmul.f32 0.5, %v3230_v16 }
 0x10e   : > { %v779_v30 = vand.u32 2147483647, %v3242_v22  ;;  %v772_v36 = vand.u32 2147483647, %v3252_v27  ;;  %v773_v44 = vand.u32 2147483647, %v3263_v34  ;;  %1541 = vmatpush.msra.mxu3 %v1473_v13  ;;  %v646_v16 = vadd.f32 %v645_v63, %v626_v46 }
 0x10f   : > { %v3337_v35 = vmul.f32 0.70710677, %v3297_v10  ;;  %v1454_v63 = vld [vmem:[%s4433_s4 + $0x38] sm:$0xff]  ;;  %v3371_v7 = vmul.f32 0.70710677, %v3305_v11 }
 0x110   : > { %v795_v41 = vmul.f32 0.3275911, %v779_v30  ;;  %v1211_v42 = vmul.f32 %v779_v30, %v779_v30  ;;  %v463_v49 = vpop.f32.mrf.mxu0  ;;  %v788_v56 = vmul.f32 0.3275911, %v772_v36  ;;  %v789_v3 = vmul.f32 0.3275911, %v773_v44  ;;  %1503 = vmatpush.msra.mxu2 %v1454_v63 }
 0x111   : > { %v579_v51 = vpop.f32.mrf.mxu1  ;;  %v1204_v9 = vmul.f32 %v772_v36, %v772_v36  ;;  %v1205_v20 = vmul.f32 %v773_v44, %v773_v44  ;;  %v1472_v30 = vld [vmem:[%s4433_s4 + $0xc8] sm:$0xff]  ;;  %v3381_v18 = vand.u32 2147483647, %v3337_v35 }
 0x112   : > { %v3284_v57 = vadd.f32 1.0, %v795_v41  ;;  %v1227_v59 = vsub.f32 0.0, %v1211_v42  ;;  %v3286_v4 = vadd.f32 %v579_v51, %v463_v49  ;;  %v3294_v8 = vadd.f32 1.0, %v788_v56  ;;  %1542 = vmatpush.msra.mxu3 %v1472_v30  ;;  %v1471_v41 = vld [vmem:[%s4433_s4 + $0xc0] sm:$0xff]  ;;  %v1449_v56 = vld [vmem:[%s4433_s4 + $0x10] sm:$0xff] }
 0x113   : > { %v3315_v19 = vadd.f32 1.0, %v789_v3  ;;  %v1220_v32 = vsub.f32 0.0, %v1204_v9  ;;  %v1221_v44 = vsub.f32 0.0, %v1205_v20  ;;  %v1470_v3 = vld [vmem:[%s4433_s4 + $0xb8] sm:$0xff]  ;;  %v1453_v20 = vld [vmem:[%s4433_s4 + $0x30] sm:$0xff] }
 0x114   : > { %2692 = vrcp.f32 %v3284_v57  ;;  %v936_v12 = vand.u32 2147483648, %v3284_v57  ;;  %v1250_v23 = vmul.f32 1.442695, %v1227_v59  ;;  %v934_v26 = vand.u32 2147483647, %v3284_v57  ;;  %1543 = vmatpush.msra.mxu3 %v1471_v41  ;;  %1504 = vmatpush.msra.mxu2 %v1453_v20 }
 0x115   : > { %2694 = vrcp.f32 %v3294_v8  ;;  %v627_v28 = vmul.f32 %v3286_v4, %v3286_v4  ;;  %v831_v15 = vand.u32 2147483648, %v3294_v8  ;;  %v846_v33 = vand.u32 2147483648, %v3315_v19 }
 0x116   : > { %2696 = vrcp.f32 %v3315_v19  ;;  %vm930_vm5 = vweird.f32 %v3284_v57  ;;  %v3340_v48 = vor.u32 1.1754944e-38, %v936_v12  ;;  %v603_v50 = vadd.f32 %v602_v17, %v3286_v4  ;;  %1544 = vmatpush.msra.mxu3 %v1470_v3 }
 0x117   : > { %v829_v42 = vand.u32 2147483647, %v3294_v8  ;;  %2698 = vpow2.f32 %v1250_v23  ;;  %v3354_v51 = vor.u32 1.1754944e-38, %v831_v15  ;;  %v844_v52 = vand.u32 2147483647, %v3315_v19  ;;  %v1469_v23 = vld [vmem:[%s4433_s4 + $0xb0] sm:$0xff] }
 0x118   : > { %v466_v36 = vpop.f32.mrf.mxu0  ;;  %vm3359_vm6 = vcmp.eq.f32.partialorder %v934_v26, 8.507059e+37  ;;  %v647_v59 = vadd.f32 %v646_v16, %v627_v28  ;;  %vm825_vm7 = vweird.f32 %v3294_v8  ;;  %v1236_v5 = vmul.f32 1.442695, %v1220_v32  ;;  %1545 = vmatpush.msra.mxu3 %v1469_v23 }
 0x119   : > { %v582_v37 = vpop.f32.mrf.mxu1  ;;  %v3378_v17 = vor.u32 1.1754944e-38, %v846_v33  ;;  %vm3392_vm9 = vcmp.eq.f32.partialorder %v829_v42, 8.507059e+37  ;;  %vm840_vm10 = vweird.f32 %v3315_v19  ;;  %v1238_v29 = vmul.f32 1.442695, %v1221_v44 }
 0x11a   : > { %v3350_v45 = vpop.eup %2692  ;;  %v3352_v49 = vadd.f32 %v582_v37, %v466_v36  ;;  %v3400_v16 = vand.u32 2147483647, %v3371_v7  ;;  %v790_v33 = vmul.f32 0.3275911, %v3381_v18  ;;  %v1452_v36 = vld [vmem:[%s4433_s4 + $0x28] sm:$0xff]  ;;  %vm3412_vm11 = vcmp.eq.f32.partialorder %v844_v52, 8.507059e+37 }
 0x11b   : > { %v926_v55 = vmul.f32 %v3350_v45, %v3284_v57  ;;  %v3373_v9 = vpop.eup %2694  ;;  %vm931_vm8 = vweird.f32 %v3350_v45  ;;  %v1468_v37 = vld [vmem:[%s4433_s4 + $0xa8] sm:$0xff]  ;;  %2700 = vpow2.f32 %v1236_v5  ;;  %1505 = vmatpush.msra.mxu2 %v1452_v36  ;;  %v1451_v52 = vld [vmem:[%s4433_s4 + $0x20] sm:$0xff] }
 0x11c   : > { %v604_v46 = vadd.f32 %v603_v50, %v3352_v49  ;;  %v628_v12 = vmul.f32 %v3352_v49, %v3352_v49  ;;  %v821_v26 = vmul.f32 %v3373_v9, %v3294_v8  ;;  %v3397_v30 = vpop.eup %2696  ;;  %1546 = vmatpush.msra.mxu3 %v1468_v37  ;;  %v791_v63 = vmul.f32 0.3275911, %v3400_v16  ;;  %v1467_v5 = vld [vmem:[%s4433_s4 + $0xa0] sm:$0xff]  ;;  %vm932_vm13 = vmor %vm930_vm5, %vm931_vm8 }
 0x11d   : > { %v927_v13 = vsub.f32 1.0, %v926_v55  ;;  %v836_v41 = vmul.f32 %v3397_v30, %v3315_v19  ;;  %v3416_v44 = vpop.eup %2698  ;;  %v3419_v3 = vadd.f32 1.0, %v790_v33  ;;  %vm826_vm12 = vweird.f32 %v3373_v9  ;;  %1506 = vmatpush.msra.mxu2 %v1451_v52  ;;  %v1466_v33 = vld [vmem:[%s4433_s4 + $0x98] sm:$0xff] }
 0x11e   : > { %v605_v15 = vrot.slane %v604_v46, 4  ;;  %v648_v32 = vadd.f32 %v647_v59, %v628_v12  ;;  %v822_v38 = vsub.f32 1.0, %v821_v26  ;;  %1547 = vmatpush.msra.mxu3 %v1467_v5  ;;  %vm841_vm14 = vweird.f32 %v3397_v30  ;;  %vm827_vm15 = vmor %vm825_vm7, %vm826_vm12  ;;  %v1448_v5 = vld [vmem:[%s4433_s4 + $0x8] sm:$0xff] }
 0x11f   : > { %v928_v50 = vmul.f32 %v3350_v45, %v927_v13  ;;  %2702 = vrcp.f32 %v3419_v3  ;;  %v859_v8 = vand.u32 2147483647, %v3419_v3  ;;  %vm842_vm0 = vmor %vm840_vm10, %vm841_vm14  ;;  %vm855_vm2 = vweird.f32 %v3419_v3 }
 0x120   : > { %v606_v55 = vadd.f32 %v605_v15, %v604_v46  ;;  %v649_v59 = vrot.slane %v648_v32, 4  ;;  %v823_v13 = vmul.f32 %v3373_v9, %v822_v38  ;;  %v837_v46 = vsub.f32 1.0, %v836_v41  ;;  %v1450_v15 = vld [vmem:[%s4433_s4 + $0x18] sm:$0xff]  ;;  %1548 = vmatpush.msra.mxu3 %v1466_v33 }
 0x121   : > { %v929_v12 = vadd.f32 %v3350_v45, %v928_v50  ;;  %v3445_v50 = vadd.f32 1.0, %v791_v63  ;;  %1507 = vmatpush.msra.mxu2 %v1450_v15  ;;  %2704 = vpow2.f32 %v1238_v29  ;;  %v3456_v38 = vpop.eup %2700  ;;  %v1463_v15 = vld [vmem:[%s4433_s4 + $0x80] sm:$0xff]  ;;  %vm3508_vm1 = vcmp.eq.f32.partialorder %v859_v8, 8.507059e+37 }
 0x122   : > { %v607_v20 = vrot.slane %v606_v55, 2  ;;  %v650_v23 = vadd.f32 %v649_v59, %v648_v32  ;;  %v824_v57 = vadd.f32 %v3373_v9, %v823_v13  ;;  %v838_v32 = vmul.f32 %v3397_v30, %v837_v46  ;;  %v1464_v13 = vld [vmem:[%s4433_s4 + $0x88] sm:$0xff] }
 0x123   : > { %v933_v26 = vsel %vm932_vm13, %v3350_v45, %v929_v12  ;;  %1508 = vmatpush.msra.mxu2 %v1449_v56  ;;  %2706 = vrcp.f32 %v3445_v50  ;;  %v1206_v56 = vmul.f32 %v3381_v18, %v3381_v18  ;;  %vm870_vm4 = vweird.f32 %v3445_v50 }
 0x124   : > { %v3450_v36 = vsel %vm3359_vm6, %v3340_v48, %v933_v26  ;;  %v608_v45 = vadd.f32 %v607_v20, %v606_v55  ;;  %v651_v37 = vrot.slane %v650_v23, 2  ;;  %v1465_v48 = vld [vmem:[%s4433_s4 + $0x90] sm:$0xff]  ;;  %v828_v55 = vsel %vm827_vm15, %v3373_v9, %v824_v57 }
 0x125   : > { %v1067_v41 = vmul.f32 1.0614054, %v3450_v36  ;;  %v839_v59 = vadd.f32 %v3397_v30, %v838_v32  ;;  %1549 = vmatpush.msra.mxu3 %v1465_v48  ;;  %v3471_v12 = vsel %vm3392_vm9, %v3354_v51, %v828_v55  ;;  %v861_v9 = vand.u32 2147483648, %v3419_v3  ;;  %v3487_v46 = vpop.eup %2702  ;;  %1509 = vmatpush.msra.mxu2 %v1448_v5 }
 0x126   : > { %v609_v63 = vrot.slane %v608_v45, 1  ;;  %v652_v29 = vadd.f32 %v651_v37, %v650_v23  ;;  %v1060_v51 = vmul.f32 1.0614054, %v3471_v12  ;;  %v851_v32 = vmul.f32 %v3487_v46, %v3419_v3 }
 0x127   : > { %v1083_v52 = vadd.f32 -1.4531521, %v1067_v41  ;;  %v843_v28 = vsel %vm842_vm0, %v3397_v30, %v839_v59  ;;  %1550 = vmatpush.msra.mxu3 %v1464_v13  ;;  %v1447_v30 = vld [vmem:[%s4433_s4] sm:$0xff]  ;;  %v2951_v37 = vmov 0.0   ;;  %vm856_vm3 = vweird.f32 %v3487_v46 }
 0x128   : > { %v610_v19 = vadd.f32 %v609_v63, %v608_v45  ;;  %v653_v20 = vrot.slane %v652_v29, 1  ;;  %v3492_v23 = vsel %vm3412_vm11, %v3378_v17, %v843_v28  ;;  %v1076_v57 = vadd.f32 -1.4531521, %v1060_v51  ;;  %v3504_v45 = vpop.eup %2704  ;;  %1510 = vmatpush.msra.mxu2 %v1447_v30  ;;  %1380 = vst [vmem:[#allocation2] sm:$0x1] %v2951_v37  ;;  %vm857_vm6 = vmor %vm855_vm2, %vm856_vm3 }
 0x129   : > { %v1099_v26 = vmul.f32 %v1083_v52, %v3450_v36  ;;  %v1061_v33 = vmul.f32 1.0614054, %v3492_v23  ;;  %1551 = vmatpush.msra.mxu3 %v1463_v15  ;;  %v852_v52 = vsub.f32 1.0, %v851_v32  ;;  %v2707_v8 = vpop.eup %2706  ;;  %v862_v18 = vor.u32 1.1754944e-38, %v861_v9  ;;  %1381 = vst [vmem:[#allocation2 + $0x48] sm:$0x1] %v2951_v37 }
 0x12a   : > { %v3506_v17 = vmul.f32 0.015625, %v610_v19  ;;  %v654_v42 = vadd.f32 %v653_v20, %v652_v29  ;;  %v1092_v59 = vmul.f32 %v1076_v57, %v3471_v12  ;;  %v866_v20 = vmul.f32 %v2707_v8, %v3445_v50  ;;  %1938 = vst [vmem:[#allocation3] sm:$0x1] %v2951_v37 }
 0x12b   : > { %v1115_v48 = vadd.f32 1.4214138, %v1099_v26  ;;  %v1077_v55 = vadd.f32 -1.4531521, %v1061_v33  ;;  %v853_v19 = vmul.f32 %v3487_v46, %v852_v52  ;;  %v874_v26 = vand.u32 2147483647, %v3445_v50 }
 0x12c   : > { %v656_v63 = vmul.f32 0.015625, %v654_v42  ;;  %v658_v29 = vmul.f32 %v3506_v17, %v3506_v17  ;;  %v1108_v28 = vadd.f32 1.4214138, %v1092_v59  ;;  %v867_v9 = vsub.f32 1.0, %v866_v20  ;;  %1939 = vst [vmem:[#allocation3 + $0x28] sm:$0x1] %v2951_v37 }
 0x12d   : > { %v1131_v5 = vmul.f32 %v1115_v48, %v3450_v36  ;;  %v1093_v13 = vmul.f32 %v1077_v55, %v3492_v23  ;;  %v854_v32 = vadd.f32 %v3487_v46, %v853_v19  ;;  %vm871_vm5 = vweird.f32 %v2707_v8 }
 0x12e   : > { %v660_v51 = vsub.f32 %v656_v63, %v658_v29  ;;  %v1124_v33 = vmul.f32 %v1108_v28, %v3471_v12  ;;  %v876_v59 = vand.u32 2147483648, %v3445_v50  ;;  %v868_v29 = vmul.f32 %v2707_v8, %v867_v9  ;;  %vm872_vm9 = vmor %vm870_vm4, %vm871_vm5 }
 0x12f   : > { %v1147_v30 = vadd.f32 -0.28449672, %v1131_v5  ;;  %v1109_v15 = vadd.f32 1.4214138, %v1093_v13  ;;  %v858_v63 = vsel %vm857_vm6, %v3487_v46, %v854_v32  ;;  %v1207_v52 = vmul.f32 %v3400_v16, %v3400_v16 }
 0x130   : > { %v3526_v57 = vadd.f32 1e-05, %v660_v51  ;;  %v1140_v55 = vadd.f32 -0.28449672, %v1124_v33  ;;  %v3543_v37 = vsel %vm3508_vm1, %v862_v18, %v858_v63  ;;  %vm1307_vm7 = vcmp.lt.f32.partialorder %v3242_v22, 0.0 }
 0x131   : > { %v1163_v42 = vmul.f32 %v1147_v30, %v3450_v36  ;;  %v1125_v48 = vmul.f32 %v1109_v15, %v3492_v23  ;;  %v869_v3 = vadd.f32 %v2707_v8, %v868_v29  ;;  %vm3546_vm8 = vcmp.eq.f32.partialorder %v874_v26, 8.507059e+37 }
 0x132   : > { %2708 = vrsqrt.f32 %v3526_v57  ;;  %v1156_v28 = vmul.f32 %v1140_v55, %v3471_v12  ;;  %v1062_v46 = vmul.f32 1.0614054, %v3543_v37  ;;  %v1222_v19 = vsub.f32 0.0, %v1206_v56 }
 0x133   : > { %v1179_v5 = vadd.f32 0.2548296, %v1163_v42  ;;  %v1141_v13 = vadd.f32 -0.28449672, %v1125_v48  ;;  %v877_v41 = vor.u32 1.1754944e-38, %v876_v59  ;;  %v873_v18 = vsel %vm872_vm9, %v2707_v8, %v869_v3 }
 0x134   : > { %v1172_v30 = vadd.f32 0.2548296, %v1156_v28  ;;  %v1078_v15 = vadd.f32 -1.4531521, %v1062_v46  ;;  %v1223_v33 = vsub.f32 0.0, %v1207_v52  ;;  %vm1300_vm10 = vcmp.lt.f32.partialorder %v3252_v27, 0.0 }
 0x135   : > { %v1195_v16 = vmul.f32 %v1179_v5, %v3450_v36  ;;  %v1157_v20 = vmul.f32 %v1141_v13, %v3492_v23  ;;  %v1240_v26 = vmul.f32 1.442695, %v1222_v19  ;;  %v3561_v36 = vsel %vm3546_vm8, %v877_v41, %v873_v18 }
 0x136   : > { %v1188_v42 = vmul.f32 %v1172_v30, %v3471_v12  ;;  %vm1301_vm11 = vcmp.lt.f32.partialorder %v3263_v34, 0.0  ;;  %v1063_v50 = vmul.f32 1.0614054, %v3561_v36  ;;  %v1094_v8 = vmul.f32 %v1078_v15, %v3543_v37 }
 0x137   : > { %v1275_v32 = vmul.f32 %v3416_v44, %v1195_v16  ;;  %v1173_v9 = vadd.f32 0.2548296, %v1157_v20  ;;  %v708_v44 = vmul.f32 %v3199_v1, %v665_v39  ;;  %vm695_vm12 = vweird.f32 %v3526_v57 }
 0x138   : > { %v2709_v56 = vpop.eup %2708  ;;  %2710 = vpow2.f32 %v1240_v26  ;;  %v1268_v59 = vmul.f32 %v3456_v38, %v1188_v42  ;;  %v1079_v63 = vadd.f32 -1.4531521, %v1063_v50  ;;  %v1110_v29 = vadd.f32 1.4214138, %v1094_v8 }
 0x139   : > { %v1291_v48 = vsub.f32 1.0, %v1275_v32  ;;  %v690_v12 = vmul.f32 %v2709_v56, %v3526_v57  ;;  %v1189_v55 = vmul.f32 %v1173_v9, %v3492_v23  ;;  %v1242_v52 = vmul.f32 1.442695, %v1223_v33 }
 0x13a   : > { %vm696_vm13 = vweird.f32 %v2709_v56  ;;  %v1284_v39 = vsub.f32 1.0, %v1268_v59  ;;  %v1095_v3 = vmul.f32 %v1079_v63, %v3561_v36  ;;  %v1126_v23 = vmul.f32 %v1110_v29, %v3543_v37 }
 0x13b   : > { %v1323_v5 = vsub.f32 0.0, %v1291_v48  ;;  %v691_v13 = vmul.f32 %v2709_v56, %v690_v12  ;;  %v1269_v28 = vmul.f32 %v3504_v45, %v1189_v55  ;;  %v3584_v19 = vadd.f32 %v3204_v2, %v708_v44  ;;  %vm697_vm14 = vmor %vm695_vm12, %vm696_vm13 }
 0x13c   : > { %v1316_v16 = vsub.f32 0.0, %v1284_v39  ;;  %v1111_v20 = vadd.f32 1.4214138, %v1095_v3  ;;  %v1142_v60 = vadd.f32 -0.28449672, %v1126_v23  ;;  %2712 = vpow2.f32 %v1242_v52 }
 0x13d   : > { %v1339_v38 = vsel %vm1307_vm7, %v1323_v5, %v1291_v48  ;;  %v692_v51 = vmul.f32 0.5, %v691_v13  ;;  %v1285_v46 = vsub.f32 1.0, %v1269_v28  ;;  %v3587_v18 = vadd.f32 %v3204_v2, %v709_v54 }
 0x13e   : > { %v1355_v45 = vadd.f32 1.0, %v1339_v38  ;;  %v2711_v30 = vpop.eup %2710  ;;  %v1332_v22 = vsel %vm1300_vm10, %v1316_v16, %v1284_v39  ;;  %v1127_v33 = vmul.f32 %v1111_v20, %v3561_v36  ;;  %v1158_v26 = vmul.f32 %v1142_v60, %v3543_v37 }
 0x13f   : > { %v693_v40 = vsub.f32 1.5, %v692_v51  ;;  %v1317_v41 = vsub.f32 0.0, %v1285_v46  ;;  %v1348_v42 = vadd.f32 1.0, %v1332_v22  ;;  %v3597_v50 = vmul.f32 0.70710677, %v3584_v19 }
 0x140   : > { %v1371_v15 = vmul.f32 %v1355_v45, %v3299_v47  ;;  %v1143_v27 = vadd.f32 -0.28449672, %v1127_v33  ;;  %v1174_v8 = vadd.f32 0.2548296, %v1158_v26  ;;  %v710_v44 = vmul.f32 %v3199_v1, %v667_v21 }
 0x141   : > { %v694_v32 = vmul.f32 %v2709_v56, %v693_v40  ;;  %v1333_v9 = vsel %vm1301_vm11, %v1317_v41, %v1285_v46  ;;  %v1364_v34 = vmul.f32 %v1348_v42, %v3318_v24  ;;  %v3608_v12 = vmul.f32 0.70710677, %v3587_v18 }
 0x142   : > { %1391 = vst [vmem:[#allocation2 + $0x39] sm:$0xff] %v1371_v15  ;;  %v1349_v47 = vadd.f32 1.0, %v1333_v9  ;;  %v3611_v55 = vand.u32 2147483647, %v3597_v50  ;;  %v1159_v63 = vmul.f32 %v1143_v27, %v3561_v36  ;;  %v1190_v29 = vmul.f32 %v1174_v8, %v3543_v37  ;;  %v2713_v0 = vpop.eup %2712 }
 0x143   : > { %v698_v48 = vsel %vm697_vm14, %v2709_v56, %v694_v32  ;;  %1384 = vst [vmem:[#allocation2 + $0x1] sm:$0xff] %v1364_v34  ;;  %v3618_v31 = vand.u32 2147483647, %v3608_v12  ;;  %v676_v21 = vsub.f32 %v3352_v49, %v3506_v17  ;;  %vm1302_vm15 = vcmp.lt.f32.partialorder %v3337_v35, 0.0 }
 0x144   : > { %v701_v57 = vmul.f32 %v3189_v53, %v698_v48  ;;  %v1365_v59 = vmul.f32 %v1349_v47, %v3321_v25  ;;  %v792_v1 = vmul.f32 0.3275911, %v3611_v55  ;;  %v1175_v53 = vadd.f32 0.2548296, %v1159_v63 }
 0x145   : > { %v1270_v56 = vmul.f32 %v2711_v30, %v1190_v29  ;;  %v793_v25 = vmul.f32 0.3275911, %v3618_v31  ;;  %v742_v46 = vmul.f32 0.5, %v3297_v10  ;;  %vm1303_vm0 = vcmp.lt.f32.partialorder %v3371_v7, 0.0 }
 0x146   : > { %v3623_v24 = vperm.slane %v701_v57, 0  ;;  %1385 = vst [vmem:[#allocation2 + $0x9] sm:$0xff] %v1365_v59  ;;  %v808_v52 = vadd.f32 1.0, %v792_v1  ;;  %v1191_v5 = vmul.f32 %v1175_v53, %v3561_v36  ;;  %v743_v22 = vmul.f32 0.5, %v3305_v11 }
 0x147   : > { %v1286_v13 = vsub.f32 1.0, %v1270_v56  ;;  %v3628_v28 = vadd.f32 1.0, %v793_v25  ;;  %v3649_v9 = vadd.f32 %v3204_v2, %v710_v44  ;;  %v1208_v53 = vmul.f32 %v3611_v55, %v3611_v55 }
 0x148   : > { %v719_v37 = vmul.f32 %v3623_v24, %v676_v21  ;;  %2714 = vrcp.f32 %v808_v52  ;;  %v1271_v49 = vmul.f32 %v2713_v0, %v1191_v5  ;;  %v891_v7 = vand.u32 2147483648, %v808_v52 }
 0x149   : > { %v1318_v39 = vsub.f32 0.0, %v1286_v13  ;;  %2716 = vrcp.f32 %v3628_v28  ;;  %v889_v27 = vand.u32 2147483647, %v808_v52  ;;  %vm885_vm2 = vweird.f32 %v808_v52 }
 0x14a   : > { %v3631_v54 = vadd.f32 %v3204_v2, %v719_v37  ;;  %v1287_v23 = vsub.f32 1.0, %v1271_v49  ;;  %v906_v11 = vand.u32 2147483648, %v3628_v28  ;;  %v3654_v48 = vmul.f32 0.70710677, %v3649_v9 }
 0x14b   : > { %v1334_v38 = vsel %vm1302_vm15, %v1318_v39, %v1286_v13  ;;  %v904_v2 = vand.u32 2147483647, %v3628_v28  ;;  %v892_v44 = vor.u32 1.1754944e-38, %v891_v7  ;;  %vm890_vm5 = vcmp.eq.f32.partialorder %v889_v27, 8.507059e+37 }
 0x14c   : > { %v3636_v3 = vmul.f32 0.70710677, %v3631_v54  ;;  %v1350_v45 = vadd.f32 1.0, %v1334_v38  ;;  %v1319_v20 = vsub.f32 0.0, %v1287_v23  ;;  %v3658_v59 = vand.u32 2147483647, %v3654_v48 }
 0x14d   : > { %v1400_v51 = vld [vmem:[#allocation2] ss:$2 sm:$0xff]  ;;  %v1408_v36 = vld [vmem:[#allocation2 + $0x1] ss:$2 sm:$0xff]  ;;  %vm900_vm6 = vweird.f32 %v3628_v28  ;;  %v907_v21 = vor.u32 1.1754944e-38, %v906_v11  ;;  %vm905_vm8 = vcmp.eq.f32.partialorder %v904_v2, 8.507059e+37 }
 0x14e   : > { %v3640_v16 = vand.u32 2147483647, %v3636_v3  ;;  %1511 = vmatmul.f32.vlgmr.msra.gmra.mxu2 %v1400_v51  ;;  %1552 = vmatmul.f32.vlgmr.msra.gmra.mxu3 %v1408_v36  ;;  %v2715_v60 = vpop.eup %2714  ;;  %v1366_v35 = vmul.f32 %v1350_v45, %v742_v46  ;;  %v1335_v40 = vsel %vm1303_vm0, %v1319_v20, %v1287_v23  ;;  %v794_v56 = vmul.f32 0.3275911, %v3658_v59 }
 0x14f   : > { %v881_v41 = vmul.f32 %v2715_v60, %v808_v52  ;;  %v2717_v15 = vpop.eup %2716  ;;  %v1351_v33 = vadd.f32 1.0, %v1335_v40  ;;  %vm886_vm1 = vweird.f32 %v2715_v60  ;;  %v1224_v46 = vsub.f32 0.0, %v1208_v53 }
 0x150   : > { %v803_v30 = vmul.f32 0.3275911, %v3640_v16  ;;  %1386 = vst [vmem:[#allocation2 + $0x11] sm:$0xff] %v1366_v35  ;;  %v896_v32 = vmul.f32 %v2717_v15, %v3628_v28  ;;  %vm901_vm3 = vweird.f32 %v2717_v15  ;;  %vm887_vm4 = vmor %vm885_vm2, %vm886_vm1  ;;  %v1209_v28 = vmul.f32 %v3618_v31, %v3618_v31 }
 0x151   : > { %v882_v26 = vsub.f32 1.0, %v881_v41  ;;  %v1367_v42 = vmul.f32 %v1351_v33, %v743_v22  ;;  %vm902_vm7 = vmor %vm900_vm6, %vm901_vm3  ;;  %v810_v39 = vadd.f32 1.0, %v794_v56  ;;  %v1244_v22 = vmul.f32 1.442695, %v1224_v46 }
 0x152   : > { %v3645_v10 = vadd.f32 1.0, %v803_v30  ;;  %v897_v8 = vsub.f32 1.0, %v896_v32  ;;  %v1225_v35 = vsub.f32 0.0, %v1209_v28  ;;  %vm1304_vm1 = vcmp.lt.f32.partialorder %v3597_v50, 0.0 }
 0x153   : > { %1387 = vst [vmem:[#allocation2 + $0x19] sm:$0xff] %v1367_v42  ;;  %v883_v47 = vmul.f32 %v2715_v60, %v882_v26  ;;  %vm915_vm14 = vweird.f32 %v810_v39  ;;  %vm1305_vm2 = vcmp.lt.f32.partialorder %v3608_v12, 0.0  ;;  %v672_v50 = vsub.f32 %v3212_v6, %v3506_v17 }
 0x154   : > { %2718 = vrcp.f32 %v3645_v10  ;;  %v898_v57 = vmul.f32 %v2717_v15, %v897_v8  ;;  %v1054_v51 = vand.u32 2147483647, %v3645_v10  ;;  %v1056_v36 = vand.u32 2147483648, %v3645_v10 }
 0x155   : > { %v884_v34 = vadd.f32 %v2715_v60, %v883_v47  ;;  %2720 = vrcp.f32 %v810_v39  ;;  %vm1050_vm10 = vweird.f32 %v3645_v10  ;;  %v1246_v47 = vmul.f32 1.442695, %v1225_v35 }
 0x156   : > { %v899_v29 = vadd.f32 %v2717_v15, %v898_v57  ;;  %v1057_v41 = vor.u32 1.1754944e-38, %v1056_v36  ;;  %vm1055_vm12 = vcmp.eq.f32.partialorder %v1054_v51, 8.507059e+37  ;;  %2722 = vpow2.f32 %v1244_v22 }
 0x157   : > { %v888_v63 = vsel %vm887_vm4, %v2715_v60, %v884_v34  ;;  %2724 = vpow2.f32 %v1246_v47  ;;  %v670_v22 = vsub.f32 %v3191_v58, %v3506_v17  ;;  %v1493_v58 = vld [vmem:[%s4433_s4 + $0x170] sm:$0xff]  ;;  %vm1315_vm3 = vcmp.lt.f32.partialorder %v3636_v3, 0.0 }
 0x158   : > { %v3661_v1 = vsel %vm890_vm5, %v892_v44, %v888_v63  ;;  %v903_v52 = vsel %vm902_vm7, %v2717_v15, %v899_v29  ;;  %v1219_v15 = vmul.f32 %v3640_v16, %v3640_v16  ;;  %v919_v63 = vand.u32 2147483647, %v810_v39 }
 0x159   : > { %v1064_v37 = vmul.f32 1.0614054, %v3661_v1  ;;  %v908_v49 = vsel %vm905_vm8, %v907_v21, %v903_v52  ;;  %v921_v29 = vand.u32 2147483648, %v810_v39  ;;  %vm1306_vm4 = vcmp.lt.f32.partialorder %v3654_v48, 0.0 }
 0x15a   : > { %v2719_v0 = vpop.eup %2718  ;;  %v1402_v5 = vld [vmem:[#allocation2 + $0x10] ss:$2 sm:$0xff]  ;;  %v1410_v13 = vld [vmem:[#allocation2 + $0x11] ss:$2 sm:$0xff]  ;;  %v1065_v38 = vmul.f32 1.0614054, %v908_v49 }
 0x15b   : > { %v1046_v25 = vmul.f32 %v2719_v0, %v3645_v10  ;;  %1514 = vmatmul.f32.gmra.mxu2 %v1402_v5  ;;  %1555 = vmatmul.f32.gmra.mxu3 %v1410_v13  ;;  %v1080_v55 = vadd.f32 -1.4531521, %v1064_v37  ;;  %vm1051_vm9 = vweird.f32 %v2719_v0  ;;  %v2721_v42 = vpop.eup %2720  ;;  %v1235_v34 = vsub.f32 0.0, %v1219_v15 }
 0x15c   : > { %v1081_v20 = vadd.f32 -1.4531521, %v1065_v38  ;;  %vm1052_vm11 = vmor %vm1050_vm10, %vm1051_vm9  ;;  %v911_v11 = vmul.f32 %v2721_v42, %v810_v39  ;;  %vm916_vm13 = vweird.f32 %v2721_v42  ;;  %v2723_v28 = vpop.eup %2722  ;;  %vm920_vm0 = vcmp.eq.f32.partialorder %v919_v63, 8.507059e+37  ;;  %v1492_v63 = vld [vmem:[%s4433_s4 + $0x168] sm:$0xff] }
 0x15d   : > { %v1047_v23 = vsub.f32 1.0, %v1046_v25  ;;  %v1096_v60 = vmul.f32 %v1080_v55, %v3661_v1  ;;  %v1210_v25 = vmul.f32 %v3658_v59, %v3658_v59  ;;  %vm917_vm15 = vmor %vm915_vm14, %vm916_vm13  ;;  %v922_v38 = vor.u32 1.1754944e-38, %v921_v29  ;;  %v2725_v39 = vpop.eup %2724  ;;  %v3723_v29 = vld [vmem:[%s4432_s3] ss:$0 sm:$0xff] }
 0x15e   : > { %v1097_v31 = vmul.f32 %v1081_v20, %v908_v49  ;;  %v912_v44 = vsub.f32 1.0, %v911_v11  ;;  %v745_v59 = vmul.f32 0.5, %v3587_v18 }
 0x15f   : > { %v1048_v45 = vmul.f32 %v2719_v0, %v1047_v23  ;;  %v1112_v40 = vadd.f32 1.4214138, %v1096_v60  ;;  %v1266_v23 = vmul.f32 1.442695, %v1235_v34 }
 0x160   : > { %v1113_v26 = vadd.f32 1.4214138, %v1097_v31  ;;  %v913_v56 = vmul.f32 %v2721_v42, %v912_v44 }
 0x161   : > { %v1049_v30 = vadd.f32 %v2719_v0, %v1048_v45  ;;  %v1128_v32 = vmul.f32 %v1112_v40, %v3661_v1  ;;  %v744_v45 = vmul.f32 0.5, %v3584_v19  ;;  %2726 = vpow2.f32 %v1266_v23  ;;  %v1490_v23 = vld [vmem:[%s4433_s4 + $0x158] sm:$0xff] }
 0x162   : > { %v1129_v10 = vmul.f32 %v1113_v26, %v908_v49  ;;  %v914_v13 = vadd.f32 %v2721_v42, %v913_v56  ;;  %v1491_v56 = vld [vmem:[%s4433_s4 + $0x160] sm:$0xff] }
 0x163   : > { %v1053_v33 = vsel %vm1052_vm11, %v2719_v0, %v1049_v30  ;;  %v1144_v8 = vadd.f32 -0.28449672, %v1128_v32 }
 0x164   : > { %v3677_v7 = vsel %vm1055_vm12, %v1057_v41, %v1053_v33  ;;  %v1145_v2 = vadd.f32 -0.28449672, %v1129_v10  ;;  %v918_v46 = vsel %vm917_vm15, %v2721_v42, %v914_v13  ;;  %v671_v33 = vsub.f32 %v3196_v62, %v3506_v17 }
 0x165   : > { %v1075_v27 = vmul.f32 1.0614054, %v3677_v7  ;;  %v1160_v16 = vmul.f32 %v1144_v8, %v3661_v1  ;;  %v3689_v20 = vsel %vm920_vm0, %v922_v38, %v918_v46  ;;  %v713_v62 = vmul.f32 %v3623_v24, %v670_v22 }
 0x166   : > { %v1161_v21 = vmul.f32 %v1145_v2, %v908_v49  ;;  %v1066_v31 = vmul.f32 1.0614054, %v3689_v20  ;;  %v714_v6 = vmul.f32 %v3623_v24, %v671_v33 }
 0x167   : > { %v1091_v57 = vadd.f32 -1.4531521, %v1075_v27  ;;  %v1176_v53 = vadd.f32 0.2548296, %v1160_v16  ;;  %v1494_v27 = vld [vmem:[%s4433_s4 + $0x178] sm:$0xff]  ;;  %v2727_v2 = vpop.eup %2726  ;;  %v3729_v12 = vadd.f32 %v3723_v29, %v713_v62  ;;  %v674_v62 = vsub.f32 %v3274_v43, %v3506_v17 }
 0x168   : > { %v1177_v37 = vadd.f32 0.2548296, %v1161_v21  ;;  %v1082_v41 = vadd.f32 -1.4531521, %v1066_v31  ;;  %1577 = vmatpush.msrb.mxu2 %v1494_v27  ;;  %v1488_v31 = vld [vmem:[%s4433_s4 + $0x148] sm:$0xff]  ;;  %v673_v27 = vsub.f32 %v3224_v14, %v3506_v17 }
 0x169   : > { %v1107_v0 = vmul.f32 %v1091_v57, %v3677_v7  ;;  %v1192_v5 = vmul.f32 %v1176_v53, %v3661_v1  ;;  %v1226_v1 = vsub.f32 0.0, %v1210_v25  ;;  %v715_v57 = vmul.f32 %v3623_v24, %v672_v50 }
 0x16a   : > { %v1193_v51 = vmul.f32 %v1177_v37, %v908_v49  ;;  %v669_v49 = vsub.f32 %v3194_v61, %v3506_v17  ;;  %v1098_v61 = vmul.f32 %v1082_v41, %v3689_v20  ;;  %1578 = vmatpush.msrb.mxu2 %v1493_v58 }
 0x16b   : > { %v1123_v52 = vadd.f32 1.4214138, %v1107_v0  ;;  %v1272_v36 = vmul.f32 %v2723_v28, %v1192_v5  ;;  %v1248_v15 = vmul.f32 1.442695, %v1226_v1  ;;  %v3742_v37 = vadd.f32 %v3723_v29, %v715_v57 }
 0x16c   : > { %v1273_v35 = vmul.f32 %v2725_v39, %v1193_v51  ;;  %v712_v10 = vmul.f32 %v3623_v24, %v669_v49  ;;  %v1114_v34 = vadd.f32 1.4214138, %v1098_v61  ;;  %1579 = vmatpush.msrb.mxu2 %v1492_v63  ;;  %v3745_v28 = vmul.f32 0.70710677, %v3729_v12 }
 0x16d   : > { %v1139_v55 = vmul.f32 %v1123_v52, %v3677_v7  ;;  %v1288_v30 = vsub.f32 1.0, %v1272_v36  ;;  %v3739_v52 = vadd.f32 %v3723_v29, %v714_v6  ;;  %2728 = vpow2.f32 %v1248_v15  ;;  %v1489_v36 = vld [vmem:[%s4433_s4 + $0x150] sm:$0xff]  ;;  %v1487_v15 = vld [vmem:[%s4433_s4 + $0x140] sm:$0xff] }
 0x16e   : > { %v1289_v40 = vsub.f32 1.0, %v1273_v35  ;;  %v1130_v21 = vmul.f32 %v1114_v34, %v3689_v20  ;;  %1580 = vmatpush.msrb.mxu2 %v1491_v56  ;;  %v781_v46 = vand.u32 2147483647, %v3745_v28  ;;  %v755_v35 = vmul.f32 0.5, %v3631_v54 }
 0x16f   : > { %v1155_v60 = vadd.f32 -0.28449672, %v1139_v55  ;;  %v1320_v18 = vsub.f32 0.0, %v1288_v30  ;;  %v675_v6 = vsub.f32 %v3286_v4, %v3506_v17  ;;  %v716_v34 = vmul.f32 %v3623_v24, %v673_v27 }
 0x170   : > { %v1321_v32 = vsub.f32 0.0, %v1289_v40  ;;  %v1146_v13 = vadd.f32 -0.28449672, %v1130_v21  ;;  %1581 = vmatpush.msrb.mxu2 %v1490_v23  ;;  %v797_v3 = vmul.f32 0.3275911, %v781_v46  ;;  %v3896_v4 = vmul.f32 0.5, %v3729_v12 }
 0x171   : > { %v1171_v19 = vmul.f32 %v1155_v60, %v3677_v7  ;;  %v1336_v42 = vsel %vm1304_vm1, %v1320_v18, %v1288_v30 }
 0x172   : > { %v1352_v47 = vadd.f32 1.0, %v1336_v42  ;;  %v1337_v11 = vsel %vm1305_vm2, %v1321_v32, %v1289_v40  ;;  %v1162_v51 = vmul.f32 %v1146_v13, %v3689_v20  ;;  %1582 = vmatpush.msrb.mxu2 %v1489_v36  ;;  %v3770_v40 = vadd.f32 1.0, %v797_v3 }
 0x173   : > { %v1187_v26 = vadd.f32 0.2548296, %v1171_v19  ;;  %v1353_v16 = vadd.f32 1.0, %v1337_v11  ;;  %v2729_v18 = vpop.eup %2728  ;;  %v746_v32 = vmul.f32 0.5, %v3649_v9  ;;  %v1213_v42 = vmul.f32 %v781_v46, %v781_v46 }
 0x174   : > { %v1368_v44 = vmul.f32 %v1352_v47, %v744_v45  ;;  %v3758_v45 = vmul.f32 0.70710677, %v3739_v52  ;;  %v1178_v60 = vadd.f32 0.2548296, %v1162_v51  ;;  %1583 = vmatpush.msrb.mxu2 %v1488_v31  ;;  %vm960_vm7 = vweird.f32 %v3770_v40 }
 0x175   : > { %v1203_v8 = vmul.f32 %v1187_v26, %v3677_v7  ;;  %v3726_v7 = vadd.f32 %v3723_v29, %v712_v10  ;;  %v1369_v53 = vmul.f32 %v1353_v16, %v745_v59  ;;  %v3761_v59 = vmul.f32 0.70710677, %v3742_v37 }
 0x176   : > { %1388 = vst [vmem:[#allocation2 + $0x21] sm:$0xff] %v1368_v44  ;;  %v1194_v19 = vmul.f32 %v1178_v60, %v3689_v20  ;;  %v782_v54 = vand.u32 2147483647, %v3758_v45  ;;  %1584 = vmatpush.msrb.mxu2 %v1487_v15  ;;  %v964_v23 = vand.u32 2147483647, %v3770_v40  ;;  %v966_v48 = vand.u32 2147483648, %v3770_v40 }
 0x177   : > { %v1283_v0 = vmul.f32 %v2727_v2, %v1203_v8  ;;  %v3736_v25 = vmul.f32 0.70710677, %v3726_v7  ;;  %1389 = vst [vmem:[#allocation2 + $0x29] sm:$0xff] %v1369_v53  ;;  %v783_v22 = vand.u32 2147483647, %v3761_v59  ;;  %v1229_v2 = vsub.f32 0.0, %v1213_v42 }
 0x178   : > { %v1274_v26 = vmul.f32 %v2729_v18, %v1194_v19  ;;  %v798_v58 = vmul.f32 0.3275911, %v782_v54  ;;  %v1214_v56 = vmul.f32 %v782_v54, %v782_v54  ;;  %vm3810_vm10 = vcmp.eq.f32.partialorder %v964_v23, 8.507059e+37 }
 0x179   : > { %v1299_v5 = vsub.f32 1.0, %v1283_v0  ;;  %v780_v38 = vand.u32 2147483647, %v3736_v25  ;;  %v799_v10 = vmul.f32 0.3275911, %v783_v22  ;;  %v1215_v51 = vmul.f32 %v783_v22, %v783_v22 }
 0x17a   : > { %v1290_v61 = vsub.f32 1.0, %v1274_v26  ;;  %v3791_v16 = vadd.f32 1.0, %v798_v58  ;;  %v1230_v3 = vsub.f32 0.0, %v1214_v56  ;;  %v3814_v31 = vmul.f32 1.442695, %v1229_v2 }
 0x17b   : > { %v1331_v55 = vsub.f32 0.0, %v1299_v5  ;;  %v796_v39 = vmul.f32 0.3275911, %v780_v38  ;;  %v1212_v20 = vmul.f32 %v780_v38, %v780_v38  ;;  %v3793_v14 = vadd.f32 1.0, %v799_v10 }
 0x17c   : > { %v1322_v8 = vsub.f32 0.0, %v1290_v61  ;;  %v979_v46 = vand.u32 2147483647, %v3791_v16  ;;  %v717_v19 = vmul.f32 %v3623_v24, %v674_v62  ;;  %v967_v15 = vor.u32 1.1754944e-38, %v966_v48 }
 0x17d   : > { %v1347_v1 = vsel %vm1315_vm3, %v1331_v55, %v1299_v5  ;;  %v3767_v49 = vadd.f32 1.0, %v796_v39  ;;  %v1228_v11 = vsub.f32 0.0, %v1212_v20  ;;  %v981_v39 = vand.u32 2147483648, %v3791_v16 }
 0x17e   : > { %v1363_v30 = vadd.f32 1.0, %v1347_v1  ;;  %v1404_v33 = vld [vmem:[#allocation2 + $0x20] ss:$2 sm:$0xff]  ;;  %v1412_v50 = vld [vmem:[#allocation2 + $0x21] ss:$2 sm:$0xff]  ;;  %v1338_v43 = vsel %vm1306_vm4, %v1322_v8, %v1290_v61  ;;  %v1231_v54 = vsub.f32 0.0, %v1215_v51  ;;  %v3820_v22 = vadd.f32 %v3723_v29, %v716_v34 }
 0x17f   : > { %2730 = vrcp.f32 %v3767_v49  ;;  %1517 = vmatmul.f32.gmra.mxu2 %v1404_v33  ;;  %1558 = vmatmul.f32.gmra.mxu3 %v1412_v50  ;;  %v949_v47 = vand.u32 2147483647, %v3767_v49  ;;  %v951_v9 = vand.u32 2147483648, %v3767_v49  ;;  %vm945_vm5 = vweird.f32 %v3767_v49  ;;  %v1485_v51 = vld [vmem:[%s4433_s4 + $0x130] sm:$0xff] }
 0x180   : > { %v1379_v41 = vmul.f32 %v1363_v30, %v755_v35  ;;  %2732 = vrcp.f32 %v3770_v40  ;;  %v1354_v21 = vadd.f32 1.0, %v1338_v43  ;;  %v1252_v60 = vmul.f32 1.442695, %v1228_v11 }
 0x181   : > { %vm3798_vm6 = vcmp.eq.f32.partialorder %v949_v47, 8.507059e+37  ;;  %2734 = vrcp.f32 %v3791_v16  ;;  %v952_v13 = vor.u32 1.1754944e-38, %v951_v9  ;;  %vm3825_vm13 = vcmp.eq.f32.partialorder %v979_v46, 8.507059e+37 }
 0x182   : > { %1399 = vst [vmem:[#allocation2 + $0x81] sm:$0xff] %v1379_v41  ;;  %v1370_v38 = vmul.f32 %v1354_v21, %v746_v32  ;;  %2736 = vrcp.f32 %v3793_v14  ;;  %v982_v20 = vor.u32 1.1754944e-38, %v981_v39  ;;  %v3834_v47 = vmul.f32 1.442695, %v1230_v3 }
 0x183   : > { %2738 = vpow2.f32 %v1252_v60  ;;  %v1258_v9 = vmul.f32 1.442695, %v1231_v54  ;;  %v3847_v11 = vmul.f32 0.70710677, %v3820_v22  ;;  %vm975_vm14 = vweird.f32 %v3791_v16 }
 0x184   : > { %1390 = vst [vmem:[#allocation2 + $0x31] sm:$0xff] %v1370_v38  ;;  %v996_v0 = vand.u32 2147483648, %v3793_v14  ;;  %vm990_vm3 = vweird.f32 %v3793_v14 }
 0x185   : > { %v2731_v57 = vpop.eup %2730 }
 0x186   : > { %v2733_v44 = vpop.eup %2732  ;;  %v941_v63 = vmul.f32 %v2731_v57, %v3767_v49  ;;  %vm946_vm8 = vweird.f32 %v2731_v57  ;;  %v994_v49 = vand.u32 2147483647, %v3793_v14 }
 0x187   : > { %v956_v53 = vmul.f32 %v2733_v44, %v3770_v40  ;;  %vm961_vm9 = vweird.f32 %v2733_v44  ;;  %v2735_v18 = vpop.eup %2734  ;;  %vm947_vm11 = vmor %vm945_vm5, %vm946_vm8  ;;  %v3837_v40 = vadd.f32 %v3723_v29, %v717_v19  ;;  %v997_v19 = vor.u32 1.1754944e-38, %v996_v0 }
 0x188   : > { %v942_v5 = vsub.f32 1.0, %v941_v63  ;;  %vm962_vm12 = vmor %vm960_vm7, %vm961_vm9  ;;  %v971_v50 = vmul.f32 %v2735_v18, %v3791_v16  ;;  %v2737_v32 = vpop.eup %2736  ;;  %vm976_vm15 = vweird.f32 %v2735_v18  ;;  %vm3855_vm0 = vcmp.eq.f32.partialorder %v994_v49, 8.507059e+37 }
 0x189   : > { %v957_v55 = vsub.f32 1.0, %v956_v53  ;;  %v986_v62 = vmul.f32 %v2737_v32, %v3793_v14  ;;  %v3852_v21 = vmul.f32 0.70710677, %v3837_v40  ;;  %vm977_vm1 = vmor %vm975_vm14, %vm976_vm15  ;;  %vm991_vm2 = vweird.f32 %v2737_v32  ;;  %v2739_v39 = vpop.eup %2738 }
 0x18a   : > { %v943_v36 = vmul.f32 %v2731_v57, %v942_v5  ;;  %v972_v10 = vsub.f32 1.0, %v971_v50  ;;  %vm992_vm4 = vmor %vm990_vm3, %vm991_vm2  ;;  %v3891_v49 = vmul.f32 0.5, %v3726_v7  ;;  %vm1308_vm5 = vcmp.lt.f32.partialorder %v3736_v25, 0.0 }
 0x18b   : > { %v958_v1 = vmul.f32 %v2733_v44, %v957_v55  ;;  %v1406_v34 = vld [vmem:[#allocation2 + $0x30] ss:$2 sm:$0xff]  ;;  %v987_v63 = vsub.f32 1.0, %v986_v62  ;;  %v785_v48 = vand.u32 2147483647, %v3852_v21  ;;  %vm1310_vm15 = vcmp.lt.f32.partialorder %v3758_v45, 0.0 }
 0x18c   : > { %v944_v35 = vadd.f32 %v2731_v57, %v943_v36  ;;  %1520 = vmatmul.f32.gmra.mxu2 %v1406_v34  ;;  %v1486_v55 = vld [vmem:[%s4433_s4 + $0x138] sm:$0xff]  ;;  %v751_v45 = vmul.f32 0.5, %v3742_v37  ;;  %v1481_v37 = vld [vmem:[%s4433_s4 + $0x110] sm:$0xff] }
 0x18d   : > { %v959_v41 = vadd.f32 %v2733_v44, %v958_v1  ;;  %v988_v23 = vmul.f32 %v2737_v32, %v987_v63  ;;  %1585 = vmatpush.msrb.mxu2 %v1486_v55 }
 0x18e   : > { %v948_v33 = vsel %vm947_vm11, %v2731_v57, %v944_v35  ;;  %v1414_v57 = vld [vmem:[#allocation2 + $0x31] ss:$2 sm:$0xff]  ;;  %v801_v35 = vmul.f32 0.3275911, %v785_v48 }
 0x18f   : > { %v3832_v42 = vsel %vm3798_vm6, %v952_v13, %v948_v33  ;;  %v963_v61 = vsel %vm962_vm12, %v2733_v44, %v959_v41  ;;  %v973_v44 = vmul.f32 %v2735_v18, %v972_v10  ;;  %1561 = vmatmul.f32.gmra.mxu3 %v1414_v57  ;;  %v784_v13 = vand.u32 2147483647, %v3847_v11  ;;  %1586 = vmatpush.msrb.mxu2 %v1485_v51 }
 0x190   : > { %v3841_v27 = vsel %vm3810_vm10, %v967_v15, %v963_v61  ;;  %v1068_v58 = vmul.f32 1.0614054, %v3832_v42  ;;  %v989_v3 = vadd.f32 %v2737_v32, %v988_v23  ;;  %v3879_v54 = vadd.f32 1.0, %v801_v35 }
 0x191   : > { %v1069_v8 = vmul.f32 1.0614054, %v3841_v27  ;;  %v974_v56 = vadd.f32 %v2735_v18, %v973_v44  ;;  %v800_v46 = vmul.f32 0.3275911, %v784_v13  ;;  %v718_v33 = vmul.f32 %v3623_v24, %v675_v6 }
 0x192   : > { %v1084_v2 = vadd.f32 -1.4531521, %v1068_v58  ;;  %v993_v15 = vsel %vm992_vm4, %v2737_v32, %v989_v3  ;;  %v3909_v34 = vmul.f32 %v784_v13, %v784_v13  ;;  %v3911_v57 = vmul.f32 %v785_v48, %v785_v48 }
 0x193   : > { %v1085_v43 = vadd.f32 -1.4531521, %v1069_v8  ;;  %v978_v36 = vsel %vm977_vm1, %v2735_v18, %v974_v56  ;;  %v3876_v18 = vadd.f32 1.0, %v800_v46  ;;  %v3887_v26 = vsel %vm3855_vm0, %v997_v19, %v993_v15 }
 0x194   : > { %v1100_v53 = vmul.f32 %v1084_v2, %v3832_v42  ;;  %v3871_v60 = vsel %vm3825_vm13, %v982_v20, %v978_v36  ;;  %v1071_v32 = vmul.f32 1.0614054, %v3887_v26  ;;  %v3905_v62 = vadd.f32 %v3723_v29, %v718_v33  ;;  %v1484_v29 = vld [vmem:[%s4433_s4 + $0x128] sm:$0xff] }
 0x195   : > { %v1101_v16 = vmul.f32 %v1085_v43, %v3841_v27  ;;  %v1070_v41 = vmul.f32 1.0614054, %v3871_v60  ;;  %2740 = vrcp.f32 %v3876_v18  ;;  %v1009_v7 = vand.u32 2147483647, %v3876_v18  ;;  %1587 = vmatpush.msrb.mxu2 %v1484_v29 }
 0x196   : > { %v1116_v38 = vadd.f32 1.4214138, %v1100_v53  ;;  %2742 = vpow2.f32 %v3814_v31  ;;  %v1087_v58 = vadd.f32 -1.4531521, %v1071_v32  ;;  %vm1309_vm6 = vcmp.lt.f32.partialorder %v3745_v28, 0.0 }
 0x197   : > { %v1117_v1 = vadd.f32 1.4214138, %v1101_v16  ;;  %v1086_v20 = vadd.f32 -1.4531521, %v1070_v41  ;;  %2744 = vrcp.f32 %v3879_v54  ;;  %vm1005_vm7 = vweird.f32 %v3876_v18 }
 0x198   : > { %v1132_v30 = vmul.f32 %v1116_v38, %v3832_v42  ;;  %2746 = vpow2.f32 %v3834_v47  ;;  %v1103_v8 = vmul.f32 %v1087_v58, %v3887_v26  ;;  %v1011_v43 = vand.u32 2147483648, %v3876_v18 }
 0x199   : > { %v1133_v14 = vmul.f32 %v1117_v1, %v3841_v27  ;;  %v1102_v24 = vmul.f32 %v1086_v20, %v3871_v60  ;;  %2748 = vpow2.f32 %v1258_v9  ;;  %v1483_v9 = vld [vmem:[%s4433_s4 + $0x120] sm:$0xff]  ;;  %vm3926_vm8 = vcmp.eq.f32.partialorder %v1009_v7, 8.507059e+37 }
 0x19a   : > { %v1148_v50 = vadd.f32 -0.28449672, %v1132_v30  ;;  %vm1020_vm9 = vweird.f32 %v3879_v54  ;;  %v1026_v23 = vand.u32 2147483648, %v3879_v54  ;;  %1588 = vmatpush.msrb.mxu2 %v1483_v9  ;;  %v1012_v3 = vor.u32 1.1754944e-38, %v1011_v43 }
 0x19b   : > { %v1149_v61 = vadd.f32 -0.28449672, %v1133_v14  ;;  %v1118_v31 = vadd.f32 1.4214138, %v1102_v24  ;;  %v2741_v2 = vpop.eup %2740  ;;  %v1024_v15 = vand.u32 2147483647, %v3879_v54 }
 0x19c   : > { %v1164_v17 = vmul.f32 %v1148_v50, %v3832_v42  ;;  %v2743_v63 = vpop.eup %2742  ;;  %v1001_v53 = vmul.f32 %v2741_v2, %v3876_v18  ;;  %vm1006_vm10 = vweird.f32 %v2741_v2  ;;  %v1027_v33 = vor.u32 1.1754944e-38, %v1026_v23 }
 0x19d   : > { %v1165_v6 = vmul.f32 %v1149_v61, %v3841_v27  ;;  %v1134_v44 = vmul.f32 %v1118_v31, %v3871_v60  ;;  %v2745_v5 = vpop.eup %2744  ;;  %vm1007_vm11 = vmor %vm1005_vm7, %vm1006_vm10  ;;  %vm1025_vm14 = vcmp.eq.f32.partialorder %v1024_v15, 8.507059e+37  ;;  %v1232_v56 = vsub.f32 0.0, %v3909_v34 }
 0x19e   : > { %v1180_v10 = vadd.f32 0.2548296, %v1164_v17  ;;  %v2747_v48 = vpop.eup %2746  ;;  %v1016_v51 = vmul.f32 %v2745_v5, %v3879_v54  ;;  %vm1021_vm12 = vweird.f32 %v2745_v5  ;;  %v1233_v23 = vsub.f32 0.0, %v3911_v57 }
 0x19f   : > { %v1181_v12 = vadd.f32 0.2548296, %v1165_v6  ;;  %v1150_v16 = vadd.f32 -0.28449672, %v1134_v44  ;;  %v2749_v36 = vpop.eup %2748  ;;  %v3944_v6 = vmul.f32 0.70710677, %v3905_v62  ;;  %vm1022_vm13 = vmor %vm1020_vm9, %vm1021_vm12 }
 0x1a0   : > { %v1196_v47 = vmul.f32 %v1180_v10, %v3832_v42  ;;  %v1119_v42 = vadd.f32 1.4214138, %v1103_v8  ;;  %v1017_v19 = vsub.f32 1.0, %v1016_v51  ;;  %vm1311_vm0 = vcmp.lt.f32.partialorder %v3761_v59, 0.0 }
 0x1a1   : > { %v1197_v0 = vmul.f32 %v1181_v12, %v3841_v27  ;;  %v1002_v27 = vsub.f32 1.0, %v1001_v53  ;;  %v1166_v1 = vmul.f32 %v1150_v16, %v3871_v60  ;;  %v3958_v44 = vand.u32 2147483647, %v3944_v6 }
 0x1a2   : > { %v1276_v13 = vmul.f32 %v2739_v39, %v1196_v47  ;;  %v1135_v55 = vmul.f32 %v1119_v42, %v3887_v26  ;;  %v1018_v32 = vmul.f32 %v2745_v5, %v1017_v19  ;;  %vm1314_vm7 = vcmp.lt.f32.partialorder %v3944_v6, 0.0 }
 0x1a3   : > { %v1277_v38 = vmul.f32 %v2743_v63, %v1197_v0  ;;  %v1003_v30 = vmul.f32 %v2741_v2, %v1002_v27  ;;  %v1182_v14 = vadd.f32 0.2548296, %v1166_v1 }
 0x1a4   : > { %v1292_v46 = vsub.f32 1.0, %v1276_v13  ;;  %v1151_v35 = vadd.f32 -0.28449672, %v1135_v55 }
 0x1a5   : > { %v1293_v39 = vsub.f32 1.0, %v1277_v38  ;;  %v1004_v61 = vadd.f32 %v2741_v2, %v1003_v30  ;;  %v1198_v24 = vmul.f32 %v1182_v14, %v3871_v60  ;;  %v1019_v60 = vadd.f32 %v2745_v5, %v1018_v32 }
 0x1a6   : > { %v1324_v41 = vsub.f32 0.0, %v1292_v46  ;;  %v1167_v20 = vmul.f32 %v1151_v35, %v3887_v26 }
 0x1a7   : > { %v1325_v50 = vsub.f32 0.0, %v1293_v39  ;;  %v1008_v31 = vsel %vm1007_vm11, %v2741_v2, %v1004_v61  ;;  %v1278_v8 = vmul.f32 %v2747_v48, %v1198_v24  ;;  %v1023_v9 = vsel %vm1022_vm13, %v2745_v5, %v1019_v60 }
 0x1a8   : > { %v1340_v17 = vsel %vm1308_vm5, %v1324_v41, %v1292_v46  ;;  %v1183_v10 = vadd.f32 0.2548296, %v1167_v20  ;;  %v3950_v25 = vsel %vm3926_vm8, %v1012_v3, %v1008_v31  ;;  %v1028_v63 = vsel %vm1025_vm14, %v1027_v33, %v1023_v9 }
 0x1a9   : > { %v1341_v58 = vsel %vm1309_vm6, %v1325_v50, %v1293_v39  ;;  %v1356_v7 = vadd.f32 1.0, %v1340_v17  ;;  %v1072_v28 = vmul.f32 1.0614054, %v3950_v25  ;;  %v1294_v29 = vsub.f32 1.0, %v1278_v8 }
 0x1aa   : > { %v1357_v12 = vadd.f32 1.0, %v1341_v58  ;;  %v1199_v47 = vmul.f32 %v1183_v10, %v3887_v26  ;;  %v1073_v26 = vmul.f32 1.0614054, %v1028_v63  ;;  %v750_v5 = vmul.f32 0.5, %v3739_v52  ;;  %v1482_v52 = vld [vmem:[%s4433_s4 + $0x118] sm:$0xff] }
 0x1ab   : > { %v1372_v18 = vmul.f32 %v1356_v7, %v3891_v49  ;;  %v1088_v0 = vadd.f32 -1.4531521, %v1072_v28  ;;  %v802_v49 = vmul.f32 0.3275911, %v3958_v44  ;;  %v1326_v54 = vsub.f32 0.0, %v1294_v29  ;;  %1589 = vmatpush.msrb.mxu2 %v1482_v52 }
 0x1ac   : > { %v1373_v2 = vmul.f32 %v1357_v12, %v3896_v4  ;;  %v1279_v43 = vmul.f32 %v2749_v36, %v1199_v47  ;;  %v1089_v16 = vadd.f32 -1.4531521, %v1073_v26  ;;  %v1260_v46 = vmul.f32 1.442695, %v1232_v56 }
 0x1ad   : > { %1392 = vst [vmem:[#allocation2 + $0x49] sm:$0xff] %v1372_v18  ;;  %v1104_v53 = vmul.f32 %v1088_v0, %v3950_v25  ;;  %v3965_v4 = vadd.f32 1.0, %v802_v49  ;;  %v1342_v13 = vsel %vm1310_vm15, %v1326_v54, %v1294_v29  ;;  %v1262_v3 = vmul.f32 1.442695, %v1233_v23  ;;  %1590 = vmatpush.msrb.mxu2 %v1481_v37 }
 0x1ae   : > { %1393 = vst [vmem:[#allocation2 + $0x51] sm:$0xff] %v1373_v2  ;;  %v1295_v42 = vsub.f32 1.0, %v1279_v43  ;;  %v1358_v38 = vadd.f32 1.0, %v1342_v13  ;;  %v1105_v27 = vmul.f32 %v1089_v16, %v1028_v63  ;;  %v1218_v43 = vmul.f32 %v3958_v44, %v3958_v44 }
 0x1af   : > { %v1120_v55 = vadd.f32 1.4214138, %v1104_v53  ;;  %2750 = vrcp.f32 %v3965_v4  ;;  %v1039_v32 = vand.u32 2147483647, %v3965_v4  ;;  %v1041_v17 = vand.u32 2147483648, %v3965_v4 }
 0x1b0   : > { %v1327_v48 = vsub.f32 0.0, %v1295_v42  ;;  %v1374_v34 = vmul.f32 %v1358_v38, %v750_v5  ;;  %v1121_v1 = vadd.f32 1.4214138, %v1105_v27  ;;  %2752 = vpow2.f32 %v1260_v46 }
 0x1b1   : > { %v1136_v36 = vmul.f32 %v1120_v55, %v3950_v25  ;;  %2754 = vpow2.f32 %v1262_v3  ;;  %vm1035_vm2 = vweird.f32 %v3965_v4  ;;  %v1042_v28 = vor.u32 1.1754944e-38, %v1041_v17 }
 0x1b2   : > { %v1343_v51 = vsel %vm1311_vm0, %v1327_v48, %v1295_v42  ;;  %1394 = vst [vmem:[#allocation2 + $0x59] sm:$0xff] %v1374_v34  ;;  %v1137_v30 = vmul.f32 %v1121_v1, %v1028_v63  ;;  %vm1040_vm4 = vcmp.eq.f32.partialorder %v1039_v32, 8.507059e+37  ;;  %vm1312_vm5 = vcmp.lt.f32.partialorder %v3847_v11, 0.0  ;;  %v1480_v48 = vld [vmem:[%s4433_s4 + $0x108] sm:$0xff]  ;;  %v1479_v11 = vld [vmem:[%s4433_s4 + $0x100] sm:$0xff] }
 0x1b3   : > { %v1359_v57 = vadd.f32 1.0, %v1343_v51  ;;  %v1152_v19 = vadd.f32 -0.28449672, %v1136_v36  ;;  %v752_v53 = vmul.f32 0.5, %v3820_v22  ;;  %vm1313_vm6 = vcmp.lt.f32.partialorder %v3852_v21, 0.0  ;;  %1591 = vmatpush.msrb.mxu2 %v1480_v48 }
 0x1b4   : > { %v1153_v14 = vadd.f32 -0.28449672, %v1137_v30  ;;  %v753_v16 = vmul.f32 0.5, %v3837_v40  ;;  %v754_v37 = vmul.f32 0.5, %v3905_v62 }
 0x1b5   : > { %v1424_v39 = vld [vmem:[#allocation2 + $0x48] ss:$2 sm:$0xff]  ;;  %v1432_v59 = vld [vmem:[#allocation2 + $0x49] ss:$2 sm:$0xff]  ;;  %v1375_v35 = vmul.f32 %v1359_v57, %v751_v45  ;;  %v2751_v41 = vpop.eup %2750  ;;  %v1168_v15 = vmul.f32 %v1152_v19, %v3950_v25  ;;  %1592 = vmatpush.msrb.mxu2 %v1479_v11 }
 0x1b6   : > { %1523 = vmatmul.f32.gmra.mxu2 %v1424_v39  ;;  %1564 = vmatmul.f32.gmra.mxu3 %v1432_v59  ;;  %v1031_v33 = vmul.f32 %v2751_v41, %v3965_v4  ;;  %v1169_v50 = vmul.f32 %v1153_v14, %v1028_v63  ;;  %vm1036_vm1 = vweird.f32 %v2751_v41  ;;  %v2753_v10 = vpop.eup %2752  ;;  %v1234_v4 = vsub.f32 0.0, %v1218_v43  ;;  %v1416_v19 = vld [vmem:[#allocation2 + $0x2] ss:$2 sm:$0xff] }
 0x1b7   : > { %1395 = vst [vmem:[#allocation2 + $0x61] sm:$0xff] %v1375_v35  ;;  %v1184_v20 = vadd.f32 0.2548296, %v1168_v15  ;;  %v2755_v60 = vpop.eup %2754  ;;  %vm1037_vm3 = vmor %vm1035_vm2, %vm1036_vm1  ;;  %v1420_v14 = vld [vmem:[#allocation2 + $0x22] ss:$2 sm:$0xff] }
 0x1b8   : > { %v1032_v61 = vsub.f32 1.0, %v1031_v33  ;;  %v1185_v24 = vadd.f32 0.2548296, %v1169_v50  ;;  %v1264_v21 = vmul.f32 1.442695, %v1234_v4 }
 0x1b9   : > { %v1200_v58 = vmul.f32 %v1184_v20, %v3950_v25  ;;  %v1422_v15 = vld [vmem:[#allocation2 + $0x32] ss:$2 sm:$0xff] }
 0x1ba   : > { %v1033_v7 = vmul.f32 %v2751_v41, %v1032_v61  ;;  %v1201_v31 = vmul.f32 %v1185_v24, %v1028_v63  ;;  %2756 = vpow2.f32 %v1264_v21  ;;  %v1440_v33 = vld [vmem:[#allocation2 + $0x4a] ss:$2 sm:$0xff] }
 0x1bb   : > { %v1280_v12 = vmul.f32 %v2753_v10, %v1200_v58 }
 0x1bc   : > { %v1034_v8 = vadd.f32 %v2751_v41, %v1033_v7  ;;  %v1281_v2 = vmul.f32 %v2755_v60, %v1201_v31 }
 0x1bd   : > { %v1296_v29 = vsub.f32 1.0, %v1280_v12 }
 0x1be   : > { %v1426_v18 = vld [vmem:[#allocation2 + $0x58] ss:$2 sm:$0xff]  ;;  %v1434_v47 = vld [vmem:[#allocation2 + $0x59] ss:$2 sm:$0xff]  ;;  %v1038_v9 = vsel %vm1037_vm3, %v2751_v41, %v1034_v8  ;;  %v1297_v63 = vsub.f32 1.0, %v1281_v2 }
 0x1bf   : > { %1526 = vmatmul.f32.gmra.mxu2 %v1426_v18  ;;  %1567 = vmatmul.f32.gmra.mxu3 %v1434_v47  ;;  %v1043_v25 = vsel %vm1040_vm4, %v1042_v28, %v1038_v9  ;;  %v1328_v0 = vsub.f32 0.0, %v1296_v29  ;;  %v1418_v41 = vld [vmem:[#allocation2 + $0x12] ss:$2 sm:$0xff] }
 0x1c0   : > { %v1074_v49 = vmul.f32 1.0614054, %v1043_v25  ;;  %v1329_v54 = vsub.f32 0.0, %v1297_v63  ;;  %v2757_v46 = vpop.eup %2756  ;;  %v1442_v6 = vld [vmem:[#allocation2 + $0x5a] ss:$2 sm:$0xff] }
 0x1c1   : > { %v1344_v26 = vsel %vm1312_vm5, %v1328_v0, %v1296_v29 }
 0x1c2   : > { %v1090_v42 = vadd.f32 -1.4531521, %v1074_v49  ;;  %v1360_v56 = vadd.f32 1.0, %v1344_v26  ;;  %v1345_v5 = vsel %vm1313_vm6, %v1329_v54, %v1297_v63 }
 0x1c3   : > { %v1361_v23 = vadd.f32 1.0, %v1345_v5 }
 0x1c4   : > { %v1106_v13 = vmul.f32 %v1090_v42, %v1043_v25  ;;  %v1376_v44 = vmul.f32 %v1360_v56, %v752_v53 }
 0x1c5   : > { %v1377_v22 = vmul.f32 %v1361_v23, %v753_v16 }
 0x1c6   : > { %v1122_v38 = vadd.f32 1.4214138, %v1106_v13  ;;  %1396 = vst [vmem:[#allocation2 + $0x69] sm:$0xff] %v1376_v44 }
 0x1c7   : > { %1397 = vst [vmem:[#allocation2 + $0x71] sm:$0xff] %v1377_v22 }
 0x1c8   : > { %v1138_v55 = vmul.f32 %v1122_v38, %v1043_v25 }
 0x1ca   : > { %v1154_v45 = vadd.f32 -0.28449672, %v1138_v55 }
 0x1cc   : > { %v1170_v40 = vmul.f32 %v1154_v45, %v1043_v25 }
 0x1ce   : > { %v1186_v27 = vadd.f32 0.2548296, %v1170_v40  ;;  %v1428_v51 = vld [vmem:[#allocation2 + $0x68] ss:$2 sm:$0xff]  ;;  %v1436_v34 = vld [vmem:[#allocation2 + $0x69] ss:$2 sm:$0xff] }
 0x1cf   : > { %1529 = vmatmul.f32.gmra.mxu2 %v1428_v51  ;;  %1570 = vmatmul.f32.gmra.mxu3 %v1436_v34  ;;  %v1444_v62 = vld [vmem:[#allocation2 + $0x6a] ss:$2 sm:$0xff] }
 0x1d0   : > { %v1202_v36 = vmul.f32 %v1186_v27, %v1043_v25 }
 0x1d1   : > { %v1512_v50 = vpop.f32.mrf.mxu2  ;;  %v1553_v58 = vpop.f32.mrf.mxu3 }
 0x1d2   : > { %v1282_v52 = vmul.f32 %v2757_v46, %v1202_v36  ;;  %v1554_v60 = vadd.f32 %v1553_v58, %v1512_v50 }
 0x1d4   : > { %v1298_v57 = vsub.f32 1.0, %v1282_v52 }
 0x1d6   : > { %v1330_v1 = vsub.f32 0.0, %v1298_v57 }
 0x1d8   : > { %v1346_v3 = vsel %vm1314_vm7, %v1330_v1, %v1298_v57 }
 0x1d9   : > { %v1362_v39 = vadd.f32 1.0, %v1346_v3 }
 0x1db   : > { %v1378_v59 = vmul.f32 %v1362_v39, %v754_v37 }
 0x1dd   : > { %1398 = vst [vmem:[#allocation2 + $0x79] sm:$0xff] %v1378_v59 }
 0x1de   : > { %v1515_v61 = vpop.f32.mrf.mxu2  ;;  %v1556_v10 = vpop.f32.mrf.mxu3 }
 0x1df   : > { %v1557_v9 = vadd.f32 %v1556_v10, %v1515_v61 }
 0x1e4   : > { %v1430_v35 = vld [vmem:[#allocation2 + $0x78] ss:$2 sm:$0xff]  ;;  %v1438_v30 = vld [vmem:[#allocation2 + $0x79] ss:$2 sm:$0xff] }
 0x1e5   : > { %1532 = vmatmul.f32.gmra.mxu2 %v1430_v35  ;;  %1573 = vmatmul.f32.gmra.mxu3 %v1438_v30  ;;  %v1446_v20 = vld [vmem:[#allocation2 + $0x7a] ss:$2 sm:$0xff] }
 0x1ed   : > { %1593 = vmatmul.f32.vlgmr.msrb.gmra.mxu2 %v1416_v19 }
 0x1f5   : > { %1596 = vmatmul.f32.gmra.mxu2 %v1418_v41 }
 0x1fd   : > { %1599 = vmatmul.f32.gmra.mxu2 %v1420_v14 }
 0x202   : > { %v1518_v32 = vpop.f32.mrf.mxu2  ;;  %v1559_v12 = vpop.f32.mrf.mxu3 }
 0x203   : > { %v1560_v42 = vadd.f32 %v1559_v12, %v1518_v32 }
 0x205   : > { %1602 = vmatmul.f32.gmra.mxu2 %v1422_v15 }
 0x20d   : > { %1605 = vmatmul.f32.gmra.mxu2 %v1440_v33 }
 0x20f   : > { %v1521_v17 = vpop.f32.mrf.mxu2 }
 0x212   : > { %v1562_v18 = vpop.f32.mrf.mxu3 }
 0x213   : > { %v1563_v55 = vadd.f32 %v1562_v18, %v1521_v17 }
 0x215   : > { %1608 = vmatmul.f32.gmra.mxu2 %v1442_v6 }
 0x21d   : > { %1611 = vmatmul.f32.gmra.mxu2 %v1444_v62 }
 0x225   : > { %1614 = vmatmul.f32.gmra.mxu2 %v1446_v20 }
 0x239   : > { %v1524_v24 = vpop.f32.mrf.mxu2  ;;  %v1565_v43 = vpop.f32.mrf.mxu3 }
 0x23a   : > { %v1566_v59 = vadd.f32 %v1565_v43, %v1524_v24  ;;  %v1988_v43 = vld [vmem:[#allocation5 + $0x78] sm:$0xff] }
 0x23b   : > { %2021 = vmatpush.msrb.mxu3 %v1988_v43 }
 0x242   : > { %v3999_v7 = vpop.f32.mrf.mxu2  ;;  %v1568_v13 = vpop.f32.mrf.mxu3 }
 0x243   : > { %v4038_v50 = vadd.f32 %v1568_v13, %v3999_v7  ;;  %v2019_v13 = vld [vmem:[#allocation5 + $0x170] sm:$0xff] }
 0x252   : > { %v4001_v31 = vpop.f32.mrf.mxu2  ;;  %v1571_v37 = vpop.f32.mrf.mxu3 }
 0x268   : > { %v4003_v8 = vpop.f32.mrf.mxu2 }
 0x270   : > { %v1594_v47 = vpop.f32.mrf.mxu2 }
 0x271   : > { %v4005_v28 = vadd.f32 %v1594_v47, %v1554_v60  ;;  %v2020_v47 = vld [vmem:[#allocation5 + $0x178] sm:$0xff] }
 0x272   : > { %2079 = vmatpush.msrb.mxu0 %v2020_v47 }
 0x273   : > { %v4008_v2 = vmul.f32 0.70710677, %v4005_v28 }
 0x274   : > { %2080 = vmatpush.msrb.mxu0 %v2019_v13 }
 0x275   : > { %v1634_v29 = vand.u32 2147483647, %v4008_v2  ;;  %vm1898_vm4 = vcmp.lt.f32.partialorder %v4008_v2, 0.0 }
 0x277   : > { %v1642_v25 = vmul.f32 0.3275911, %v1634_v29  ;;  %v1850_v57 = vmul.f32 %v1634_v29, %v1634_v29 }
 0x278   : > { %v1597_v63 = vpop.f32.mrf.mxu2 }
 0x279   : > { %v1650_v0 = vadd.f32 1.0, %v1642_v25  ;;  %v4011_v49 = vadd.f32 %v1597_v63, %v1557_v9  ;;  %v1858_v41 = vsub.f32 0.0, %v1850_v57 }
 0x27b   : > { %2758 = vrcp.f32 %v1650_v0  ;;  %v4014_v54 = vmul.f32 0.70710677, %v4011_v49  ;;  %v1669_v11 = vand.u32 2147483648, %v1650_v0  ;;  %v1667_v21 = vand.u32 2147483647, %v1650_v0 }
 0x27c   : > { %vm1663_vm9 = vweird.f32 %v1650_v0  ;;  %v1866_v60 = vmul.f32 1.442695, %v1858_v41 }
 0x27d   : > { %v1635_v26 = vand.u32 2147483647, %v4014_v54  ;;  %v1670_v51 = vor.u32 1.1754944e-38, %v1669_v11  ;;  %vm1668_vm11 = vcmp.eq.f32.partialorder %v1667_v21, 8.507059e+37 }
 0x27f   : > { %v1643_v53 = vmul.f32 0.3275911, %v1635_v26  ;;  %v1851_v15 = vmul.f32 %v1635_v26, %v1635_v26 }
 0x280   : > { %v1600_v56 = vpop.f32.mrf.mxu2 }
 0x281   : > { %v2759_v4 = vpop.eup %2758  ;;  %v4017_v5 = vadd.f32 %v1600_v56, %v1560_v42  ;;  %v1651_v23 = vadd.f32 1.0, %v1643_v53  ;;  %v1859_v9 = vsub.f32 0.0, %v1851_v15 }
 0x282   : > { %v1659_v16 = vmul.f32 %v2759_v4, %v1650_v0  ;;  %vm1664_vm8 = vweird.f32 %v2759_v4 }
 0x283   : > { %v4020_v44 = vmul.f32 0.70710677, %v4017_v5  ;;  %2760 = vrcp.f32 %v1651_v23  ;;  %vm1665_vm10 = vmor %vm1663_vm9, %vm1664_vm8  ;;  %v1684_v14 = vand.u32 2147483648, %v1651_v23  ;;  %v1682_v6 = vand.u32 2147483647, %v1651_v23 }
 0x284   : > { %v1660_v48 = vsub.f32 1.0, %v1659_v16  ;;  %vm1678_vm13 = vweird.f32 %v1651_v23  ;;  %v1987_v16 = vld [vmem:[#allocation5 + $0x70] sm:$0xff] }
 0x285   : > { %v1636_v38 = vand.u32 2147483647, %v4020_v44  ;;  %v1685_v18 = vor.u32 1.1754944e-38, %v1684_v14  ;;  %vm1683_vm15 = vcmp.eq.f32.partialorder %v1682_v6, 8.507059e+37  ;;  %2022 = vmatpush.msrb.mxu3 %v1987_v16  ;;  %v2016_v6 = vld [vmem:[#allocation5 + $0x158] sm:$0xff] }
 0x286   : > { %v1661_v22 = vmul.f32 %v2759_v4, %v1660_v48 }
 0x287   : > { %v1644_v45 = vmul.f32 0.3275911, %v1636_v38  ;;  %v1852_v24 = vmul.f32 %v1636_v38, %v1636_v38 }
 0x288   : > { %v1662_v40 = vadd.f32 %v2759_v4, %v1661_v22  ;;  %v1603_v27 = vpop.f32.mrf.mxu2  ;;  %v4063_v22 = vadd.f32 %v1571_v37, %v4001_v31 }
 0x289   : > { %v4023_v34 = vadd.f32 1.0, %v1644_v45  ;;  %v4025_v36 = vadd.f32 %v1603_v27, %v1563_v55  ;;  %v2761_v46 = vpop.eup %2760  ;;  %v2018_v55 = vld [vmem:[#allocation5 + $0x168] sm:$0xff]  ;;  %v1868_v27 = vmul.f32 1.442695, %v1859_v9 }
 0x28a   : > { %v1666_v52 = vsel %vm1665_vm10, %v2759_v4, %v1662_v40  ;;  %v1674_v3 = vmul.f32 %v2761_v46, %v1651_v23  ;;  %vm1679_vm12 = vweird.f32 %v2761_v46  ;;  %v1860_v4 = vsub.f32 0.0, %v1852_v24  ;;  %v1574_v23 = vpop.f32.mrf.mxu3  ;;  %2081 = vmatpush.msrb.mxu0 %v2018_v55 }
 0x28b   : > { %v4027_v1 = vsel %vm1668_vm11, %v1670_v51, %v1666_v52  ;;  %2762 = vrcp.f32 %v4023_v34  ;;  %v4032_v30 = vmul.f32 0.70710677, %v4025_v36  ;;  %vm1680_vm14 = vmor %vm1678_vm13, %vm1679_vm12  ;;  %v1699_v56 = vand.u32 2147483648, %v4023_v34  ;;  %v1986_v52 = vld [vmem:[#allocation5 + $0x68] sm:$0xff] }
 0x28c   : > { %v1778_v39 = vmul.f32 1.0614054, %v4027_v1  ;;  %v1675_v35 = vsub.f32 1.0, %v1674_v3  ;;  %v1697_v38 = vand.u32 2147483647, %v4023_v34  ;;  %vm1693_vm1 = vweird.f32 %v4023_v34  ;;  %2023 = vmatpush.msrb.mxu3 %v1986_v52 }
 0x28d   : > { %v4035_v62 = vand.u32 2147483647, %v4032_v30  ;;  %v4072_v57 = vadd.f32 %v1574_v23, %v4003_v8  ;;  %v1700_v3 = vor.u32 1.1754944e-38, %v1699_v56  ;;  %v4082_v8 = vmul.f32 0.5, %v4005_v28  ;;  %v1982_v56 = vld [vmem:[#allocation5 + $0x48] sm:$0xff]  ;;  %v1981_v23 = vld [vmem:[#allocation5 + $0x40] sm:$0xff] }
 0x28e   : > { %v1786_v19 = vadd.f32 -1.4531521, %v1778_v39  ;;  %v1676_v33 = vmul.f32 %v2761_v46, %v1675_v35  ;;  %v2017_v39 = vld [vmem:[#allocation5 + $0x160] sm:$0xff]  ;;  %vm1698_vm3 = vcmp.eq.f32.partialorder %v1697_v38, 8.507059e+37  ;;  %vm1899_vm10 = vcmp.lt.f32.partialorder %v4014_v54, 0.0 }
 0x28f   : > { %v1645_v58 = vmul.f32 0.3275911, %v4035_v62  ;;  %2082 = vmatpush.msrb.mxu0 %v2017_v39 }
 0x290   : > { %v1794_v20 = vmul.f32 %v1786_v19, %v4027_v1  ;;  %v1606_v61 = vpop.f32.mrf.mxu2  ;;  %v1677_v17 = vadd.f32 %v2761_v46, %v1676_v33  ;;  %v1870_v19 = vmul.f32 1.442695, %v1860_v4  ;;  %v2014_v4 = vld [vmem:[#allocation5 + $0x148] sm:$0xff] }
 0x291   : > { %v4041_v32 = vpop.eup %2762  ;;  %v4044_v10 = vadd.f32 %v1606_v61, %v1566_v59  ;;  %v4048_v25 = vadd.f32 1.0, %v1645_v58  ;;  %v1985_v59 = vld [vmem:[#allocation5 + $0x60] sm:$0xff]  ;;  %2083 = vmatpush.msrb.mxu0 %v2016_v6  ;;  %v1979_v6 = vld [vmem:[#allocation5 + $0x30] sm:$0xff] }
 0x292   : > { %v1802_v12 = vadd.f32 1.4214138, %v1794_v20  ;;  %v1689_v7 = vmul.f32 %v4041_v32, %v4023_v34  ;;  %v1681_v29 = vsel %vm1680_vm14, %v2761_v46, %v1677_v17  ;;  %vm1694_vm0 = vweird.f32 %v4041_v32  ;;  %2024 = vmatpush.msrb.mxu3 %v1985_v59  ;;  %v1984_v20 = vld [vmem:[#allocation5 + $0x58] sm:$0xff] }
 0x293   : > { %v4051_v0 = vsel %vm1683_vm15, %v1685_v18, %v1681_v29  ;;  %v4054_v42 = vmul.f32 0.70710677, %v4044_v10  ;;  %2764 = vrcp.f32 %v4048_v25  ;;  %vm1695_vm2 = vmor %vm1693_vm1, %vm1694_vm0  ;;  %v4100_v29 = vmul.f32 0.5, %v4011_v49  ;;  %v1980_v59 = vld [vmem:[#allocation5 + $0x38] sm:$0xff] }
 0x294   : > { %v1810_v63 = vmul.f32 %v1802_v12, %v4027_v1  ;;  %v1690_v26 = vsub.f32 1.0, %v1689_v7  ;;  %v1779_v53 = vmul.f32 1.0614054, %v4051_v0  ;;  %2766 = vpow2.f32 %v1866_v60  ;;  %2025 = vmatpush.msrb.mxu3 %v1984_v20  ;;  %v2015_v12 = vld [vmem:[#allocation5 + $0x150] sm:$0xff] }
 0x295   : > { %v4066_v45 = vand.u32 2147483647, %v4054_v42  ;;  %2768 = vpow2.f32 %v1868_v27  ;;  %v1712_v7 = vand.u32 2147483647, %v4048_v25  ;;  %2084 = vmatpush.msrb.mxu0 %v2015_v12  ;;  %v1714_v43 = vand.u32 2147483648, %v4048_v25  ;;  %v2011_v20 = vld [vmem:[#allocation5 + $0x130] sm:$0xff] }
 0x296   : > { %v1818_v48 = vadd.f32 -0.28449672, %v1810_v63  ;;  %v1691_v11 = vmul.f32 %v4041_v32, %v1690_v26  ;;  %v1787_v21 = vadd.f32 -1.4531521, %v1779_v53  ;;  %vm1708_vm6 = vweird.f32 %v4048_v25 }
 0x297   : > { %v1646_v37 = vmul.f32 0.3275911, %v4066_v45  ;;  %v4110_v49 = vmul.f32 %v4035_v62, %v4035_v62  ;;  %2085 = vmatpush.msrb.mxu0 %v2014_v4  ;;  %vm4116_vm7 = vcmp.eq.f32.partialorder %v1712_v7, 8.507059e+37  ;;  %vm1900_vm14 = vcmp.lt.f32.partialorder %v4020_v44, 0.0 }
 0x298   : > { %v1826_v40 = vmul.f32 %v1818_v48, %v4027_v1  ;;  %v1692_v51 = vadd.f32 %v4041_v32, %v1691_v11  ;;  %v1609_v46 = vpop.f32.mrf.mxu2  ;;  %v1795_v31 = vmul.f32 %v1787_v21, %v4051_v0  ;;  %v2013_v48 = vld [vmem:[#allocation5 + $0x140] sm:$0xff] }
 0x299   : > { %v4079_v41 = vpop.eup %2764  ;;  %v4086_v33 = vadd.f32 1.0, %v1646_v37  ;;  %v4096_v58 = vadd.f32 %v1609_v46, %v4038_v50  ;;  %2086 = vmatpush.msrb.mxu0 %v2013_v48  ;;  %v1976_v48 = vld [vmem:[#allocation5 + $0x18] sm:$0xff] }
 0x29a   : > { %v1834_v35 = vadd.f32 0.2548296, %v1826_v40  ;;  %v1696_v34 = vsel %vm1695_vm2, %v4041_v32, %v1692_v51  ;;  %v1803_v14 = vadd.f32 1.4214138, %v1795_v31  ;;  %v1704_v17 = vmul.f32 %v4079_v41, %v4048_v25  ;;  %v2767_v24 = vpop.eup %2766 }
 0x29b   : > { %v4084_v15 = vsel %vm1698_vm3, %v1700_v3, %v1696_v34  ;;  %2770 = vrcp.f32 %v4086_v33  ;;  %vm1709_vm5 = vweird.f32 %v4079_v41  ;;  %v4113_v16 = vmul.f32 0.70710677, %v4096_v58  ;;  %v2769_v11 = vpop.eup %2768 }
 0x29c   : > { %v1842_v61 = vmul.f32 %v1834_v35, %v4027_v1  ;;  %v1780_v32 = vmul.f32 1.0614054, %v4084_v15  ;;  %v1811_v28 = vmul.f32 %v1803_v14, %v4051_v0  ;;  %v1983_v1 = vld [vmem:[#allocation5 + $0x50] sm:$0xff]  ;;  %v1705_v47 = vsub.f32 1.0, %v1704_v17  ;;  %vm4124_vm8 = vmor %vm1708_vm6, %vm1709_vm5  ;;  %v2012_v35 = vld [vmem:[#allocation5 + $0x138] sm:$0xff] }
 0x29d   : > { %2772 = vpow2.f32 %v1870_v19  ;;  %2026 = vmatpush.msrb.mxu3 %v1983_v1  ;;  %v1715_v51 = vor.u32 1.1754944e-38, %v1714_v43  ;;  %v4129_v46 = vand.u32 2147483647, %v4113_v16  ;;  %v1727_v2 = vand.u32 2147483647, %v4086_v33  ;;  %2087 = vmatpush.msrb.mxu0 %v2012_v35  ;;  %v1978_v1 = vld [vmem:[#allocation5 + $0x28] sm:$0xff] }
 0x29e   : > { %v1882_v60 = vmul.f32 %v2767_v24, %v1842_v61  ;;  %v1788_v18 = vadd.f32 -1.4531521, %v1780_v32  ;;  %v1819_v9 = vadd.f32 -0.28449672, %v1811_v28  ;;  %v1706_v26 = vmul.f32 %v4079_v41, %v1705_v47  ;;  %v1974_v35 = vld [vmem:[#allocation5 + $0x8] sm:$0xff] }
 0x29f   : > { %2027 = vmatpush.msrb.mxu3 %v1982_v56  ;;  %v1729_v17 = vand.u32 2147483648, %v4086_v33  ;;  %2088 = vmatpush.msrb.mxu0 %v2011_v20  ;;  %vm1723_vm11 = vweird.f32 %v4086_v33  ;;  %v2009_v56 = vld [vmem:[#allocation5 + $0x120] sm:$0xff]  ;;  %vm1728_vm13 = vcmp.eq.f32.partialorder %v1727_v2, 8.507059e+37  ;;  %vm1901_vm3 = vcmp.lt.f32.partialorder %v4032_v30, 0.0 }
 0x2a0   : > { %v1890_v63 = vsub.f32 1.0, %v1882_v60  ;;  %v1796_v50 = vmul.f32 %v1788_v18, %v4084_v15  ;;  %v1612_v53 = vpop.f32.mrf.mxu2  ;;  %v1827_v13 = vmul.f32 %v1819_v9, %v4051_v0  ;;  %v1707_v55 = vadd.f32 %v4079_v41, %v1706_v26  ;;  %v2010_v60 = vld [vmem:[#allocation5 + $0x128] sm:$0xff] }
 0x2a1   : > { %v4120_v25 = vpop.eup %2770  ;;  %v4132_v52 = vadd.f32 %v1612_v53, %v4063_v22  ;;  %2028 = vmatpush.msrb.mxu3 %v1981_v23  ;;  %2089 = vmatpush.msrb.mxu0 %v2010_v60  ;;  %v1977_v53 = vld [vmem:[#allocation5 + $0x20] sm:$0xff] }
 0x2a2   : > { %v1906_v38 = vsub.f32 0.0, %v1890_v63  ;;  %v1804_v21 = vadd.f32 1.4214138, %v1796_v50  ;;  %v1835_v62 = vadd.f32 0.2548296, %v1827_v13  ;;  %v1711_v37 = vsel %vm4124_vm8, %v4079_v41, %v1707_v55 }
 0x2a3   : > { %v1719_v39 = vmul.f32 %v4120_v25, %v4086_v33  ;;  %v2773_v34 = vpop.eup %2772  ;;  %v4145_v14 = vsel %vm4116_vm7, %v1715_v51, %v1711_v37  ;;  %2029 = vmatpush.msrb.mxu3 %v1980_v59  ;;  %v4153_v12 = vmul.f32 0.70710677, %v4132_v52  ;;  %vm1724_vm9 = vweird.f32 %v4120_v25  ;;  %2090 = vmatpush.msrb.mxu0 %v2009_v56 }
 0x2a4   : > { %v1914_v31 = vsel %vm1898_vm4, %v1906_v38, %v1890_v63  ;;  %v1812_v3 = vmul.f32 %v1804_v21, %v4084_v15  ;;  %v1843_v22 = vmul.f32 %v1835_v62, %v4051_v0  ;;  %v1781_v61 = vmul.f32 1.0614054, %v4145_v14  ;;  %vm4167_vm12 = vmor %vm1723_vm11, %vm1724_vm9 }
 0x2a5   : > { %v1922_v19 = vadd.f32 1.0, %v1914_v31  ;;  %v1720_v32 = vsub.f32 1.0, %v1719_v39  ;;  %v1647_v0 = vmul.f32 0.3275911, %v4129_v46  ;;  %2030 = vmatpush.msrb.mxu3 %v1979_v6  ;;  %v4173_v23 = vand.u32 2147483647, %v4153_v12 }
 0x2a6   : > { %v1820_v41 = vadd.f32 -0.28449672, %v1812_v3  ;;  %v1883_v28 = vmul.f32 %v2769_v11, %v1843_v22  ;;  %v1789_v47 = vadd.f32 -1.4531521, %v1781_v61  ;;  %v2008_v11 = vld [vmem:[#allocation5 + $0x118] sm:$0xff]  ;;  %v1854_v51 = vmul.f32 %v4066_v45, %v4066_v45  ;;  %v1975_v31 = vld [vmem:[#allocation5 + $0x10] sm:$0xff] }
 0x2a7   : > { %v1930_v24 = vmul.f32 %v1922_v19, %v4082_v8  ;;  %v1721_v7 = vmul.f32 %v4120_v25, %v1720_v32  ;;  %v1861_v8 = vsub.f32 0.0, %v4110_v49  ;;  %v4160_v43 = vadd.f32 1.0, %v1647_v0  ;;  %2031 = vmatpush.msrb.mxu3 %v1978_v1  ;;  %2091 = vmatpush.msrb.mxu0 %v2008_v11  ;;  %v2006_v19 = vld [vmem:[#allocation5 + $0x108] sm:$0xff] }
 0x2a8   : > { %v1828_v18 = vmul.f32 %v1820_v41, %v4084_v15  ;;  %v1891_v9 = vsub.f32 1.0, %v1883_v28  ;;  %v1797_v50 = vmul.f32 %v1789_v47, %v4145_v14  ;;  %v1730_v49 = vor.u32 1.1754944e-38, %v1729_v17  ;;  %v1615_v55 = vpop.f32.mrf.mxu2  ;;  %v2005_v28 = vld [vmem:[#allocation5 + $0x100] sm:$0xff] }
 0x2a9   : > { %1942 = vst [vmem:[#allocation3 + $0x1] sm:$0xff] %v1930_v24  ;;  %v1722_v26 = vadd.f32 %v4120_v25, %v1721_v7  ;;  %2774 = vrcp.f32 %v4160_v43  ;;  %2032 = vmatpush.msrb.mxu3 %v1977_v53  ;;  %v1872_v62 = vmul.f32 1.442695, %v1861_v8  ;;  %v1648_v59 = vmul.f32 0.3275911, %v4173_v23 }
 0x2aa   : > { %v1836_v63 = vadd.f32 0.2548296, %v1828_v18  ;;  %v1907_v4 = vsub.f32 0.0, %v1891_v9  ;;  %v1805_v38 = vadd.f32 1.4214138, %v1797_v50  ;;  %v4189_v54 = vadd.f32 %v1615_v55, %v4072_v57  ;;  %v1973_v57 = vld [vmem:[#allocation5] sm:$0xff] }
 0x2ab   : > { %v1726_v21 = vsel %vm4167_vm12, %v4120_v25, %v1722_v26  ;;  %2033 = vmatpush.msrb.mxu3 %v1976_v48  ;;  %2776 = vpow2.f32 %v1872_v62  ;;  %v4192_v41 = vadd.f32 1.0, %v1648_v59  ;;  %v1620_v0 = vmul.f32 0.5, %v4017_v5 }
 0x2ac   : > { %v1844_v33 = vmul.f32 %v1836_v63, %v4084_v15  ;;  %v1915_v40 = vsel %vm1899_vm10, %v1907_v4, %v1891_v9  ;;  %v4181_v27 = vsel %vm1728_vm13, %v1730_v49, %v1726_v21  ;;  %v2007_v15 = vld [vmem:[#allocation5 + $0x110] sm:$0xff]  ;;  %v1813_v39 = vmul.f32 %v1805_v38, %v4145_v14 }
 0x2ad   : > { %v1923_v3 = vadd.f32 1.0, %v1915_v40  ;;  %v1782_v25 = vmul.f32 1.0614054, %v4181_v27  ;;  %2034 = vmatpush.msrb.mxu3 %v1975_v31  ;;  %2092 = vmatpush.msrb.mxu0 %v2007_v15  ;;  %v4195_v61 = vmul.f32 0.70710677, %v4189_v54  ;;  %2778 = vrcp.f32 %v4192_v41 }
 0x2ae   : > { %v1884_v37 = vmul.f32 %v2773_v34, %v1844_v33  ;;  %v1821_v2 = vadd.f32 -0.28449672, %v1813_v39  ;;  %v1862_v34 = vsub.f32 0.0, %v1854_v51  ;;  %v1742_v1 = vand.u32 2147483647, %v4160_v43 }
 0x2af   : > { %v1931_v45 = vmul.f32 %v1923_v3, %v4100_v29  ;;  %v1790_v6 = vadd.f32 -1.4531521, %v1782_v25  ;;  %v2775_v20 = vpop.eup %2774  ;;  %2035 = vmatpush.msrb.mxu3 %v1974_v35  ;;  %2093 = vmatpush.msrb.mxu0 %v2006_v19  ;;  %v1744_v63 = vand.u32 2147483648, %v4160_v43  ;;  %v4208_v26 = vand.u32 2147483647, %v4195_v61 }
 0x2b0   : > { %v1892_v22 = vsub.f32 1.0, %v1884_v37  ;;  %v1829_v17 = vmul.f32 %v1821_v2, %v4145_v14  ;;  %v1734_v24 = vmul.f32 %v2775_v20, %v4160_v43  ;;  %v1874_v8 = vmul.f32 1.442695, %v1862_v34 }
 0x2b1   : > { %1943 = vst [vmem:[#allocation3 + $0x9] sm:$0xff] %v1931_v45  ;;  %v1798_v29 = vmul.f32 %v1790_v6, %v4181_v27  ;;  %2036 = vmatpush.msrb.mxu3 %v1973_v57  ;;  %2094 = vmatpush.msrb.mxu0 %v2005_v28  ;;  %vm1739_vm15 = vweird.f32 %v2775_v20  ;;  %v2777_v53 = vpop.eup %2776  ;;  %vm1738_vm0 = vweird.f32 %v4160_v43  ;;  %vm4211_vm1 = vcmp.eq.f32.partialorder %v1742_v1, 8.507059e+37 }
 0x2b2   : > { %v1908_v32 = vsub.f32 0.0, %v1892_v22  ;;  %v1837_v18 = vadd.f32 0.2548296, %v1829_v17  ;;  %v1735_v7 = vsub.f32 1.0, %v1734_v24  ;;  %v1649_v11 = vmul.f32 0.3275911, %v4208_v26  ;;  %vm1740_vm2 = vmor %vm1738_vm0, %vm1739_vm15 }
 0x2b3   : > { %v1806_v47 = vadd.f32 1.4214138, %v1798_v29  ;;  %2780 = vpow2.f32 %v1874_v8  ;;  %v1745_v33 = vor.u32 1.1754944e-38, %v1744_v63  ;;  %v1855_v31 = vmul.f32 %v4129_v46, %v4129_v46 }
 0x2b4   : > { %v1916_v60 = vsel %vm1900_vm14, %v1908_v32, %v1892_v22  ;;  %v1845_v50 = vmul.f32 %v1837_v18, %v4145_v14  ;;  %v1736_v44 = vmul.f32 %v2775_v20, %v1735_v7  ;;  %v2779_v14 = vpop.eup %2778  ;;  %v4226_v15 = vadd.f32 1.0, %v1649_v11 }
 0x2b5   : > { %v1924_v9 = vadd.f32 1.0, %v1916_v60  ;;  %v1814_v5 = vmul.f32 %v1806_v47, %v4181_v27  ;;  %v1749_v62 = vmul.f32 %v2779_v14, %v4192_v41  ;;  %vm1754_vm4 = vweird.f32 %v2779_v14 }
 0x2b6   : > { %v1885_v13 = vmul.f32 %v2777_v53, %v1845_v50  ;;  %v1737_v48 = vadd.f32 %v2775_v20, %v1736_v44  ;;  %v1757_v59 = vand.u32 2147483647, %v4192_v41  ;;  %v1759_v35 = vand.u32 2147483648, %v4192_v41 }
 0x2b7   : > { %v1932_v56 = vmul.f32 %v1924_v9, %v1620_v0  ;;  %v1822_v49 = vadd.f32 -0.28449672, %v1814_v5  ;;  %v1750_v25 = vsub.f32 1.0, %v1749_v62  ;;  %2782 = vrcp.f32 %v4226_v15 }
 0x2b8   : > { %v1950_v38 = vld [vmem:[#allocation3] ss:$2 sm:$0xff]  ;;  %v1893_v55 = vsub.f32 1.0, %v1885_v13  ;;  %v1741_v40 = vsel %vm1740_vm2, %v2775_v20, %v1737_v48  ;;  %v1621_v2 = vmul.f32 0.5, %v4025_v36  ;;  %v1863_v20 = vsub.f32 0.0, %v1855_v31 }
 0x2b9   : > { %1944 = vst [vmem:[#allocation3 + $0x11] sm:$0xff] %v1932_v56  ;;  %v1958_v21 = vld [vmem:[#allocation3 + $0x2] ss:$2 sm:$0xff]  ;;  %v1830_v43 = vmul.f32 %v1822_v49, %v4181_v27  ;;  %2037 = vmatmul.f32.vlgmr.msrb.gmra.mxu3 %v1950_v38  ;;  %v4222_v51 = vsel %vm4211_vm1, %v1745_v33, %v1741_v40  ;;  %v1751_v22 = vmul.f32 %v2779_v14, %v1750_v25  ;;  %v2781_v46 = vpop.eup %2780  ;;  %vm1753_vm5 = vweird.f32 %v4192_v41  ;;  %v2002_v25 = vld [vmem:[#allocation5 + $0xe8] sm:$0xff] }
 0x2ba   : > { %2095 = vmatmul.f32.vlgmr.msrb.gmra.mxu0 %v1958_v21  ;;  %v1909_v3 = vsub.f32 0.0, %v1893_v55  ;;  %v1783_v39 = vmul.f32 1.0614054, %v4222_v51  ;;  %vm1755_vm6 = vmor %vm1753_vm5, %vm1754_vm4  ;;  %v1760_v29 = vor.u32 1.1754944e-38, %v1759_v35  ;;  %vm1758_vm7 = vcmp.eq.f32.partialorder %v1757_v59, 8.507059e+37  ;;  %v2003_v40 = vld [vmem:[#allocation5 + $0xf0] sm:$0xff] }
 0x2bb   : > { %v1838_v37 = vadd.f32 0.2548296, %v1830_v43  ;;  %v1752_v32 = vadd.f32 %v2779_v14, %v1751_v22  ;;  %v1876_v1 = vmul.f32 1.442695, %v1863_v20  ;;  %v1622_v9 = vmul.f32 0.5, %v4044_v10  ;;  %v2004_v43 = vld [vmem:[#allocation5 + $0xf8] sm:$0xff] }
 0x2bc   : > { %v1917_v30 = vsel %vm1901_vm3, %v1909_v3, %v1893_v55  ;;  %v1791_v45 = vadd.f32 -1.4531521, %v1783_v39  ;;  %vm1902_vm8 = vcmp.lt.f32.partialorder %v4054_v42, 0.0  ;;  %v1774_v53 = vand.u32 2147483648, %v4226_v15  ;;  %2050 = vmatpush.msra.mxu3 %v2004_v43 }
 0x2bd   : > { %v1846_v19 = vmul.f32 %v1838_v37, %v4181_v27  ;;  %v1925_v6 = vadd.f32 1.0, %v1917_v30  ;;  %v1856_v27 = vmul.f32 %v4173_v23, %v4173_v23  ;;  %v1756_v0 = vsel %vm1755_vm6, %v2779_v14, %v1752_v32  ;;  %v2783_v36 = vpop.eup %2782 }
 0x2be   : > { %v1799_v57 = vmul.f32 %v1791_v45, %v4222_v51  ;;  %v4239_v60 = vsel %vm1758_vm7, %v1760_v29, %v1756_v0  ;;  %v1764_v7 = vmul.f32 %v2783_v36, %v4226_v15  ;;  %2784 = vpow2.f32 %v1876_v1  ;;  %2051 = vmatpush.msra.mxu3 %v2003_v40  ;;  %v1998_v0 = vld [vmem:[#allocation5 + $0xc8] sm:$0xff] }
 0x2bf   : > { %v1886_v34 = vmul.f32 %v2781_v46, %v1846_v19  ;;  %v1933_v17 = vmul.f32 %v1925_v6, %v1621_v2  ;;  %v1784_v41 = vmul.f32 1.0614054, %v4239_v60  ;;  %v1864_v23 = vsub.f32 0.0, %v1856_v27  ;;  %v2000_v2 = vld [vmem:[#allocation5 + $0xd8] sm:$0xff] }
 0x2c0   : > { %v1807_v28 = vadd.f32 1.4214138, %v1799_v57  ;;  %v1765_v5 = vsub.f32 1.0, %v1764_v7  ;;  %vm1769_vm9 = vweird.f32 %v2783_v36  ;;  %v1772_v49 = vand.u32 2147483647, %v4226_v15  ;;  %2052 = vmatpush.msra.mxu3 %v2002_v25  ;;  %v2290_v25 = vld [vmem:[#allocation8 + $0x58] sm:$0xff] }
 0x2c1   : > { %v1894_v24 = vsub.f32 1.0, %v1886_v34  ;;  %1945 = vst [vmem:[#allocation3 + $0x19] sm:$0xff] %v1933_v17  ;;  %v1792_v50 = vadd.f32 -1.4531521, %v1784_v41  ;;  %v1878_v48 = vmul.f32 1.442695, %v1864_v23  ;;  %vm1768_vm10 = vweird.f32 %v4226_v15 }
 0x2c2   : > { %v1815_v47 = vmul.f32 %v1807_v28, %v4222_v51  ;;  %v1766_v13 = vmul.f32 %v2783_v36, %v1765_v5  ;;  %vm4251_vm11 = vmor %vm1768_vm10, %vm1769_vm9  ;;  %v1775_v21 = vor.u32 1.1754944e-38, %v1774_v53  ;;  %vm1773_vm12 = vcmp.eq.f32.partialorder %v1772_v49, 8.507059e+37  ;;  %v1994_v5 = vld [vmem:[#allocation5 + $0xa8] sm:$0xff] }
 0x2c3   : > { %v1910_v18 = vsub.f32 0.0, %v1894_v24  ;;  %v1800_v4 = vmul.f32 %v1792_v50, %v4239_v60  ;;  %v1857_v39 = vmul.f32 %v4208_v26, %v4208_v26  ;;  %2786 = vpow2.f32 %v1878_v48  ;;  %v1999_v26 = vld [vmem:[#allocation5 + $0xd0] sm:$0xff] }
 0x2c4   : > { %v1823_v63 = vadd.f32 -0.28449672, %v1815_v47  ;;  %v1767_v14 = vadd.f32 %v2783_v36, %v1766_v13  ;;  %v2785_v3 = vpop.eup %2784  ;;  %vm1903_vm13 = vcmp.lt.f32.partialorder %v4113_v16, 0.0  ;;  %v1623_v27 = vmul.f32 0.5, %v4096_v58  ;;  %v1997_v47 = vld [vmem:[#allocation5 + $0xc0] sm:$0xff]  ;;  %v1996_v16 = vld [vmem:[#allocation5 + $0xb8] sm:$0xff] }
 0x2c5   : > { %v1918_v8 = vsel %vm1902_vm8, %v1910_v18, %v1894_v24  ;;  %v1808_v11 = vadd.f32 1.4214138, %v1800_v4  ;;  %v1865_v46 = vsub.f32 0.0, %v1857_v39  ;;  %vm1904_vm14 = vcmp.lt.f32.partialorder %v4153_v12, 0.0  ;;  %v1995_v58 = vld [vmem:[#allocation5 + $0xb0] sm:$0xff]  ;;  %v1993_v4 = vld [vmem:[#allocation5 + $0xa0] sm:$0xff] }
 0x2c6   : > { %v1926_v44 = vadd.f32 1.0, %v1918_v8  ;;  %v1831_v56 = vmul.f32 %v1823_v63, %v4222_v51  ;;  %v1771_v15 = vsel %vm4251_vm11, %v2783_v36, %v1767_v14  ;;  %v1624_v63 = vmul.f32 0.5, %v4132_v52  ;;  %v1992_v12 = vld [vmem:[#allocation5 + $0x98] sm:$0xff]  ;;  %v1990_v52 = vld [vmem:[#allocation5 + $0x88] sm:$0xff]  ;;  %v2291_v39 = vld [vmem:[#allocation8 + $0x60] sm:$0xff] }
 0x2c7   : > { %v1816_v31 = vmul.f32 %v1808_v11, %v4239_v60  ;;  %v1776_v37 = vsel %vm1773_vm12, %v1775_v21, %v1771_v15  ;;  %v1880_v28 = vmul.f32 1.442695, %v1865_v46  ;;  %vm1905_vm15 = vcmp.lt.f32.partialorder %v4195_v61, 0.0  ;;  %v1989_v21 = vld [vmem:[#allocation5 + $0x80] sm:$0xff] }
 0x2c8   : > { %v1934_v10 = vmul.f32 %v1926_v44, %v1622_v9  ;;  %v1839_v42 = vadd.f32 0.2548296, %v1831_v56  ;;  %v1952_v38 = vld [vmem:[#allocation3 + $0x10] ss:$2 sm:$0xff]  ;;  %v1785_v30 = vmul.f32 1.0614054, %v1776_v37 }
 0x2c9   : > { %2040 = vmatmul.f32.gmra.mxu3 %v1952_v38  ;;  %v1960_v55 = vld [vmem:[#allocation3 + $0x12] ss:$2 sm:$0xff]  ;;  %v1824_v35 = vadd.f32 -0.28449672, %v1816_v31  ;;  %v2787_v29 = vpop.eup %2786  ;;  %2788 = vpow2.f32 %v1880_v28  ;;  %v1625_v33 = vmul.f32 0.5, %v4189_v54 }
 0x2ca   : > { %1946 = vst [vmem:[#allocation3 + $0x29] sm:$0xff] %v1934_v10  ;;  %v1847_v62 = vmul.f32 %v1839_v42, %v4222_v51  ;;  %2098 = vmatmul.f32.gmra.mxu0 %v1960_v55  ;;  %v2001_v51 = vld [vmem:[#allocation5 + $0xe0] sm:$0xff]  ;;  %v1793_v22 = vadd.f32 -1.4531521, %v1785_v30  ;;  %v1991_v42 = vld [vmem:[#allocation5 + $0x90] sm:$0xff] }
 0x2cb   : > { %v1832_v45 = vmul.f32 %v1824_v35, %v4239_v60  ;;  %2053 = vmatpush.msra.mxu3 %v2001_v51  ;;  %v1956_v31 = vld [vmem:[#allocation3 + $0x11] ss:$2 sm:$0xff]  ;;  %v2293_v54 = vld [vmem:[#allocation8 + $0x70] sm:$0xff] }
 0x2cc   : > { %v1887_v59 = vmul.f32 %v2785_v3, %v1847_v62  ;;  %v1801_v34 = vmul.f32 %v1793_v22, %v1776_v37  ;;  %v1954_v62 = vld [vmem:[#allocation3 + $0x1] ss:$2 sm:$0xff] }
 0x2cd   : > { %v1840_v20 = vadd.f32 0.2548296, %v1832_v45  ;;  %2054 = vmatpush.msra.mxu3 %v2000_v2  ;;  %v2294_v3 = vld [vmem:[#allocation8 + $0x78] sm:$0xff] }
 0x2ce   : > { %v1895_v19 = vsub.f32 1.0, %v1887_v59  ;;  %v1809_v17 = vadd.f32 1.4214138, %v1801_v34  ;;  %2311 = vmatpush.msrb.mxu1 %v2294_v3 }
 0x2cf   : > { %v1848_v32 = vmul.f32 %v1840_v20, %v4239_v60  ;;  %2055 = vmatpush.msra.mxu3 %v1999_v26  ;;  %v2789_v53 = vpop.eup %2788 }
 0x2d0   : > { %v1911_v6 = vsub.f32 0.0, %v1895_v19  ;;  %v1817_v1 = vmul.f32 %v1809_v17, %v1776_v37  ;;  %2312 = vmatpush.msrb.mxu1 %v2293_v54 }
 0x2d1   : > { %v1888_v36 = vmul.f32 %v2787_v29, %v1848_v32  ;;  %2056 = vmatpush.msra.mxu3 %v1998_v0 }
 0x2d2   : > { %v1919_v57 = vsel %vm1903_vm13, %v1911_v6, %v1895_v19  ;;  %v1825_v7 = vadd.f32 -0.28449672, %v1817_v1 }
 0x2d3   : > { %v1927_v24 = vadd.f32 1.0, %v1919_v57  ;;  %v1896_v41 = vsub.f32 1.0, %v1888_v36  ;;  %2057 = vmatpush.msra.mxu3 %v1997_v47 }
 0x2d4   : > { %v1833_v9 = vmul.f32 %v1825_v7, %v1776_v37 }
 0x2d5   : > { %v1935_v18 = vmul.f32 %v1927_v24, %v1623_v27  ;;  %v1912_v60 = vsub.f32 0.0, %v1896_v41  ;;  %2058 = vmatpush.msra.mxu3 %v1996_v16 }
 0x2d6   : > { %v1841_v8 = vadd.f32 0.2548296, %v1833_v9 }
 0x2d7   : > { %1947 = vst [vmem:[#allocation3 + $0x31] sm:$0xff] %v1935_v18  ;;  %v1920_v23 = vsel %vm1904_vm14, %v1912_v60, %v1896_v41  ;;  %2059 = vmatpush.msra.mxu3 %v1995_v58 }
 0x2d8   : > { %v1928_v50 = vadd.f32 1.0, %v1920_v23  ;;  %v1849_v44 = vmul.f32 %v1841_v8, %v1776_v37  ;;  %v2292_v37 = vld [vmem:[#allocation8 + $0x68] sm:$0xff] }
 0x2d9   : > { %2060 = vmatpush.msra.mxu3 %v1994_v5  ;;  %2313 = vmatpush.msrb.mxu1 %v2292_v37 }
 0x2da   : > { %v1936_v56 = vmul.f32 %v1928_v50, %v1624_v63  ;;  %v1889_v13 = vmul.f32 %v2789_v53, %v1849_v44 }
 0x2db   : > { %2061 = vmatpush.msra.mxu3 %v1993_v4  ;;  %2314 = vmatpush.msrb.mxu1 %v2291_v39 }
 0x2dc   : > { %1948 = vst [vmem:[#allocation3 + $0x39] sm:$0xff] %v1936_v56  ;;  %v1897_v48 = vsub.f32 1.0, %v1889_v13  ;;  %v2289_v56 = vld [vmem:[#allocation8 + $0x50] sm:$0xff]  ;;  %v2310_v13 = vld [vmem:[#allocation8 + $0xf8] sm:$0xff] }
 0x2dd   : > { %2062 = vmatpush.msra.mxu3 %v1992_v12  ;;  %2315 = vmatpush.msrb.mxu1 %v2290_v25  ;;  %v2306_v25 = vld [vmem:[#allocation8 + $0xd8] sm:$0xff] }
 0x2de   : > { %v1962_v49 = vld [vmem:[#allocation3 + $0x28] ss:$2 sm:$0xff]  ;;  %v1913_v11 = vsub.f32 0.0, %v1897_v48  ;;  %v1966_v61 = vld [vmem:[#allocation3 + $0x29] ss:$2 sm:$0xff]  ;;  %2334 = vmatpush.msra.mxu2 %v2310_v13 }
 0x2df   : > { %v1970_v10 = vld [vmem:[#allocation3 + $0x2a] ss:$2 sm:$0xff]  ;;  %2043 = vmatmul.f32.gmra.mxu3 %v1962_v49  ;;  %2316 = vmatpush.msrb.mxu1 %v2289_v56 }
 0x2e0   : > { %2101 = vmatmul.f32.gmra.mxu0 %v1970_v10  ;;  %v1921_v14 = vsel %vm1905_vm15, %v1913_v11, %v1897_v48  ;;  %2063 = vmatpush.msra.mxu3 %v1991_v42 }
 0x2e1   : > { %v1929_v38 = vadd.f32 1.0, %v1921_v14 }
 0x2e2   : > { %2064 = vmatpush.msra.mxu3 %v1990_v52  ;;  %v2309_v52 = vld [vmem:[#allocation8 + $0xf0] sm:$0xff] }
 0x2e3   : > { %v1937_v55 = vmul.f32 %v1929_v38, %v1625_v33  ;;  %2335 = vmatpush.msra.mxu2 %v2309_v52 }
 0x2e4   : > { %2065 = vmatpush.msra.mxu3 %v1989_v21 }
 0x2e5   : > { %1949 = vst [vmem:[#allocation3 + $0x41] sm:$0xff] %v1937_v55 }
 0x2e6   : > { %2607 = vmatpush.msrb.mxu3 %v2310_v13 }
 0x2e8   : > { %2608 = vmatpush.msrb.mxu3 %v2309_v52 }
 0x2ec   : > { %v1964_v43 = vld [vmem:[#allocation3 + $0x38] ss:$2 sm:$0xff]  ;;  %v1968_v15 = vld [vmem:[#allocation3 + $0x39] ss:$2 sm:$0xff] }
 0x2ed   : > { %v1972_v40 = vld [vmem:[#allocation3 + $0x3a] ss:$2 sm:$0xff]  ;;  %2046 = vmatmul.f32.gmra.mxu3 %v1964_v43 }
 0x2ee   : > { %2104 = vmatmul.f32.gmra.mxu0 %v1972_v40  ;;  %v2308_v40 = vld [vmem:[#allocation8 + $0xe8] sm:$0xff] }
 0x2ef   : > { %2336 = vmatpush.msra.mxu2 %v2308_v40  ;;  %2609 = vmatpush.msrb.mxu3 %v2308_v40 }
 0x2f5   : > { %2066 = vmatmul.f32.vlgmr.msra.gmra.mxu3 %v1954_v62 }
 0x2fd   : > { %2069 = vmatmul.f32.gmra.mxu3 %v1956_v31 }
 0x305   : > { %2072 = vmatmul.f32.gmra.mxu3 %v1966_v61 }
 0x30d   : > { %2075 = vmatmul.f32.gmra.mxu3 %v1968_v15  ;;  %v2307_v15 = vld [vmem:[#allocation8 + $0xe0] sm:$0xff] }
 0x30e   : > { %2337 = vmatpush.msra.mxu2 %v2307_v15  ;;  %2610 = vmatpush.msrb.mxu3 %v2307_v15 }
 0x310   : > { %2338 = vmatpush.msra.mxu2 %v2306_v25  ;;  %2611 = vmatpush.msrb.mxu3 %v2306_v25 }
 0x337   : > { %v2096_v22 = vpop.f32.mrf.mxu0 }
 0x33c   : > { %v2038_v59 = vpop.f32.mrf.mxu3 }
 0x347   : > { %v2099_v57 = vpop.f32.mrf.mxu0 }
 0x34c   : > { %v2041_v35 = vpop.f32.mrf.mxu3 }
 0x35d   : > { %v2102_v0 = vpop.f32.mrf.mxu0 }
 0x362   : > { %v2044_v30 = vpop.f32.mrf.mxu3 }
 0x36b   : > { %v2105_v44 = vpop.f32.mrf.mxu0 }
 0x370   : > { %v2047_v51 = vpop.f32.mrf.mxu3 }
 0x378   : > { %v2067_v19 = vpop.f32.mrf.mxu3 }
 0x379   : > { %v2068_v45 = vadd.f32 %v2067_v19, %v2038_v59 }
 0x37b   : > { %v4269_v46 = vadd.f32 %v2096_v22, %v2068_v45 }
 0x37d   : > { %v4272_v2 = vmul.f32 0.70710677, %v4269_v46 }
 0x37f   : > { %v2116_v6 = vand.u32 2147483647, %v4272_v2  ;;  %vm2248_vm13 = vcmp.lt.f32.partialorder %v4272_v2, 0.0  ;;  %v2279_v2 = vld [vmem:[#allocation8] sm:$0xff] }
 0x380   : > { %v2070_v20 = vpop.f32.mrf.mxu3 }
 0x381   : > { %v2120_v34 = vmul.f32 0.3275911, %v2116_v6  ;;  %v2071_v26 = vadd.f32 %v2070_v20, %v2041_v35  ;;  %v2224_v12 = vmul.f32 %v2116_v6, %v2116_v6  ;;  %v2305_v20 = vld [vmem:[#allocation8 + $0xd0] sm:$0xff] }
 0x382   : > { %2339 = vmatpush.msra.mxu2 %v2305_v20  ;;  %2612 = vmatpush.msrb.mxu3 %v2305_v20 }
 0x383   : > { %v2124_v32 = vadd.f32 1.0, %v2120_v34  ;;  %v4275_v17 = vadd.f32 %v2099_v57, %v2071_v26  ;;  %v2228_v55 = vsub.f32 0.0, %v2224_v12  ;;  %v2301_v12 = vld [vmem:[#allocation8 + $0xb0] sm:$0xff] }
 0x385   : > { %2790 = vrcp.f32 %v2124_v32  ;;  %v4278_v29 = vmul.f32 0.70710677, %v4275_v17  ;;  %v2139_v60 = vand.u32 2147483648, %v2124_v32  ;;  %v2137_v23 = vand.u32 2147483647, %v2124_v32 }
 0x386   : > { %vm2133_vm1 = vweird.f32 %v2124_v32  ;;  %v2232_v35 = vmul.f32 1.442695, %v2228_v55  ;;  %v2300_v55 = vld [vmem:[#allocation8 + $0xa8] sm:$0xff] }
 0x387   : > { %v4281_v27 = vand.u32 2147483647, %v4278_v29  ;;  %v2140_v53 = vor.u32 1.1754944e-38, %v2139_v60  ;;  %vm2138_vm3 = vcmp.eq.f32.partialorder %v2137_v23, 8.507059e+37 }
 0x388   : > { %v2073_v24 = vpop.f32.mrf.mxu3 }
 0x389   : > { %v2074_v28 = vadd.f32 %v2073_v24, %v2044_v30  ;;  %v2121_v36 = vmul.f32 0.3275911, %v4281_v27  ;;  %v2225_v22 = vmul.f32 %v4281_v27, %v4281_v27 }
 0x38b   : > { %v2791_v1 = vpop.eup %2790  ;;  %v4284_v18 = vadd.f32 %v2102_v0, %v2074_v28  ;;  %v4286_v41 = vadd.f32 1.0, %v2121_v36  ;;  %v2304_v28 = vld [vmem:[#allocation8 + $0xc8] sm:$0xff] }
 0x38c   : > { %v2129_v47 = vmul.f32 %v2791_v1, %v2124_v32  ;;  %vm2134_vm0 = vweird.f32 %v2791_v1  ;;  %2340 = vmatpush.msra.mxu2 %v2304_v28  ;;  %2613 = vmatpush.msrb.mxu3 %v2304_v28  ;;  %v2280_v28 = vld [vmem:[#allocation8 + $0x8] sm:$0xff] }
 0x38d   : > { %v4289_v7 = vmul.f32 0.70710677, %v4284_v18  ;;  %2792 = vrcp.f32 %v4286_v41  ;;  %vm2135_vm2 = vmor %vm2133_vm1, %vm2134_vm0  ;;  %v2154_v43 = vand.u32 2147483648, %v4286_v41  ;;  %v2152_v31 = vand.u32 2147483647, %v4286_v41 }
 0x38e   : > { %v2130_v16 = vsub.f32 1.0, %v2129_v47  ;;  %vm2148_vm5 = vweird.f32 %v4286_v41  ;;  %v2229_v47 = vsub.f32 0.0, %v2225_v22  ;;  %vm2249_vm1 = vcmp.lt.f32.partialorder %v4278_v29, 0.0 }
 0x38f   : > { %v4293_v9 = vand.u32 2147483647, %v4289_v7  ;;  %v2155_v30 = vor.u32 1.1754944e-38, %v2154_v43  ;;  %vm2153_vm7 = vcmp.eq.f32.partialorder %v2152_v31, 8.507059e+37 }
 0x390   : > { %v2131_v58 = vmul.f32 %v2791_v1, %v2130_v16  ;;  %v2076_v8 = vpop.f32.mrf.mxu3  ;;  %v2303_v16 = vld [vmem:[#allocation8 + $0xc0] sm:$0xff]  ;;  %v2234_v13 = vmul.f32 1.442695, %v2229_v47 }
 0x391   : > { %v2122_v63 = vmul.f32 0.3275911, %v4293_v9  ;;  %v2077_v5 = vadd.f32 %v2076_v8, %v2047_v51  ;;  %v2288_v51 = vld [vmem:[#allocation8 + $0x48] sm:$0xff]  ;;  %2341 = vmatpush.msra.mxu2 %v2303_v16  ;;  %2614 = vmatpush.msrb.mxu3 %v2303_v16 }
 0x392   : > { %v2132_v50 = vadd.f32 %v2791_v1, %v2131_v58  ;;  %2317 = vmatpush.msrb.mxu1 %v2288_v51  ;;  %v2282_v51 = vld [vmem:[#allocation8 + $0x18] sm:$0xff] }
 0x393   : > { %v4296_v4 = vadd.f32 1.0, %v2122_v63  ;;  %v2793_v49 = vpop.eup %2792  ;;  %v4298_v48 = vadd.f32 %v2105_v44, %v2077_v5  ;;  %v2286_v63 = vld [vmem:[#allocation8 + $0x38] sm:$0xff] }
 0x394   : > { %v2136_v10 = vsel %vm2135_vm2, %v2791_v1, %v2132_v50  ;;  %v2144_v11 = vmul.f32 %v2793_v49, %v4286_v41  ;;  %vm2149_vm4 = vweird.f32 %v2793_v49  ;;  %v2287_v41 = vld [vmem:[#allocation8 + $0x40] sm:$0xff]  ;;  %v2302_v50 = vld [vmem:[#allocation8 + $0xb8] sm:$0xff]  ;;  %vm2250_vm2 = vcmp.lt.f32.partialorder %v4289_v7, 0.0 }
 0x395   : > { %v4300_v42 = vsel %vm2138_vm3, %v2140_v53, %v2136_v10  ;;  %2794 = vrcp.f32 %v4296_v4  ;;  %v4306_v38 = vmul.f32 0.70710677, %v4298_v48  ;;  %vm2150_vm6 = vmor %vm2148_vm5, %vm2149_vm4  ;;  %v2169_v24 = vand.u32 2147483648, %v4296_v4  ;;  %2318 = vmatpush.msrb.mxu1 %v2287_v41  ;;  %v2285_v10 = vld [vmem:[#allocation8 + $0x30] sm:$0xff]  ;;  %2342 = vmatpush.msra.mxu2 %v2302_v50 }
 0x396   : > { %v2188_v14 = vmul.f32 1.0614054, %v4300_v42  ;;  %v2145_v33 = vsub.f32 1.0, %v2144_v11  ;;  %v2167_v36 = vand.u32 2147483647, %v4296_v4  ;;  %vm2163_vm9 = vweird.f32 %v4296_v4  ;;  %2615 = vmatpush.msrb.mxu3 %v2302_v50 }
 0x397   : > { %v4311_v61 = vand.u32 2147483647, %v4306_v38  ;;  %v2170_v8 = vor.u32 1.1754944e-38, %v2169_v24  ;;  %v2226_v53 = vmul.f32 %v4293_v9, %v4293_v9  ;;  %2319 = vmatpush.msrb.mxu1 %v2286_v63  ;;  %2343 = vmatpush.msra.mxu2 %v2301_v12  ;;  %v2281_v24 = vld [vmem:[#allocation8 + $0x10] sm:$0xff]  ;;  %v2295_v63 = vld [vmem:[#allocation8 + $0x80] sm:$0xff]  ;;  %vm2251_vm3 = vcmp.lt.f32.partialorder %v4306_v38, 0.0 }
 0x398   : > { %v2192_v21 = vadd.f32 -1.4531521, %v2188_v14  ;;  %v2146_v62 = vmul.f32 %v2793_v49, %v2145_v33  ;;  %vm2168_vm11 = vcmp.eq.f32.partialorder %v2167_v36, 8.507059e+37  ;;  %2616 = vmatpush.msrb.mxu3 %v2301_v12  ;;  %v2111_v7 = vmul.f32 0.5, %v4298_v48 }
 0x399   : > { %v2123_v39 = vmul.f32 0.3275911, %v4311_v61  ;;  %2320 = vmatpush.msrb.mxu1 %v2285_v10  ;;  %2344 = vmatpush.msra.mxu2 %v2300_v55 }
 0x39a   : > { %v2196_v3 = vmul.f32 %v2192_v21, %v4300_v42  ;;  %v2147_v37 = vadd.f32 %v2793_v49, %v2146_v62  ;;  %v2284_v21 = vld [vmem:[#allocation8 + $0x28] sm:$0xff]  ;;  %v2230_v62 = vsub.f32 0.0, %v2226_v53  ;;  %2617 = vmatpush.msrb.mxu3 %v2300_v55 }
 0x39b   : > { %v2795_v54 = vpop.eup %2794  ;;  %v4320_v6 = vadd.f32 1.0, %v2123_v39  ;;  %2321 = vmatpush.msrb.mxu1 %v2284_v21 }
 0x39c   : > { %v2200_v59 = vadd.f32 1.4214138, %v2196_v3  ;;  %v2159_v19 = vmul.f32 %v2795_v54, %v4296_v4  ;;  %v2151_v45 = vsel %vm2150_vm6, %v2793_v49, %v2147_v37  ;;  %vm2164_vm8 = vweird.f32 %v2795_v54  ;;  %v2283_v3 = vld [vmem:[#allocation8 + $0x20] sm:$0xff] }
 0x39d   : > { %v4323_v26 = vsel %vm2153_vm7, %v2155_v30, %v2151_v45  ;;  %2796 = vrcp.f32 %v4320_v6  ;;  %vm2165_vm10 = vmor %vm2163_vm9, %vm2164_vm8  ;;  %v2184_v15 = vand.u32 2147483648, %v4320_v6  ;;  %2322 = vmatpush.msrb.mxu1 %v2283_v3  ;;  %vm2178_vm14 = vweird.f32 %v4320_v6 }
 0x39e   : > { %v2204_v34 = vmul.f32 %v2200_v59, %v4300_v42  ;;  %v2160_v57 = vsub.f32 1.0, %v2159_v19  ;;  %v2189_v32 = vmul.f32 1.0614054, %v4323_v26  ;;  %2798 = vpow2.f32 %v2232_v35  ;;  %v2298_v19 = vld [vmem:[#allocation8 + $0x98] sm:$0xff] }
 0x39f   : > { %2800 = vpow2.f32 %v2234_v13  ;;  %v2182_v59 = vand.u32 2147483647, %v4320_v6  ;;  %v2108_v35 = vmul.f32 0.5, %v4269_v46  ;;  %v2236_v20 = vmul.f32 1.442695, %v2230_v62  ;;  %2323 = vmatpush.msrb.mxu1 %v2282_v51 }
 0x3a0   : > { %v2208_v27 = vadd.f32 -0.28449672, %v2204_v34  ;;  %v2161_v0 = vmul.f32 %v2795_v54, %v2160_v57  ;;  %v2193_v1 = vadd.f32 -1.4531521, %v2189_v32  ;;  %v2185_v32 = vor.u32 1.1754944e-38, %v2184_v15 }
 0x3a1   : > { %vm2183_vm0 = vcmp.eq.f32.partialorder %v2182_v59, 8.507059e+37  ;;  %2324 = vmatpush.msrb.mxu1 %v2281_v24  ;;  %2802 = vpow2.f32 %v2236_v20  ;;  %v2110_v15 = vmul.f32 0.5, %v4284_v18 }
 0x3a2   : > { %v2212_v60 = vmul.f32 %v2208_v27, %v4300_v42  ;;  %v2162_v58 = vadd.f32 %v2795_v54, %v2161_v0  ;;  %v2197_v23 = vmul.f32 %v2193_v1, %v4323_v26  ;;  %v2296_v1 = vld [vmem:[#allocation8 + $0x88] sm:$0xff] }
 0x3a3   : > { %v4335_v56 = vpop.eup %2796  ;;  %2325 = vmatpush.msrb.mxu1 %v2280_v28 }
 0x3a4   : > { %v2216_v5 = vadd.f32 0.2548296, %v2212_v60  ;;  %v2166_v44 = vsel %vm2165_vm10, %v2795_v54, %v2162_v58  ;;  %v2201_v4 = vadd.f32 1.4214138, %v2197_v23  ;;  %v2174_v14 = vmul.f32 %v4335_v56, %v4320_v6  ;;  %v2799_v9 = vpop.eup %2798  ;;  %v2299_v54 = vld [vmem:[#allocation8 + $0xa0] sm:$0xff]  ;;  %v2297_v6 = vld [vmem:[#allocation8 + $0x90] sm:$0xff] }
 0x3a5   : > { %v4337_v49 = vsel %vm2168_vm11, %v2170_v8, %v2166_v44  ;;  %vm2179_vm12 = vweird.f32 %v4335_v56  ;;  %2345 = vmatpush.msra.mxu2 %v2299_v54  ;;  %2618 = vmatpush.msrb.mxu3 %v2299_v54  ;;  %v2801_v47 = vpop.eup %2800  ;;  %v2227_v58 = vmul.f32 %v4311_v61, %v4311_v61 }
 0x3a6   : > { %v2220_v11 = vmul.f32 %v2216_v5, %v4300_v42  ;;  %v2190_v52 = vmul.f32 1.0614054, %v4337_v49  ;;  %v2205_v33 = vmul.f32 %v2201_v4, %v4323_v26  ;;  %v2175_v31 = vsub.f32 1.0, %v2174_v14  ;;  %vm4356_vm15 = vmor %vm2178_vm14, %vm2179_vm12  ;;  %2326 = vmatpush.msrb.mxu1 %v2279_v2 }
 0x3a7   : > { %2346 = vmatpush.msra.mxu2 %v2298_v19  ;;  %2619 = vmatpush.msrb.mxu3 %v2298_v19 }
 0x3a8   : > { %v2240_v43 = vmul.f32 %v2799_v9, %v2220_v11  ;;  %v2194_v40 = vadd.f32 -1.4531521, %v2190_v52  ;;  %v2209_v42 = vadd.f32 -0.28449672, %v2205_v33  ;;  %v2176_v25 = vmul.f32 %v4335_v56, %v2175_v31  ;;  %v2803_v11 = vpop.eup %2802 }
 0x3a9   : > { %2347 = vmatpush.msra.mxu2 %v2297_v6  ;;  %2620 = vmatpush.msrb.mxu3 %v2297_v6  ;;  %v2109_v9 = vmul.f32 0.5, %v4275_v17 }
 0x3aa   : > { %v2244_v37 = vsub.f32 1.0, %v2240_v43  ;;  %v2198_v39 = vmul.f32 %v2194_v40, %v4337_v49  ;;  %v2213_v30 = vmul.f32 %v2209_v42, %v4323_v26  ;;  %v2177_v34 = vadd.f32 %v4335_v56, %v2176_v25 }
 0x3ab   : > { %2348 = vmatpush.msra.mxu2 %v2296_v1  ;;  %2621 = vmatpush.msrb.mxu3 %v2296_v1 }
 0x3ac   : > { %v2252_v45 = vsub.f32 0.0, %v2244_v37  ;;  %v2202_v22 = vadd.f32 1.4214138, %v2198_v39  ;;  %v2217_v46 = vadd.f32 0.2548296, %v2213_v30  ;;  %v2181_v36 = vsel %vm4356_vm15, %v4335_v56, %v2177_v34 }
 0x3ad   : > { %v2186_v60 = vsel %vm2183_vm0, %v2185_v32, %v2181_v36  ;;  %v2231_v56 = vsub.f32 0.0, %v2227_v58  ;;  %2349 = vmatpush.msra.mxu2 %v2295_v63  ;;  %2622 = vmatpush.msrb.mxu3 %v2295_v63 }
 0x3ae   : > { %v2256_v27 = vsel %vm2248_vm13, %v2252_v45, %v2244_v37  ;;  %v2206_v0 = vmul.f32 %v2202_v22, %v4337_v49  ;;  %v2221_v16 = vmul.f32 %v2217_v46, %v4323_v26  ;;  %v2191_v8 = vmul.f32 1.0614054, %v2186_v60 }
 0x3af   : > { %v2260_v41 = vadd.f32 1.0, %v2256_v27  ;;  %v2238_v14 = vmul.f32 1.442695, %v2231_v56 }
 0x3b0   : > { %v2210_v23 = vadd.f32 -0.28449672, %v2206_v0  ;;  %v2241_v5 = vmul.f32 %v2801_v47, %v2221_v16  ;;  %v2195_v53 = vadd.f32 -1.4531521, %v2191_v8 }
 0x3b1   : > { %v2264_v50 = vmul.f32 %v2260_v41, %v2108_v35  ;;  %2804 = vpow2.f32 %v2238_v14 }
 0x3b2   : > { %v2214_v44 = vmul.f32 %v2210_v23, %v4337_v49  ;;  %v2245_v26 = vsub.f32 1.0, %v2241_v5  ;;  %v2199_v4 = vmul.f32 %v2195_v53, %v2186_v60 }
 0x3b3   : > { %2268 = vst [vmem:[#allocation4] sm:$0xff] %v2264_v50 }
 0x3b4   : > { %v2218_v61 = vadd.f32 0.2548296, %v2214_v44  ;;  %v2253_v13 = vsub.f32 0.0, %v2245_v26  ;;  %v2203_v12 = vadd.f32 1.4214138, %v2199_v4 }
 0x3b6   : > { %v2222_v10 = vmul.f32 %v2218_v61, %v4337_v49  ;;  %v2257_v52 = vsel %vm2249_vm1, %v2253_v13, %v2245_v26  ;;  %v2207_v55 = vmul.f32 %v2203_v12, %v2186_v60 }
 0x3b7   : > { %v2261_v33 = vadd.f32 1.0, %v2257_v52  ;;  %v2805_v37 = vpop.eup %2804 }
 0x3b8   : > { %v2242_v21 = vmul.f32 %v2803_v11, %v2222_v10  ;;  %v2211_v62 = vadd.f32 -0.28449672, %v2207_v55 }
 0x3b9   : > { %v2265_v43 = vmul.f32 %v2261_v33, %v2109_v9 }
 0x3ba   : > { %v2246_v40 = vsub.f32 1.0, %v2242_v21  ;;  %v2215_v42 = vmul.f32 %v2211_v62, %v2186_v60 }
 0x3bb   : > { %2269 = vst [vmem:[#allocation4 + $0x8] sm:$0xff] %v2265_v43 }
 0x3bc   : > { %v2254_v31 = vsub.f32 0.0, %v2246_v40  ;;  %v2219_v49 = vadd.f32 0.2548296, %v2215_v42 }
 0x3be   : > { %v2258_v29 = vsel %vm2250_vm2, %v2254_v31, %v2246_v40  ;;  %v2223_v54 = vmul.f32 %v2219_v49, %v2186_v60 }
 0x3bf   : > { %v2262_v3 = vadd.f32 1.0, %v2258_v29 }
 0x3c0   : > { %v2243_v39 = vmul.f32 %v2805_v37, %v2223_v54 }
 0x3c1   : > { %v2266_v17 = vmul.f32 %v2262_v3, %v2110_v15 }
 0x3c2   : > { %v2272_v25 = vld [vmem:[#allocation4] ss:$2 sm:$0xff]  ;;  %v2274_v59 = vld [vmem:[#allocation4 + $0x1] ss:$2 sm:$0xff]  ;;  %v2247_v35 = vsub.f32 1.0, %v2243_v39 }
 0x3c3   : > { %2270 = vst [vmem:[#allocation4 + $0x10] sm:$0xff] %v2266_v17  ;;  %2327 = vmatmul.f32.vlgmr.msrb.gmra.mxu1 %v2272_v25  ;;  %2350 = vmatmul.f32.vlgmr.msra.gmra.mxu2 %v2274_v59 }
 0x3c4   : > { %v2255_v30 = vsub.f32 0.0, %v2247_v35 }
 0x3c6   : > { %v2259_v51 = vsel %vm2251_vm3, %v2255_v30, %v2247_v35 }
 0x3c7   : > { %v2263_v19 = vadd.f32 1.0, %v2259_v51 }
 0x3c9   : > { %v2267_v45 = vmul.f32 %v2263_v19, %v2111_v7 }
 0x3cb   : > { %2271 = vst [vmem:[#allocation4 + $0x18] sm:$0xff] %v2267_v45 }
 0x3d2   : > { %v2276_v18 = vld [vmem:[#allocation4 + $0x10] ss:$2 sm:$0xff]  ;;  %v2278_v22 = vld [vmem:[#allocation4 + $0x11] ss:$2 sm:$0xff] }
 0x3d3   : > { %2330 = vmatmul.f32.gmra.mxu1 %v2276_v18  ;;  %2353 = vmatmul.f32.vlgmr.msrb.gmra.mxu3 %v2278_v22 }
 0x440   : > { %v2328_v20 = vpop.f32.mrf.mxu1 }
 0x446   : > { %v2351_v34 = vpop.f32.mrf.mxu2 }
 0x447   : > { %v4377_v57 = vadd.f32 %v2351_v34, %v2328_v20 }
 0x449   : > { %v4380_v46 = vmul.f32 0.70710677, %v4377_v57  ;;  %v2357_v51 = vmul.f32 0.5, %v4377_v57 }
 0x44b   : > { %v2361_v32 = vand.u32 2147483647, %v4380_v46  ;;  %vm2427_vm12 = vcmp.lt.f32.partialorder %v4380_v46, 0.0 }
 0x44d   : > { %v2363_v38 = vmul.f32 0.3275911, %v2361_v32  ;;  %v2415_v5 = vmul.f32 %v2361_v32, %v2361_v32 }
 0x44f   : > { %v2365_v24 = vadd.f32 1.0, %v2363_v38  ;;  %v2417_v26 = vsub.f32 0.0, %v2415_v5 }
 0x450   : > { %v2331_v6 = vpop.f32.mrf.mxu1 }
 0x451   : > { %2806 = vrcp.f32 %v2365_v24  ;;  %v2378_v47 = vand.u32 2147483648, %v2365_v24  ;;  %v2376_v16 = vand.u32 2147483647, %v2365_v24  ;;  %vm2372_vm5 = vweird.f32 %v2365_v24 }
 0x452   : > { %v2419_v13 = vmul.f32 1.442695, %v2417_v26 }
 0x453   : > { %v2379_v23 = vor.u32 1.1754944e-38, %v2378_v47  ;;  %vm2377_vm7 = vcmp.eq.f32.partialorder %v2376_v16, 8.507059e+37 }
 0x456   : > { %v2354_v28 = vpop.f32.mrf.mxu3 }
 0x457   : > { %v2807_v48 = vpop.eup %2806  ;;  %v4383_v0 = vadd.f32 %v2354_v28, %v2331_v6 }
 0x458   : > { %v2368_v27 = vmul.f32 %v2807_v48, %v2365_v24  ;;  %vm2373_vm4 = vweird.f32 %v2807_v48 }
 0x459   : > { %v4386_v1 = vmul.f32 0.70710677, %v4383_v0  ;;  %vm2374_vm6 = vmor %vm2372_vm5, %vm2373_vm4 }
 0x45a   : > { %v2369_v36 = vsub.f32 1.0, %v2368_v27 }
 0x45b   : > { %v2362_v60 = vand.u32 2147483647, %v4386_v1  ;;  %vm2428_vm13 = vcmp.lt.f32.partialorder %v4386_v1, 0.0 }
 0x45c   : > { %v2370_v41 = vmul.f32 %v2807_v48, %v2369_v36 }
 0x45d   : > { %v2364_v2 = vmul.f32 0.3275911, %v2362_v60  ;;  %v2416_v29 = vmul.f32 %v2362_v60, %v2362_v60 }
 0x45e   : > { %v2371_v58 = vadd.f32 %v2807_v48, %v2370_v41 }
 0x45f   : > { %v2366_v63 = vadd.f32 1.0, %v2364_v2  ;;  %v2418_v17 = vsub.f32 0.0, %v2416_v29 }
 0x460   : > { %v2375_v8 = vsel %vm2374_vm6, %v2807_v48, %v2371_v58  ;;  %v2358_v48 = vmul.f32 0.5, %v4383_v0 }
 0x461   : > { %v2380_v50 = vsel %vm2377_vm7, %v2379_v23, %v2375_v8  ;;  %2808 = vrcp.f32 %v2366_v63  ;;  %v2393_v14 = vand.u32 2147483648, %v2366_v63  ;;  %v2391_v33 = vand.u32 2147483647, %v2366_v63 }
 0x462   : > { %v2397_v44 = vmul.f32 1.0614054, %v2380_v50  ;;  %2810 = vpow2.f32 %v2419_v13  ;;  %vm2387_vm9 = vweird.f32 %v2366_v63  ;;  %v2421_v30 = vmul.f32 1.442695, %v2418_v17 }
 0x463   : > { %v2394_v40 = vor.u32 1.1754944e-38, %v2393_v14  ;;  %vm2392_vm11 = vcmp.eq.f32.partialorder %v2391_v33, 8.507059e+37 }
 0x464   : > { %v2399_v53 = vadd.f32 -1.4531521, %v2397_v44  ;;  %2812 = vpow2.f32 %v2421_v30 }
 0x466   : > { %v2401_v56 = vmul.f32 %v2399_v53, %v2380_v50 }
 0x467   : > { %v2809_v61 = vpop.eup %2808 }
 0x468   : > { %v2403_v4 = vadd.f32 1.4214138, %v2401_v56  ;;  %v2383_v10 = vmul.f32 %v2809_v61, %v2366_v63  ;;  %vm2388_vm8 = vweird.f32 %v2809_v61  ;;  %v2811_v49 = vpop.eup %2810 }
 0x469   : > { %vm2389_vm10 = vmor %vm2387_vm9, %vm2388_vm8 }
 0x46a   : > { %v2405_v12 = vmul.f32 %v2403_v4, %v2380_v50  ;;  %v2384_v11 = vsub.f32 1.0, %v2383_v10  ;;  %v2813_v32 = vpop.eup %2812 }
 0x46c   : > { %v2407_v52 = vadd.f32 -0.28449672, %v2405_v12  ;;  %v2385_v9 = vmul.f32 %v2809_v61, %v2384_v11 }
 0x46e   : > { %v2409_v21 = vmul.f32 %v2407_v52, %v2380_v50  ;;  %v2386_v55 = vadd.f32 %v2809_v61, %v2385_v9 }
 0x470   : > { %v2411_v43 = vadd.f32 0.2548296, %v2409_v21  ;;  %v2390_v62 = vsel %vm2389_vm10, %v2809_v61, %v2386_v55 }
 0x471   : > { %v2395_v42 = vsel %vm2392_vm11, %v2394_v40, %v2390_v62 }
 0x472   : > { %v2413_v31 = vmul.f32 %v2411_v43, %v2380_v50  ;;  %v2398_v15 = vmul.f32 1.0614054, %v2395_v42 }
 0x474   : > { %v2423_v3 = vmul.f32 %v2811_v49, %v2413_v31  ;;  %v2400_v54 = vadd.f32 -1.4531521, %v2398_v15 }
 0x476   : > { %v2425_v37 = vsub.f32 1.0, %v2423_v3  ;;  %v2402_v39 = vmul.f32 %v2400_v54, %v2395_v42 }
 0x478   : > { %v2429_v25 = vsub.f32 0.0, %v2425_v37  ;;  %v2404_v59 = vadd.f32 1.4214138, %v2402_v39 }
 0x47a   : > { %v2431_v35 = vsel %vm2427_vm12, %v2429_v25, %v2425_v37  ;;  %v2406_v19 = vmul.f32 %v2404_v59, %v2395_v42 }
 0x47b   : > { %v2433_v7 = vadd.f32 1.0, %v2431_v35 }
 0x47c   : > { %v2408_v18 = vadd.f32 -0.28449672, %v2406_v19 }
 0x47d   : > { %v2435_v45 = vmul.f32 %v2433_v7, %v2357_v51 }
 0x47e   : > { %v2410_v22 = vmul.f32 %v2408_v18, %v2395_v42 }
 0x47f   : > { %2437 = vst [vmem:[%s308_s14] sm:$0xff] %v2435_v45 }
 0x480   : > { %v2412_v20 = vadd.f32 0.2548296, %v2410_v22 }
 0x482   : > { %v2414_v34 = vmul.f32 %v2412_v20, %v2395_v42 }
 0x484   : > { %v2424_v38 = vmul.f32 %v2813_v32, %v2414_v34 }
 0x486   : > { %v2426_v46 = vsub.f32 1.0, %v2424_v38 }
 0x488   : > { %v2430_v57 = vsub.f32 0.0, %v2426_v46 }
 0x48a   : > { %v2432_v24 = vsel %vm2428_vm13, %v2430_v57, %v2426_v46 }
 0x48b   : > { %v2434_v6 = vadd.f32 1.0, %v2432_v24 }
 0x48d   : > { %v2436_v28 = vmul.f32 %v2434_v6, %v2358_v48 }
 0x48f   : > { %2438 = vst [vmem:[%s308_s14 + $0x8] sm:$0xff] %v2436_v28 }
 0x490   : > { %2902 = shalt.err (!%p2899_p8)
}
 0x491   : > { %s2952_s8 = smov 128   ;;  %s2953_s14 = smov 8  }
 0x492   : > { %2632 = dma.vmem_to_hbm [thread:$0]  (%p3032_p5), %s2453_s18, 256, %s2455_s19, %s2440_s28, %s2952_s8, %s2952_s8, %s2953_s14  }
 0x493 PF: > { %p2649_p9 = scmp.ge.s32.totalorder %s2945_s27, 2  ;;  %s2469_s15 = sand.u32 1, %s2933_s24  }
 0x494   : > { %s2470_s16 = scalar_lea.sflag [#allocation7], %s2469_s15 }
 0x495   : > { %p2642_p10 = pnand %p2649_p9, %p3036_p6 }
 0x497   : > { %p2643_p11 = pneg %p2642_p10 }
 0x499   : > { %2928 = dma.done.wait (%p2643_p11), %s2470_s16, 256  }
 0x49a   : > { %2930 = vsyncadd (%p2643_p11), %s2470_s16, 4294967040  ;;  %p19_p12 = scmp.ge.s32.totalorder %s3019_s30, 6   ;;  %s4472_s24 = smov %s2937_s25 }
 0x49b   : > { %s4473_s25 = smov %s2941_s26  ;;  %s4474_s26 = smov %s3030_s10 }
 0x49c   : > { %s4475_s27 = smov %s3019_s30  ;;  %21 = sbr.rel (!%p19_p12) target bundleno = 5 (0x5), region = 129 }
 0x4a1   :  { %2476 = vsyncpa [#allocation6], 1 }
 0x4a2   :  { %2478 = vsyncpa [#allocation6 + $0x1], 1 }
 0x4a3   :  { %2479 = vsyncpa [#allocation9], 1 }
 0x4a4   :  { %2480 = vsyncpa [#allocation7], 1 }
 0x4a5   :  { %2482 = vsyncpa [#allocation7 + $0x1], 1 }

</bundles_post_ra>
